<compile_context>
chip_gen: v5e
topology: v5e:2x2
jax: 0.10.0
libtpu: 0.0.40
codegen_flags: <defaults>
</compile_context>

<pallas_src>
import functools

import numpy as np
import jax
import jax.numpy as jnp
from jax.experimental import pallas as pl
from jax.experimental.pallas import tpu as pltpu

# ----------------------------- configuration -------------------------------
B = 2              # batch
NTILE = 6          # cubed-sphere tiles
NX = 4             # nx (grid points per tile edge)
C_IN = 4           # node_in_channels
H = 32             # node_hidden_channels
EH = 16            # edge_hidden_channels
K = 4              # fixed in-degree of the synthetic graph
STEPS = 2          # num_step_message_passing
EDGE_FEAT = 4      # edge_relation feature width (one-hot direction)
N_NODES = NTILE * NX * NX          # 96
# aggregator = "mean" (DGL NNConv mean over incoming edges; degree is constant K)


# ------------------------------ Pallas kernels ------------------------------
def _edge_net_kernel(df_ref, w1_ref, b1_ref, w2_ref, b2_ref, o_ref):
    # edge_network applied once to the K distinct one-hot direction features:
    #   Linear(EDGE_FEAT, EH) -> ReLU -> Linear(EH, H*H)
    h = jnp.dot(df_ref[...], w1_ref[...], preferred_element_type=jnp.float32)
    h = jnp.maximum(h + b1_ref[...], 0.0)
    w = jnp.dot(h, w2_ref[...], preferred_element_type=jnp.float32) + b2_ref[...]
    o_ref[...] = w


def edge_net_pallas(dir_feats, w1, b1, w2, b2):
    kdirs = dir_feats.shape[0]
    return pl.pallas_call(
        _edge_net_kernel,
        out_shape=jax.ShapeDtypeStruct((kdirs, H * H), jnp.float32),
        grid_spec=pltpu.PrefetchScalarGridSpec(
            num_scalar_prefetch=0,
            grid=(1,),
            in_specs=[
                pl.BlockSpec((kdirs, EDGE_FEAT), lambda i: (0, 0)),
                pl.BlockSpec((EDGE_FEAT, EH), lambda i: (0, 0)),
                pl.BlockSpec((1, EH), lambda i: (0, 0)),
                pl.BlockSpec((EH, H * H), lambda i: (0, 0)),
                pl.BlockSpec((1, H * H), lambda i: (0, 0)),
            ],
            out_specs=pl.BlockSpec((kdirs, H * H), lambda i: (0, 0)),
        ),
        compiler_params=pltpu.CompilerParams(dimension_semantics=("arbitrary",)),
    )(dir_feats, w1, b1.reshape(1, EH), w2, b2.reshape(1, H * H))


def _mpnn_fused_kernel(x_ref, pw1_ref, pb1_ref, pw2_ref, pb2_ref,
                       gmat_ref, wdir_ref, cb_ref,
                       wi_ref, wh_ref, bi_ref, bh_ref, o_ref,
                       *, hidden, k_deg, steps):
    f32 = jnp.float32
    bf16 = jnp.bfloat16
    inv_k = 1.0 / k_deg

    # ---- project_node_features: Linear -> ReLU -> Linear (all N rows at once)
    x = x_ref[0].astype(bf16)                                       # (N, C_IN)
    nf = jnp.dot(x, pw1_ref[...], preferred_element_type=f32) + pb1_ref[...]
    nf = jnp.maximum(nf, 0.0)
    nf = jnp.dot(nf.astype(bf16), pw2_ref[...],
                 preferred_element_type=f32) + pb2_ref[...]          # (N, H) f32

    node = nf
    h = nf
    # STEPS is small & static -> unrolled; node/h stay VMEM/vreg resident.
    for _ in range(steps):
        nb = node.astype(bf16)
        # NNConv('mean'): with one-hot direction edge features the per-edge
        # weight matrix depends only on direction k, so
        #   agg_v = (1/K) * sum_k node[nbr_k(v)] @ W_k + bias
        # the gather is an MXU matmul with a one-hot gather matrix G_k.
        acc = jnp.zeros((nb.shape[0], hidden), f32)
        for k in range(k_deg):
            g = jnp.dot(gmat_ref[k], nb, preferred_element_type=f32)     # gather
            acc = acc + jnp.dot(g.astype(bf16), wdir_ref[k],
                                preferred_element_type=f32)              # message
        m = jnp.maximum(acc * inv_k + cb_ref[...], 0.0)   # + bias, then self.relu

        # GRU cell (PyTorch gate order r, z, n):  h' = (1-z)*n + z*h
        # (gi and gh kept separate: the n-gate needs gi_n + r*gh_n)
        gi = jnp.dot(m.astype(bf16), wi_ref[...],
                     preferred_element_type=f32) + bi_ref[...]
        gh = jnp.dot(h.astype(bf16), wh_ref[...],
                     preferred_element_type=f32) + bh_ref[...]
        r = jax.nn.sigmoid(gi[:, 0:hidden] + gh[:, 0:hidden])
        z = jax.nn.sigmoid(gi[:, hidden:2 * hidden] + gh[:, hidden:2 * hidden])
        n = jnp.tanh(gi[:, 2 * hidden:3 * hidden] + r * gh[:, 2 * hidden:3 * hidden])
        h = (1.0 - z) * n + z * h
        node = h

    o_ref[0] = node.astype(o_ref.dtype)


def mpnn_fused_pallas(x, params, gmat, w_dir):
    b, n, _ = x.shape
    c2 = lambda i: (0, 0)
    c3 = lambda i: (0, 0, 0)
    return pl.pallas_call(
        functools.partial(_mpnn_fused_kernel, hidden=H, k_deg=K, steps=STEPS),
        out_shape=jax.ShapeDtypeStruct((b, n, H), jnp.float32),
        grid_spec=pltpu.PrefetchScalarGridSpec(
            num_scalar_prefetch=0,
            grid=(b,),                                  # batch = parallel axis (v7x 2 TCs)
            in_specs=[
                pl.BlockSpec((1, n, C_IN), lambda i: (i, 0, 0)),   # x
                pl.BlockSpec((C_IN, H), c2),                       # proj_w1 (bf16)
                pl.BlockSpec((1, H), c2),                          # proj_b1
                pl.BlockSpec((H, H), c2),                          # proj_w2 (bf16)
                pl.BlockSpec((1, H), c2),                          # proj_b2
                pl.BlockSpec((K, n, n), c3),                       # gather matrices (bf16)
                pl.BlockSpec((K, H, H), c3),                       # W_k direction weights (bf16)
                pl.BlockSpec((1, H), c2),                          # conv bias
                pl.BlockSpec((H, 3 * H), c2),                      # gru W_ih^T (bf16)
                pl.BlockSpec((H, 3 * H), c2),                      # gru W_hh^T (bf16)
                pl.BlockSpec((1, 3 * H), c2),                      # gru b_ih
                pl.BlockSpec((1, 3 * H), c2),                      # gru b_hh
            ],
            out_specs=pl.BlockSpec((1, n, H), lambda i: (i, 0, 0)),
        ),
        compiler_params=pltpu.CompilerParams(dimension_semantics=("parallel",)),
    )(x,
      params["proj_w1"], params["proj_b1"].reshape(1, H),
      params["proj_w2"], params["proj_b2"].reshape(1, H),
      gmat, w_dir,
      params["conv_bias"].reshape(1, H),
      params["gru_wi"], params["gru_wh"],
      params["gru_bi"].reshape(1, 3 * H), params["gru_bh"].reshape(1, 3 * H))


# ------------------------------- graph (glue) --------------------------------
def build_graph(ntile, nx):
    """Synthetic stand-in for build_dgl_graph_with_edge: every node has K=4
    incoming edges from its grid neighbours (periodic within each tile) with a
    one-hot 'direction' edge feature.  Returned as K one-hot gather matrices
    (so the in-kernel gather is an MXU matmul) plus the K distinct direction
    feature vectors (the edge network only needs to run on those)."""
    # TODO(synk): the real build_dgl_graph_with_edge stitches tiles across
    # cubed-sphere seams; here each tile is an independent periodic grid.
    n = ntile * nx * nx
    idx = np.arange(n).reshape(ntile, nx, nx)
    gmat = np.zeros((K, n, n), dtype=np.float32)
    for t in range(ntile):
        for i in range(nx):
            for j in range(nx):
                v = idx[t, i, j]
                nbrs = (idx[t, (i - 1) % nx, j], idx[t, (i + 1) % nx, j],
                        idx[t, i, (j - 1) % nx], idx[t, i, (j + 1) % nx])
                for k in range(K):
                    gmat[k, v, nbrs[k]] = 1.0
    dir_feats = np.eye(K, EDGE_FEAT, dtype=np.float32)   # one-hot direction feats
    # one-hot matrices are exact in bf16 -> feed the MXU directly in bf16
    return jnp.asarray(gmat, jnp.bfloat16), jnp.asarray(dir_feats)


# ----------------------------- parameters (glue) -----------------------------
def init_params(key):
    ks = jax.random.split(key, 12)

    def rnd(k, shape, scale, dtype=jnp.float32):
        return (jax.random.normal(k, shape, jnp.float32) * scale).astype(dtype)

    bf16 = jnp.bfloat16
    return {
        # project_node_features: Linear(C_IN,H) -> ReLU -> Linear(H,H)
        "proj_w1": rnd(ks[0], (C_IN, H), 1.0 / np.sqrt(C_IN), bf16),
        "proj_b1": rnd(ks[1], (H,), 0.1),
        "proj_w2": rnd(ks[2], (H, H), 1.0 / np.sqrt(H), bf16),
        "proj_b2": rnd(ks[3], (H,), 0.1),
        # edge_network: Linear(EDGE_FEAT,EH) -> ReLU -> Linear(EH, H*H)
        "edge_w1": rnd(ks[4], (EDGE_FEAT, EH), 1.0 / np.sqrt(EDGE_FEAT)),
        "edge_b1": rnd(ks[5], (EH,), 0.1),
        "edge_w2": rnd(ks[6], (EH, H * H), 0.1 / np.sqrt(EH)),
        "edge_b2": rnd(ks[7], (H * H,), 0.01),
        # NNConv bias (DGL zero-inits it)
        "conv_bias": jnp.zeros((H,), jnp.float32),
        # GRU(H,H): stored already transposed as (H, 3H), gate order (r,z,n)
        "gru_wi": rnd(ks[8], (H, 3 * H), 1.0 / np.sqrt(H), bf16),
        "gru_wh": rnd(ks[9], (H, 3 * H), 1.0 / np.sqrt(H), bf16),
        "gru_bi": rnd(ks[10], (3 * H,), 0.1),
        "gru_bh": rnd(ks[11], (3 * H,), 0.1),
    }


# ------------------------------- forward pass --------------------------------
def mpnn_forward(inputs, params, gmat, dir_feats):
    # edge_relation is fixed at model construction time, so the NNConv edge
    # network runs once on the K distinct direction features -> K (H,H) mats.
    w_dir = edge_net_pallas(dir_feats, params["edge_w1"], params["edge_b1"],
                            params["edge_w2"], params["edge_b2"])
    w_dir = w_dir.reshape(K, H, H).astype(jnp.bfloat16)

    x = inputs.reshape(inputs.shape[0], N_NODES, C_IN)
    out = mpnn_fused_pallas(x, params, gmat, w_dir)          # (B, N, H)
    return out.reshape(inputs.shape[0], NTILE, NX, NX, H)


# ---------------------------------- main --------------------------------------
if __name__ == "__main__":
    key = jax.random.PRNGKey(0)
    kp, kx = jax.random.split(key)
    params = init_params(kp)
    gmat, dir_feats = build_graph(NTILE, NX)
    inputs = jax.random.normal(kx, (B, NTILE, NX, NX, C_IN), jnp.float32)

    fwd = jax.jit(lambda xx: mpnn_forward(xx, params, gmat, dir_feats))
    out = fwd(inputs)
    jax.block_until_ready(out)
    assert out.shape == (B, NTILE, NX, NX, H), out.shape
    assert bool(jnp.all(jnp.isfinite(out)))
    print("KERNEL_OK")
</pallas_src>

<mosaic_0001>
module attributes {stable_mosaic.version = 11 : i64} {
  func.func @_edge_net_kernel(%arg0: i32, %arg1: memref<4x4xf32, #tpu.memory_space<vmem>>, %arg2: memref<4x16xf32, #tpu.memory_space<vmem>>, %arg3: memref<1x16xf32, #tpu.memory_space<vmem>>, %arg4: memref<16x1024xf32, #tpu.memory_space<vmem>>, %arg5: memref<1x1024xf32, #tpu.memory_space<vmem>>, %arg6: memref<4x1024xf32, #tpu.memory_space<vmem>>) attributes {dimension_semantics = [#tpu.dimension_semantics<arbitrary>], iteration_bounds = array<i64: 1>, scalar_prefetch = 0 : i64, scratch_operands = 0 : i64, tpu.core_type = #tpu.core_type<tc>, window_params = [{pipeline_mode = #tpu.pipeline_mode<synchronous>, transform_indices = @transform_0, window_bounds = array<i64: 4, 4>}, {pipeline_mode = #tpu.pipeline_mode<synchronous>, transform_indices = @transform_1, window_bounds = array<i64: 4, 16>}, {pipeline_mode = #tpu.pipeline_mode<synchronous>, transform_indices = @transform_2, window_bounds = array<i64: 1, 16>}, {pipeline_mode = #tpu.pipeline_mode<synchronous>, transform_indices = @transform_3, window_bounds = array<i64: 16, 1024>}, {pipeline_mode = #tpu.pipeline_mode<synchronous>, transform_indices = @transform_4, window_bounds = array<i64: 1, 1024>}, {pipeline_mode = #tpu.pipeline_mode<synchronous>, transform_indices = @transform_5, window_bounds = array<i64: 4, 1024>}]} {
    %c0 = arith.constant 0 : index
    %c0_0 = arith.constant 0 : index
    %0 = vector.load %arg1[%c0, %c0_0] : memref<4x4xf32, #tpu.memory_space<vmem>>, vector<4x4xf32>
    %c0_1 = arith.constant 0 : index
    %c0_2 = arith.constant 0 : index
    %1 = vector.load %arg2[%c0_1, %c0_2] : memref<4x16xf32, #tpu.memory_space<vmem>>, vector<4x16xf32>
    %cst = arith.constant dense<0.000000e+00> : vector<4x16xf32>
    %2 = tpu.matmul %0, %1, %cst {dimension_numbers = #tpu.dot_dimension_numbers<[1], [0], [0], [1], [0, 0, 1, 1], [], []>} : vector<4x4xf32>, vector<4x16xf32>, vector<4x16xf32> -> vector<4x16xf32>
    %c0_3 = arith.constant 0 : index
    %c0_4 = arith.constant 0 : index
    %3 = vector.load %arg3[%c0_3, %c0_4] : memref<1x16xf32, #tpu.memory_space<vmem>>, vector<1x16xf32>
    %4 = vector.broadcast %3 : vector<1x16xf32> to vector<4x16xf32>
    %5 = arith.addf %2, %4 : vector<4x16xf32>
    %cst_5 = arith.constant 0.000000e+00 : f32
    %6 = vector.broadcast %cst_5 : f32 to vector<4x16xf32>
    %7 = arith.maximumf %5, %6 : vector<4x16xf32>
    %c0_6 = arith.constant 0 : index
    %c0_7 = arith.constant 0 : index
    %8 = vector.load %arg4[%c0_6, %c0_7] : memref<16x1024xf32, #tpu.memory_space<vmem>>, vector<16x1024xf32>
    %cst_8 = arith.constant dense<0.000000e+00> : vector<4x1024xf32>
    %9 = tpu.matmul %7, %8, %cst_8 {dimension_numbers = #tpu.dot_dimension_numbers<[1], [0], [0], [1], [0, 0, 1, 1], [], []>} : vector<4x16xf32>, vector<16x1024xf32>, vector<4x1024xf32> -> vector<4x1024xf32>
    %c0_9 = arith.constant 0 : index
    %c0_10 = arith.constant 0 : index
    %10 = vector.load %arg5[%c0_9, %c0_10] : memref<1x1024xf32, #tpu.memory_space<vmem>>, vector<1x1024xf32>
    %11 = vector.broadcast %10 : vector<1x1024xf32> to vector<4x1024xf32>
    %12 = arith.addf %9, %11 : vector<4x1024xf32>
    %c0_11 = arith.constant 0 : index
    %c0_12 = arith.constant 0 : index
    %13 = vector.load %arg6[%c0_11, %c0_12] : memref<4x1024xf32, #tpu.memory_space<vmem>>, vector<4x1024xf32>
    tpu.vector_store %arg6[%c0_11, %c0_12], %12 {strides = array<i32>} : memref<4x1024xf32, #tpu.memory_space<vmem>>, vector<4x1024xf32>,
    return
  }
  func.func @transform_0(%arg0: i32) -> (i32, i32) {
    %c0_i32 = arith.constant 0 : i32
    %c0_i32_0 = arith.constant 0 : i32
    %c0_i32_1 = arith.constant 0 : i32
    return %c0_i32, %c0_i32_0 : i32, i32
  }
  func.func @transform_1(%arg0: i32) -> (i32, i32) {
    %c0_i32 = arith.constant 0 : i32
    %c0_i32_0 = arith.constant 0 : i32
    %c0_i32_1 = arith.constant 0 : i32
    return %c0_i32, %c0_i32_0 : i32, i32
  }
  func.func @transform_2(%arg0: i32) -> (i32, i32) {
    %c0_i32 = arith.constant 0 : i32
    %c0_i32_0 = arith.constant 0 : i32
    %c0_i32_1 = arith.constant 0 : i32
    return %c0_i32, %c0_i32_0 : i32, i32
  }
  func.func @transform_3(%arg0: i32) -> (i32, i32) {
    %c0_i32 = arith.constant 0 : i32
    %c0_i32_0 = arith.constant 0 : i32
    %c0_i32_1 = arith.constant 0 : i32
    return %c0_i32, %c0_i32_0 : i32, i32
  }
  func.func @transform_4(%arg0: i32) -> (i32, i32) {
    %c0_i32 = arith.constant 0 : i32
    %c0_i32_0 = arith.constant 0 : i32
    %c0_i32_1 = arith.constant 0 : i32
    return %c0_i32, %c0_i32_0 : i32, i32
  }
  func.func @transform_5(%arg0: i32) -> (i32, i32) {
    %c0_i32 = arith.constant 0 : i32
    %c0_i32_0 = arith.constant 0 : i32
    %c0_i32_1 = arith.constant 0 : i32
    return %c0_i32, %c0_i32_0 : i32, i32
  }
}

module attributes {stable_mosaic.version = 11 : i64} {
  func.func @_mpnn_fused_kernel(%arg0: i32, %arg1: memref<1x96x4xf32, #tpu.memory_space<vmem>>, %arg2: memref<4x32xbf16, #tpu.memory_space<vmem>>, %arg3: memref<1x32xf32, #tpu.memory_space<vmem>>, %arg4: memref<32x32xbf16, #tpu.memory_space<vmem>>, %arg5: memref<1x32xf32, #tpu.memory_space<vmem>>, %arg6: memref<4x96x96xbf16, #tpu.memory_space<vmem>>, %arg7: memref<4x32x32xbf16, #tpu.memory_space<vmem>>, %arg8: memref<1x32xf32, #tpu.memory_space<vmem>>, %arg9: memref<32x96xbf16, #tpu.memory_space<vmem>>, %arg10: memref<32x96xbf16, #tpu.memory_space<vmem>>, %arg11: memref<1x96xf32, #tpu.memory_space<vmem>>, %arg12: memref<1x96xf32, #tpu.memory_space<vmem>>, %arg13: memref<1x96x32xf32, #tpu.memory_space<vmem>>) attributes {dimension_semantics = [#tpu.dimension_semantics<parallel>], iteration_bounds = array<i64: 2>, scalar_prefetch = 0 : i64, scratch_operands = 0 : i64, tpu.core_type = #tpu.core_type<tc>, window_params = [{transform_indices = @transform_0, window_bounds = array<i64: 1, 96, 4>}, {pipeline_mode = #tpu.pipeline_mode<synchronous>, transform_indices = @transform_1, window_bounds = array<i64: 4, 32>}, {pipeline_mode = #tpu.pipeline_mode<synchronous>, transform_indices = @transform_2, window_bounds = array<i64: 1, 32>}, {pipeline_mode = #tpu.pipeline_mode<synchronous>, transform_indices = @transform_3, window_bounds = array<i64: 32, 32>}, {pipeline_mode = #tpu.pipeline_mode<synchronous>, transform_indices = @transform_4, window_bounds = array<i64: 1, 32>}, {pipeline_mode = #tpu.pipeline_mode<synchronous>, transform_indices = @transform_5, window_bounds = array<i64: 4, 96, 96>}, {pipeline_mode = #tpu.pipeline_mode<synchronous>, transform_indices = @transform_6, window_bounds = array<i64: 4, 32, 32>}, {pipeline_mode = #tpu.pipeline_mode<synchronous>, transform_indices = @transform_7, window_bounds = array<i64: 1, 32>}, {pipeline_mode = #tpu.pipeline_mode<synchronous>, transform_indices = @transform_8, window_bounds = array<i64: 32, 96>}, {pipeline_mode = #tpu.pipeline_mode<synchronous>, transform_indices = @transform_9, window_bounds = array<i64: 32, 96>}, {pipeline_mode = #tpu.pipeline_mode<synchronous>, transform_indices = @transform_10, window_bounds = array<i64: 1, 96>}, {pipeline_mode = #tpu.pipeline_mode<synchronous>, transform_indices = @transform_11, window_bounds = array<i64: 1, 96>}, {transform_indices = @transform_12, window_bounds = array<i64: 1, 96, 32>}]} {
    %c0 = arith.constant 0 : index
    %c0_0 = arith.constant 0 : index
    %c0_1 = arith.constant 0 : index
    %0 = vector.load %arg1[%c0, %c0_0, %c0_1] : memref<1x96x4xf32, #tpu.memory_space<vmem>>, vector<1x96x4xf32>
    %1 = vector.shape_cast %0 : vector<1x96x4xf32> to vector<96x4xf32>
    %2 = arith.truncf %1 : vector<96x4xf32> to vector<96x4xbf16>
    %c0_2 = arith.constant 0 : index
    %c0_3 = arith.constant 0 : index
    %3 = vector.load %arg2[%c0_2, %c0_3] : memref<4x32xbf16, #tpu.memory_space<vmem>>, vector<4x32xbf16>
    %cst = arith.constant dense<0.000000e+00> : vector<96x32xf32>
    %4 = tpu.matmul %2, %3, %cst {dimension_numbers = #tpu.dot_dimension_numbers<[1], [0], [0], [1], [0, 0, 1, 1], [], []>} : vector<96x4xbf16>, vector<4x32xbf16>, vector<96x32xf32> -> vector<96x32xf32>
    %c0_4 = arith.constant 0 : index
    %c0_5 = arith.constant 0 : index
    %5 = vector.load %arg3[%c0_4, %c0_5] : memref<1x32xf32, #tpu.memory_space<vmem>>, vector<1x32xf32>
    %6 = vector.broadcast %5 : vector<1x32xf32> to vector<96x32xf32>
    %7 = arith.addf %4, %6 : vector<96x32xf32>
    %cst_6 = arith.constant 0.000000e+00 : f32
    %8 = vector.broadcast %cst_6 : f32 to vector<96x32xf32>
    %9 = arith.maximumf %7, %8 : vector<96x32xf32>
    %10 = arith.truncf %9 : vector<96x32xf32> to vector<96x32xbf16>
    %c0_7 = arith.constant 0 : index
    %c0_8 = arith.constant 0 : index
    %11 = vector.load %arg4[%c0_7, %c0_8] : memref<32x32xbf16, #tpu.memory_space<vmem>>, vector<32x32xbf16>
    %cst_9 = arith.constant dense<0.000000e+00> : vector<96x32xf32>
    %12 = tpu.matmul %10, %11, %cst_9 {dimension_numbers = #tpu.dot_dimension_numbers<[1], [0], [0], [1], [0, 0, 1, 1], [], []>} : vector<96x32xbf16>, vector<32x32xbf16>, vector<96x32xf32> -> vector<96x32xf32>
    %c0_10 = arith.constant 0 : index
    %c0_11 = arith.constant 0 : index
    %13 = vector.load %arg5[%c0_10, %c0_11] : memref<1x32xf32, #tpu.memory_space<vmem>>, vector<1x32xf32>
    %14 = vector.broadcast %13 : vector<1x32xf32> to vector<96x32xf32>
    %15 = arith.addf %12, %14 : vector<96x32xf32>
    %16 = arith.truncf %15 : vector<96x32xf32> to vector<96x32xbf16>
    %cst_12 = arith.constant 0.000000e+00 : f32
    %17 = vector.broadcast %cst_12 : f32 to vector<96x32xf32>
    %c0_13 = arith.constant 0 : index
    %c0_14 = arith.constant 0 : index
    %c0_15 = arith.constant 0 : index
    %18 = vector.load %arg6[%c0_13, %c0_14, %c0_15] : memref<4x96x96xbf16, #tpu.memory_space<vmem>>, vector<1x96x96xbf16>
    %19 = vector.shape_cast %18 : vector<1x96x96xbf16> to vector<96x96xbf16>
    %cst_16 = arith.constant dense<0.000000e+00> : vector<96x32xf32>
    %20 = tpu.matmul %19, %16, %cst_16 {dimension_numbers = #tpu.dot_dimension_numbers<[1], [0], [0], [1], [0, 0, 1, 1], [], []>} : vector<96x96xbf16>, vector<96x32xbf16>, vector<96x32xf32> -> vector<96x32xf32>
    %21 = arith.truncf %20 : vector<96x32xf32> to vector<96x32xbf16>
    %c0_17 = arith.constant 0 : index
    %c0_18 = arith.constant 0 : index
    %c0_19 = arith.constant 0 : index
    %22 = vector.load %arg7[%c0_17, %c0_18, %c0_19] : memref<4x32x32xbf16, #tpu.memory_space<vmem>>, vector<1x32x32xbf16>
    %23 = vector.shape_cast %22 : vector<1x32x32xbf16> to vector<32x32xbf16>
    %cst_20 = arith.constant dense<0.000000e+00> : vector<96x32xf32>
    %24 = tpu.matmul %21, %23, %cst_20 {dimension_numbers = #tpu.dot_dimension_numbers<[1], [0], [0], [1], [0, 0, 1, 1], [], []>} : vector<96x32xbf16>, vector<32x32xbf16>, vector<96x32xf32> -> vector<96x32xf32>
    %25 = arith.addf %17, %24 : vector<96x32xf32>
    %c1 = arith.constant 1 : index
    %c0_21 = arith.constant 0 : index
    %c0_22 = arith.constant 0 : index
    %26 = vector.load %arg6[%c1, %c0_21, %c0_22] : memref<4x96x96xbf16, #tpu.memory_space<vmem>>, vector<1x96x96xbf16>
    %27 = vector.shape_cast %26 : vector<1x96x96xbf16> to vector<96x96xbf16>
    %cst_23 = arith.constant dense<0.000000e+00> : vector<96x32xf32>
    %28 = tpu.matmul %27, %16, %cst_23 {dimension_numbers = #tpu.dot_dimension_numbers<[1], [0], [0], [1], [0, 0, 1, 1], [], []>} : vector<96x96xbf16>, vector<96x32xbf16>, vector<96x32xf32> -> vector<96x32xf32>
    %29 = arith.truncf %28 : vector<96x32xf32> to vector<96x32xbf16>
    %c1_24 = arith.constant 1 : index
    %c0_25 = arith.constant 0 : index
    %c0_26 = arith.constant 0 : index
    %30 = vector.load %arg7[%c1_24, %c0_25, %c0_26] : memref<4x32x32xbf16, #tpu.memory_space<vmem>>, vector<1x32x32xbf16>
    %31 = vector.shape_cast %30 : vector<1x32x32xbf16> to vector<32x32xbf16>
    %cst_27 = arith.constant dense<0.000000e+00> : vector<96x32xf32>
    %32 = tpu.matmul %29, %31, %cst_27 {dimension_numbers = #tpu.dot_dimension_numbers<[1], [0], [0], [1], [0, 0, 1, 1], [], []>} : vector<96x32xbf16>, vector<32x32xbf16>, vector<96x32xf32> -> vector<96x32xf32>
    %33 = arith.addf %25, %32 : vector<96x32xf32>
    %c2 = arith.constant 2 : index
    %c0_28 = arith.constant 0 : index
    %c0_29 = arith.constant 0 : index
    %34 = vector.load %arg6[%c2, %c0_28, %c0_29] : memref<4x96x96xbf16, #tpu.memory_space<vmem>>, vector<1x96x96xbf16>
    %35 = vector.shape_cast %34 : vector<1x96x96xbf16> to vector<96x96xbf16>
    %cst_30 = arith.constant dense<0.000000e+00> : vector<96x32xf32>
    %36 = tpu.matmul %35, %16, %cst_30 {dimension_numbers = #tpu.dot_dimension_numbers<[1], [0], [0], [1], [0, 0, 1, 1], [], []>} : vector<96x96xbf16>, vector<96x32xbf16>, vector<96x32xf32> -> vector<96x32xf32>
    %37 = arith.truncf %36 : vector<96x32xf32> to vector<96x32xbf16>
    %c2_31 = arith.constant 2 : index
    %c0_32 = arith.constant 0 : index
    %c0_33 = arith.constant 0 : index
    %38 = vector.load %arg7[%c2_31, %c0_32, %c0_33] : memref<4x32x32xbf16, #tpu.memory_space<vmem>>, vector<1x32x32xbf16>
    %39 = vector.shape_cast %38 : vector<1x32x32xbf16> to vector<32x32xbf16>
    %cst_34 = arith.constant dense<0.000000e+00> : vector<96x32xf32>
    %40 = tpu.matmul %37, %39, %cst_34 {dimension_numbers = #tpu.dot_dimension_numbers<[1], [0], [0], [1], [0, 0, 1, 1], [], []>} : vector<96x32xbf16>, vector<32x32xbf16>, vector<96x32xf32> -> vector<96x32xf32>
    %41 = arith.addf %33, %40 : vector<96x32xf32>
    %c3 = arith.constant 3 : index
    %c0_35 = arith.constant 0 : index
    %c0_36 = arith.constant 0 : index
    %42 = vector.load %arg6[%c3, %c0_35, %c0_36] : memref<4x96x96xbf16, #tpu.memory_space<vmem>>, vector<1x96x96xbf16>
    %43 = vector.shape_cast %42 : vector<1x96x96xbf16> to vector<96x96xbf16>
    %cst_37 = arith.constant dense<0.000000e+00> : vector<96x32xf32>
    %44 = tpu.matmul %43, %16, %cst_37 {dimension_numbers = #tpu.dot_dimension_numbers<[1], [0], [0], [1], [0, 0, 1, 1], [], []>} : vector<96x96xbf16>, vector<96x32xbf16>, vector<96x32xf32> -> vector<96x32xf32>
    %45 = arith.truncf %44 : vector<96x32xf32> to vector<96x32xbf16>
    %c3_38 = arith.constant 3 : index
    %c0_39 = arith.constant 0 : index
    %c0_40 = arith.constant 0 : index
    %46 = vector.load %arg7[%c3_38, %c0_39, %c0_40] : memref<4x32x32xbf16, #tpu.memory_space<vmem>>, vector<1x32x32xbf16>
    %47 = vector.shape_cast %46 : vector<1x32x32xbf16> to vector<32x32xbf16>
    %cst_41 = arith.constant dense<0.000000e+00> : vector<96x32xf32>
    %48 = tpu.matmul %45, %47, %cst_41 {dimension_numbers = #tpu.dot_dimension_numbers<[1], [0], [0], [1], [0, 0, 1, 1], [], []>} : vector<96x32xbf16>, vector<32x32xbf16>, vector<96x32xf32> -> vector<96x32xf32>
    %49 = arith.addf %41, %48 : vector<96x32xf32>
    %cst_42 = arith.constant 2.500000e-01 : f32
    %50 = vector.broadcast %cst_42 : f32 to vector<96x32xf32>
    %51 = arith.mulf %49, %50 : vector<96x32xf32>
    %c0_43 = arith.constant 0 : index
    %c0_44 = arith.constant 0 : index
    %52 = vector.load %arg8[%c0_43, %c0_44] : memref<1x32xf32, #tpu.memory_space<vmem>>, vector<1x32xf32>
    %53 = vector.broadcast %52 : vector<1x32xf32> to vector<96x32xf32>
    %54 = arith.addf %51, %53 : vector<96x32xf32>
    %cst_45 = arith.constant 0.000000e+00 : f32
    %55 = vector.broadcast %cst_45 : f32 to vector<96x32xf32>
    %56 = arith.maximumf %54, %55 : vector<96x32xf32>
    %57 = arith.truncf %56 : vector<96x32xf32> to vector<96x32xbf16>
    %c0_46 = arith.constant 0 : index
    %c0_47 = arith.constant 0 : index
    %58 = vector.load %arg9[%c0_46, %c0_47] : memref<32x96xbf16, #tpu.memory_space<vmem>>, vector<32x96xbf16>
    %cst_48 = arith.constant dense<0.000000e+00> : vector<96x96xf32>
    %59 = tpu.matmul %57, %58, %cst_48 {dimension_numbers = #tpu.dot_dimension_numbers<[1], [0], [0], [1], [0, 0, 1, 1], [], []>} : vector<96x32xbf16>, vector<32x96xbf16>, vector<96x96xf32> -> vector<96x96xf32>
    %c0_49 = arith.constant 0 : index
    %c0_50 = arith.constant 0 : index
    %60 = vector.load %arg11[%c0_49, %c0_50] : memref<1x96xf32, #tpu.memory_space<vmem>>, vector<1x96xf32>
    %61 = vector.broadcast %60 : vector<1x96xf32> to vector<96x96xf32>
    %62 = arith.addf %59, %61 : vector<96x96xf32>
    %63 = arith.truncf %15 : vector<96x32xf32> to vector<96x32xbf16>
    %c0_51 = arith.constant 0 : index
    %c0_52 = arith.constant 0 : index
    %64 = vector.load %arg10[%c0_51, %c0_52] : memref<32x96xbf16, #tpu.memory_space<vmem>>, vector<32x96xbf16>
    %cst_53 = arith.constant dense<0.000000e+00> : vector<96x96xf32>
    %65 = tpu.matmul %63, %64, %cst_53 {dimension_numbers = #tpu.dot_dimension_numbers<[1], [0], [0], [1], [0, 0, 1, 1], [], []>} : vector<96x32xbf16>, vector<32x96xbf16>, vector<96x96xf32> -> vector<96x96xf32>
    %c0_54 = arith.constant 0 : index
    %c0_55 = arith.constant 0 : index
    %66 = vector.load %arg12[%c0_54, %c0_55] : memref<1x96xf32, #tpu.memory_space<vmem>>, vector<1x96xf32>
    %67 = vector.broadcast %66 : vector<1x96xf32> to vector<96x96xf32>
    %68 = arith.addf %65, %67 : vector<96x96xf32>
    %69 = vector.extract_strided_slice %62 {offsets = [0, 0], sizes = [96, 32], strides = [1, 1]} : vector<96x96xf32> to vector<96x32xf32>
    %70 = vector.extract_strided_slice %68 {offsets = [0, 0], sizes = [96, 32], strides = [1, 1]} : vector<96x96xf32> to vector<96x32xf32>
    %71 = arith.addf %69, %70 : vector<96x32xf32>
    %72 = arith.negf %71 : vector<96x32xf32>
    %73 = math.exp %72 : vector<96x32xf32>
    %cst_56 = arith.constant 1.000000e+00 : f32
    %74 = vector.broadcast %cst_56 : f32 to vector<96x32xf32>
    %75 = arith.addf %74, %73 : vector<96x32xf32>
    %76 = arith.divf %74, %75 : vector<96x32xf32>
    %77 = vector.extract_strided_slice %62 {offsets = [0, 32], sizes = [96, 32], strides = [1, 1]} : vector<96x96xf32> to vector<96x32xf32>
    %78 = vector.extract_strided_slice %68 {offsets = [0, 32], sizes = [96, 32], strides = [1, 1]} : vector<96x96xf32> to vector<96x32xf32>
    %79 = arith.addf %77, %78 : vector<96x32xf32>
    %80 = arith.negf %79 : vector<96x32xf32>
    %81 = math.exp %80 : vector<96x32xf32>
    %cst_57 = arith.constant 1.000000e+00 : f32
    %82 = vector.broadcast %cst_57 : f32 to vector<96x32xf32>
    %83 = arith.addf %82, %81 : vector<96x32xf32>
    %84 = arith.divf %82, %83 : vector<96x32xf32>
    %85 = vector.extract_strided_slice %62 {offsets = [0, 64], sizes = [96, 32], strides = [1, 1]} : vector<96x96xf32> to vector<96x32xf32>
    %86 = vector.extract_strided_slice %68 {offsets = [0, 64], sizes = [96, 32], strides = [1, 1]} : vector<96x96xf32> to vector<96x32xf32>
    %87 = arith.mulf %76, %86 : vector<96x32xf32>
    %88 = arith.addf %85, %87 : vector<96x32xf32>
    %89 = math.tanh %88 : vector<96x32xf32>
    %cst_58 = arith.constant 1.000000e+00 : f32
    %90 = vector.broadcast %cst_58 : f32 to vector<96x32xf32>
    %91 = arith.subf %90, %84 : vector<96x32xf32>
    %92 = arith.mulf %91, %89 : vector<96x32xf32>
    %93 = arith.mulf %84, %15 : vector<96x32xf32>
    %94 = arith.addf %92, %93 : vector<96x32xf32>
    %95 = arith.truncf %94 : vector<96x32xf32> to vector<96x32xbf16>
    %cst_59 = arith.constant 0.000000e+00 : f32
    %96 = vector.broadcast %cst_59 : f32 to vector<96x32xf32>
    %c0_60 = arith.constant 0 : index
    %c0_61 = arith.constant 0 : index
    %c0_62 = arith.constant 0 : index
    %97 = vector.load %arg6[%c0_60, %c0_61, %c0_62] : memref<4x96x96xbf16, #tpu.memory_space<vmem>>, vector<1x96x96xbf16>
    %98 = vector.shape_cast %97 : vector<1x96x96xbf16> to vector<96x96xbf16>
    %cst_63 = arith.constant dense<0.000000e+00> : vector<96x32xf32>
    %99 = tpu.matmul %98, %95, %cst_63 {dimension_numbers = #tpu.dot_dimension_numbers<[1], [0], [0], [1], [0, 0, 1, 1], [], []>} : vector<96x96xbf16>, vector<96x32xbf16>, vector<96x32xf32> -> vector<96x32xf32>
    %100 = arith.truncf %99 : vector<96x32xf32> to vector<96x32xbf16>
    %c0_64 = arith.constant 0 : index
    %c0_65 = arith.constant 0 : index
    %c0_66 = arith.constant 0 : index
    %101 = vector.load %arg7[%c0_64, %c0_65, %c0_66] : memref<4x32x32xbf16, #tpu.memory_space<vmem>>, vector<1x32x32xbf16>
    %102 = vector.shape_cast %101 : vector<1x32x32xbf16> to vector<32x32xbf16>
    %cst_67 = arith.constant dense<0.000000e+00> : vector<96x32xf32>
    %103 = tpu.matmul %100, %102, %cst_67 {dimension_numbers = #tpu.dot_dimension_numbers<[1], [0], [0], [1], [0, 0, 1, 1], [], []>} : vector<96x32xbf16>, vector<32x32xbf16>, vector<96x32xf32> -> vector<96x32xf32>
    %104 = arith.addf %96, %103 : vector<96x32xf32>
    %c1_68 = arith.constant 1 : index
    %c0_69 = arith.constant 0 : index
    %c0_70 = arith.constant 0 : index
    %105 = vector.load %arg6[%c1_68, %c0_69, %c0_70] : memref<4x96x96xbf16, #tpu.memory_space<vmem>>, vector<1x96x96xbf16>
    %106 = vector.shape_cast %105 : vector<1x96x96xbf16> to vector<96x96xbf16>
    %cst_71 = arith.constant dense<0.000000e+00> : vector<96x32xf32>
    %107 = tpu.matmul %106, %95, %cst_71 {dimension_numbers = #tpu.dot_dimension_numbers<[1], [0], [0], [1], [0, 0, 1, 1], [], []>} : vector<96x96xbf16>, vector<96x32xbf16>, vector<96x32xf32> -> vector<96x32xf32>
    %108 = arith.truncf %107 : vector<96x32xf32> to vector<96x32xbf16>
    %c1_72 = arith.constant 1 : index
    %c0_73 = arith.constant 0 : index
    %c0_74 = arith.constant 0 : index
    %109 = vector.load %arg7[%c1_72, %c0_73, %c0_74] : memref<4x32x32xbf16, #tpu.memory_space<vmem>>, vector<1x32x32xbf16>
    %110 = vector.shape_cast %109 : vector<1x32x32xbf16> to vector<32x32xbf16>
    %cst_75 = arith.constant dense<0.000000e+00> : vector<96x32xf32>
    %111 = tpu.matmul %108, %110, %cst_75 {dimension_numbers = #tpu.dot_dimension_numbers<[1], [0], [0], [1], [0, 0, 1, 1], [], []>} : vector<96x32xbf16>, vector<32x32xbf16>, vector<96x32xf32> -> vector<96x32xf32>
    %112 = arith.addf %104, %111 : vector<96x32xf32>
    %c2_76 = arith.constant 2 : index
    %c0_77 = arith.constant 0 : index
    %c0_78 = arith.constant 0 : index
    %113 = vector.load %arg6[%c2_76, %c0_77, %c0_78] : memref<4x96x96xbf16, #tpu.memory_space<vmem>>, vector<1x96x96xbf16>
    %114 = vector.shape_cast %113 : vector<1x96x96xbf16> to vector<96x96xbf16>
    %cst_79 = arith.constant dense<0.000000e+00> : vector<96x32xf32>
    %115 = tpu.matmul %114, %95, %cst_79 {dimension_numbers = #tpu.dot_dimension_numbers<[1], [0], [0], [1], [0, 0, 1, 1], [], []>} : vector<96x96xbf16>, vector<96x32xbf16>, vector<96x32xf32> -> vector<96x32xf32>
    %116 = arith.truncf %115 : vector<96x32xf32> to vector<96x32xbf16>
    %c2_80 = arith.constant 2 : index
    %c0_81 = arith.constant 0 : index
    %c0_82 = arith.constant 0 : index
    %117 = vector.load %arg7[%c2_80, %c0_81, %c0_82] : memref<4x32x32xbf16, #tpu.memory_space<vmem>>, vector<1x32x32xbf16>
    %118 = vector.shape_cast %117 : vector<1x32x32xbf16> to vector<32x32xbf16>
    %cst_83 = arith.constant dense<0.000000e+00> : vector<96x32xf32>
    %119 = tpu.matmul %116, %118, %cst_83 {dimension_numbers = #tpu.dot_dimension_numbers<[1], [0], [0], [1], [0, 0, 1, 1], [], []>} : vector<96x32xbf16>, vector<32x32xbf16>, vector<96x32xf32> -> vector<96x32xf32>
    %120 = arith.addf %112, %119 : vector<96x32xf32>
    %c3_84 = arith.constant 3 : index
    %c0_85 = arith.constant 0 : index
    %c0_86 = arith.constant 0 : index
    %121 = vector.load %arg6[%c3_84, %c0_85, %c0_86] : memref<4x96x96xbf16, #tpu.memory_space<vmem>>, vector<1x96x96xbf16>
    %122 = vector.shape_cast %121 : vector<1x96x96xbf16> to vector<96x96xbf16>
    %cst_87 = arith.constant dense<0.000000e+00> : vector<96x32xf32>
    %123 = tpu.matmul %122, %95, %cst_87 {dimension_numbers = #tpu.dot_dimension_numbers<[1], [0], [0], [1], [0, 0, 1, 1], [], []>} : vector<96x96xbf16>, vector<96x32xbf16>, vector<96x32xf32> -> vector<96x32xf32>
    %124 = arith.truncf %123 : vector<96x32xf32> to vector<96x32xbf16>
    %c3_88 = arith.constant 3 : index
    %c0_89 = arith.constant 0 : index
    %c0_90 = arith.constant 0 : index
    %125 = vector.load %arg7[%c3_88, %c0_89, %c0_90] : memref<4x32x32xbf16, #tpu.memory_space<vmem>>, vector<1x32x32xbf16>
    %126 = vector.shape_cast %125 : vector<1x32x32xbf16> to vector<32x32xbf16>
    %cst_91 = arith.constant dense<0.000000e+00> : vector<96x32xf32>
    %127 = tpu.matmul %124, %126, %cst_91 {dimension_numbers = #tpu.dot_dimension_numbers<[1], [0], [0], [1], [0, 0, 1, 1], [], []>} : vector<96x32xbf16>, vector<32x32xbf16>, vector<96x32xf32> -> vector<96x32xf32>
    %128 = arith.addf %120, %127 : vector<96x32xf32>
    %cst_92 = arith.constant 2.500000e-01 : f32
    %129 = vector.broadcast %cst_92 : f32 to vector<96x32xf32>
    %130 = arith.mulf %128, %129 : vector<96x32xf32>
    %c0_93 = arith.constant 0 : index
    %c0_94 = arith.constant 0 : index
    %131 = vector.load %arg8[%c0_93, %c0_94] : memref<1x32xf32, #tpu.memory_space<vmem>>, vector<1x32xf32>
    %132 = vector.broadcast %131 : vector<1x32xf32> to vector<96x32xf32>
    %133 = arith.addf %130, %132 : vector<96x32xf32>
    %cst_95 = arith.constant 0.000000e+00 : f32
    %134 = vector.broadcast %cst_95 : f32 to vector<96x32xf32>
    %135 = arith.maximumf %133, %134 : vector<96x32xf32>
    %136 = arith.truncf %135 : vector<96x32xf32> to vector<96x32xbf16>
    %c0_96 = arith.constant 0 : index
    %c0_97 = arith.constant 0 : index
    %137 = vector.load %arg9[%c0_96, %c0_97] : memref<32x96xbf16, #tpu.memory_space<vmem>>, vector<32x96xbf16>
    %cst_98 = arith.constant dense<0.000000e+00> : vector<96x96xf32>
    %138 = tpu.matmul %136, %137, %cst_98 {dimension_numbers = #tpu.dot_dimension_numbers<[1], [0], [0], [1], [0, 0, 1, 1], [], []>} : vector<96x32xbf16>, vector<32x96xbf16>, vector<96x96xf32> -> vector<96x96xf32>
    %c0_99 = arith.constant 0 : index
    %c0_100 = arith.constant 0 : index
    %139 = vector.load %arg11[%c0_99, %c0_100] : memref<1x96xf32, #tpu.memory_space<vmem>>, vector<1x96xf32>
    %140 = vector.broadcast %139 : vector<1x96xf32> to vector<96x96xf32>
    %141 = arith.addf %138, %140 : vector<96x96xf32>
    %142 = arith.truncf %94 : vector<96x32xf32> to vector<96x32xbf16>
    %c0_101 = arith.constant 0 : index
    %c0_102 = arith.constant 0 : index
    %143 = vector.load %arg10[%c0_101, %c0_102] : memref<32x96xbf16, #tpu.memory_space<vmem>>, vector<32x96xbf16>
    %cst_103 = arith.constant dense<0.000000e+00> : vector<96x96xf32>
    %144 = tpu.matmul %142, %143, %cst_103 {dimension_numbers = #tpu.dot_dimension_numbers<[1], [0], [0], [1], [0, 0, 1, 1], [], []>} : vector<96x32xbf16>, vector<32x96xbf16>, vector<96x96xf32> -> vector<96x96xf32>
    %c0_104 = arith.constant 0 : index
    %c0_105 = arith.constant 0 : index
    %145 = vector.load %arg12[%c0_104, %c0_105] : memref<1x96xf32, #tpu.memory_space<vmem>>, vector<1x96xf32>
    %146 = vector.broadcast %145 : vector<1x96xf32> to vector<96x96xf32>
    %147 = arith.addf %144, %146 : vector<96x96xf32>
    %148 = vector.extract_strided_slice %141 {offsets = [0, 0], sizes = [96, 32], strides = [1, 1]} : vector<96x96xf32> to vector<96x32xf32>
    %149 = vector.extract_strided_slice %147 {offsets = [0, 0], sizes = [96, 32], strides = [1, 1]} : vector<96x96xf32> to vector<96x32xf32>
    %150 = arith.addf %148, %149 : vector<96x32xf32>
    %151 = arith.negf %150 : vector<96x32xf32>
    %152 = math.exp %151 : vector<96x32xf32>
    %cst_106 = arith.constant 1.000000e+00 : f32
    %153 = vector.broadcast %cst_106 : f32 to vector<96x32xf32>
    %154 = arith.addf %153, %152 : vector<96x32xf32>
    %155 = arith.divf %153, %154 : vector<96x32xf32>
    %156 = vector.extract_strided_slice %141 {offsets = [0, 32], sizes = [96, 32], strides = [1, 1]} : vector<96x96xf32> to vector<96x32xf32>
    %157 = vector.extract_strided_slice %147 {offsets = [0, 32], sizes = [96, 32], strides = [1, 1]} : vector<96x96xf32> to vector<96x32xf32>
    %158 = arith.addf %156, %157 : vector<96x32xf32>
    %159 = arith.negf %158 : vector<96x32xf32>
    %160 = math.exp %159 : vector<96x32xf32>
    %cst_107 = arith.constant 1.000000e+00 : f32
    %161 = vector.broadcast %cst_107 : f32 to vector<96x32xf32>
    %162 = arith.addf %161, %160 : vector<96x32xf32>
    %163 = arith.divf %161, %162 : vector<96x32xf32>
    %164 = vector.extract_strided_slice %141 {offsets = [0, 64], sizes = [96, 32], strides = [1, 1]} : vector<96x96xf32> to vector<96x32xf32>
    %165 = vector.extract_strided_slice %147 {offsets = [0, 64], sizes = [96, 32], strides = [1, 1]} : vector<96x96xf32> to vector<96x32xf32>
    %166 = arith.mulf %155, %165 : vector<96x32xf32>
    %167 = arith.addf %164, %166 : vector<96x32xf32>
    %168 = math.tanh %167 : vector<96x32xf32>
    %cst_108 = arith.constant 1.000000e+00 : f32
    %169 = vector.broadcast %cst_108 : f32 to vector<96x32xf32>
    %170 = arith.subf %169, %163 : vector<96x32xf32>
    %171 = arith.mulf %170, %168 : vector<96x32xf32>
    %172 = arith.mulf %163, %94 : vector<96x32xf32>
    %173 = arith.addf %171, %172 : vector<96x32xf32>
    %c0_109 = arith.constant 0 : index
    %c0_110 = arith.constant 0 : index
    %c0_111 = arith.constant 0 : index
    %174 = vector.load %arg13[%c0_109, %c0_110, %c0_111] : memref<1x96x32xf32, #tpu.memory_space<vmem>>, vector<1x96x32xf32>
    %175 = vector.shape_cast %174 : vector<1x96x32xf32> to vector<96x32xf32>
    %176 = vector.shape_cast %173 : vector<96x32xf32> to vector<1x96x32xf32>
    tpu.vector_store %arg13[%c0_109, %c0_110, %c0_111], %176 {strides = array<i32>} : memref<1x96x32xf32, #tpu.memory_space<vmem>>, vector<1x96x32xf32>,
    return
  }
  func.func @transform_0(%arg0: i32) -> (i32, i32, i32) {
    %c0_i32 = arith.constant 0 : i32
    %c0_i32_0 = arith.constant 0 : i32
    %c0_i32_1 = arith.constant 0 : i32
    return %arg0, %c0_i32, %c0_i32_0 : i32, i32, i32
  }
  func.func @transform_1(%arg0: i32) -> (i32, i32) {
    %c0_i32 = arith.constant 0 : i32
    %c0_i32_0 = arith.constant 0 : i32
    %c0_i32_1 = arith.constant 0 : i32
    return %c0_i32, %c0_i32_0 : i32, i32
  }
  func.func @transform_2(%arg0: i32) -> (i32, i32) {
    %c0_i32 = arith.constant 0 : i32
    %c0_i32_0 = arith.constant 0 : i32
    %c0_i32_1 = arith.constant 0 : i32
    return %c0_i32, %c0_i32_0 : i32, i32
  }
  func.func @transform_3(%arg0: i32) -> (i32, i32) {
    %c0_i32 = arith.constant 0 : i32
    %c0_i32_0 = arith.constant 0 : i32
    %c0_i32_1 = arith.constant 0 : i32
    return %c0_i32, %c0_i32_0 : i32, i32
  }
  func.func @transform_4(%arg0: i32) -> (i32, i32) {
    %c0_i32 = arith.constant 0 : i32
    %c0_i32_0 = arith.constant 0 : i32
    %c0_i32_1 = arith.constant 0 : i32
    return %c0_i32, %c0_i32_0 : i32, i32
  }
  func.func @transform_5(%arg0: i32) -> (i32, i32, i32) {
    %c0_i32 = arith.constant 0 : i32
    %c0_i32_0 = arith.constant 0 : i32
    %c0_i32_1 = arith.constant 0 : i32
    %c0_i32_2 = arith.constant 0 : i32
    return %c0_i32, %c0_i32_0, %c0_i32_1 : i32, i32, i32
  }
  func.func @transform_6(%arg0: i32) -> (i32, i32, i32) {
    %c0_i32 = arith.constant 0 : i32
    %c0_i32_0 = arith.constant 0 : i32
    %c0_i32_1 = arith.constant 0 : i32
    %c0_i32_2 = arith.constant 0 : i32
    return %c0_i32, %c0_i32_0, %c0_i32_1 : i32, i32, i32
  }
  func.func @transform_7(%arg0: i32) -> (i32, i32) {
    %c0_i32 = arith.constant 0 : i32
    %c0_i32_0 = arith.constant 0 : i32
    %c0_i32_1 = arith.constant 0 : i32
    return %c0_i32, %c0_i32_0 : i32, i32
  }
  func.func @transform_8(%arg0: i32) -> (i32, i32) {
    %c0_i32 = arith.constant 0 : i32
    %c0_i32_0 = arith.constant 0 : i32
    %c0_i32_1 = arith.constant 0 : i32
    return %c0_i32, %c0_i32_0 : i32, i32
  }
  func.func @transform_9(%arg0: i32) -> (i32, i32) {
    %c0_i32 = arith.constant 0 : i32
    %c0_i32_0 = arith.constant 0 : i32
    %c0_i32_1 = arith.constant 0 : i32
    return %c0_i32, %c0_i32_0 : i32, i32
  }
  func.func @transform_10(%arg0: i32) -> (i32, i32) {
    %c0_i32 = arith.constant 0 : i32
    %c0_i32_0 = arith.constant 0 : i32
    %c0_i32_1 = arith.constant 0 : i32
    return %c0_i32, %c0_i32_0 : i32, i32
  }
  func.func @transform_11(%arg0: i32) -> (i32, i32) {
    %c0_i32 = arith.constant 0 : i32
    %c0_i32_0 = arith.constant 0 : i32
    %c0_i32_1 = arith.constant 0 : i32
    return %c0_i32, %c0_i32_0 : i32, i32
  }
  func.func @transform_12(%arg0: i32) -> (i32, i32, i32) {
    %c0_i32 = arith.constant 0 : i32
    %c0_i32_0 = arith.constant 0 : i32
    %c0_i32_1 = arith.constant 0 : i32
    return %arg0, %c0_i32, %c0_i32_0 : i32, i32, i32
  }
}

</mosaic_0001>

<bundles_post_ra>
// kernel: _lambda_.2
= control target key start
LH: loop header
LB: loop body
LE: loop exit
PB: predicated region body
PF: predicated region fallthrough
CT: control target
= control target key end

     0   :  { %10 = vsyncpa [#allocation3], 0  ;;  %s446_s0 = inlined_call_operand.hbm [shape: f32[4,4], index: 0, kind: input, shape index: {}]   ;;  %s447_s1 = inlined_call_operand.vmem [shape: f32[4,16], index: 1, kind: input, shape index: {}]   ;;  %s448_s2 = inlined_call_operand.vmem [shape: f32[1,16], index: 2, kind: input, shape index: {}]   ;;  %s449_s3 = inlined_call_operand.hbm [shape: f32[16,1024], index: 3, kind: input, shape index: {}]   ;;  %s450_s4 = inlined_call_operand.vmem [shape: f32[1,1024], index: 4, kind: input, shape index: {}]   ;;  %s451_s5 = inlined_call_operand.vmem [shape: f32[4,1024], index: 5, kind: output, shape index: {}]  }
   0x1   :  { %s17_s20 = sshll.u32 %s446_s0, 4  ;;  %s18_s20 = int_to_ptr.hbm [resolvable:$true] %s17_s20 }
   0x2   :  { %11 = vsyncpa [#allocation5], 0  ;;  %s380_s21 = smov [#allocation2]   ;;  %s31_s25 = sshll.u32 %s449_s3, 4  ;;  %s32_s25 = int_to_ptr.hbm [resolvable:$true] %s31_s25 }
   0x3   :  { %s19_s22 = sshll.u32 %s380_s21, 4  ;;  %s381_s26 = smov [#allocation4]   ;;  %s20_s22 = int_to_ptr.vmem [resolvable:$true] %s19_s22 }
   0x4   :  { %22 = dma.hbm_to_vmem [thread:$0]  %s18_s20, 64, %s20_s22, [#allocation3]  }
   0x5   :  { %s33_s27 = sshll.u32 %s381_s26, 4  ;;  %s382_s28 = smov 1024   ;;  %s34_s27 = int_to_ptr.vmem [resolvable:$true] %s33_s27 }
   0x6   :  { %s383_s29 = smov 64  }
   0x7   :  { %39 = dma.hbm_to_vmem [thread:$0]  %s32_s25, 2048, %s34_s27, [#allocation5], %s382_s28, %s382_s28, %s383_s29  }
   0x8   :  { %376 = dma.done.wait [#allocation3], 64  }
   0x9   :  { %377 = vsyncadd [#allocation3], 4294967232 }
   0xa   :  { %378 = dma.done.wait [#allocation5], 2048  }
   0xb   :  { %379 = vsyncadd [#allocation5], 4294965248  ;;  %vm60_vm0 = vcmask 1043456   ;;  %vm56_vm1 = vcmask 31744   ;;  %v51_v0 = vld [vmem:[%s447_s1] sm:$0xf] }
   0xc   :  { %v50_v1 = vld [vmem:[#allocation2] sm:$0xf]  ;;  %313 = vmatpush.msk.msra.mxu0 %vm60_vm0, %v51_v0  ;;  %v93_v2 = vld [vmem:[#allocation4 + $0x40] sm:$0xff]  ;;  %v94_v3 = vld [vmem:[#allocation4 + $0x48] sm:$0xff]  ;;  %vm119_vm2 = vcmask 130048  }
   0xd   :  { %314 = vmatmul.msk.f32.vlgmr.msra.gmra.mxu0 %vm56_vm1, %v50_v1  ;;  %v95_v4 = vld [vmem:[#allocation4 + $0x50] sm:$0xff]  ;;  %137 = vmatpush.msra.mxu1 %v93_v2  ;;  %v96_v5 = vld [vmem:[#allocation4 + $0x58] sm:$0xff]  ;;  %v85_v6 = vld [vmem:[#allocation4] sm:$0xff] }
   0xe   :  { %157 = vmatpush.msra.mxu2 %v94_v3  ;;  %177 = vmatpush.msra.mxu3 %v95_v4  ;;  %v86_v7 = vld [vmem:[#allocation4 + $0x8] sm:$0xff]  ;;  %v87_v8 = vld [vmem:[#allocation4 + $0x10] sm:$0xff]  ;;  %v88_v9 = vld [vmem:[#allocation4 + $0x18] sm:$0xff] }
   0xf   :  { %197 = vmatpush.msrb.mxu0 %v96_v5  ;;  %138 = vmatpush.msra.mxu1 %v85_v6  ;;  %v98_v10 = vld [vmem:[#allocation4 + $0x68] sm:$0xff]  ;;  %v99_v11 = vld [vmem:[#allocation4 + $0x70] sm:$0xff]  ;;  %v97_v13 = vld [vmem:[#allocation4 + $0x60] sm:$0xff] }
  0x10   :  { %158 = vmatpush.msra.mxu2 %v86_v7  ;;  %178 = vmatpush.msra.mxu3 %v87_v8  ;;  %v90_v12 = vld [vmem:[#allocation4 + $0x28] sm:$0xff]  ;;  %v100_v14 = vld [vmem:[#allocation4 + $0x78] sm:$0xff]  ;;  %v91_v15 = vld [vmem:[#allocation4 + $0x30] sm:$0xff] }
  0x11   :  { %198 = vmatpush.msrb.mxu0 %v88_v9  ;;  %217 = vmatpush.msrb.mxu1 %v97_v13  ;;  %v89_v16 = vld [vmem:[#allocation4 + $0x20] sm:$0xff]  ;;  %v92_v17 = vld [vmem:[#allocation4 + $0x38] sm:$0xff] }
  0x12   :  { %237 = vmatpush.msrb.mxu2 %v98_v10  ;;  %257 = vmatpush.msrb.mxu3 %v99_v11  ;;  %v327_v18 = vld [vmem:[%s448_s2] ss:$0 sm:$0xff] }
  0x13   :  { %277 = vmatpush.msra.mxu0 %v100_v14  ;;  %218 = vmatpush.msrb.mxu1 %v89_v16  ;;  %v101_v22 = vld [vmem:[%s450_s4] sm:$0xff] }
  0x14   :  { %238 = vmatpush.msrb.mxu2 %v90_v12  ;;  %258 = vmatpush.msrb.mxu3 %v91_v15  ;;  %v106_v23 = vperm.slane %v101_v22, 3  ;;  %v104_v25 = vperm.slane %v101_v22, 1  ;;  %v105_v28 = vperm.slane %v101_v22, 2  ;;  %v103_v29 = vperm.slane %v101_v22, 0 }
  0x15   :  { %278 = vmatpush.msra.mxu0 %v92_v17  ;;  %v110_v35 = vperm.slane %v101_v22, 7  ;;  %v108_v41 = vperm.slane %v101_v22, 5  ;;  %v109_v43 = vperm.slane %v101_v22, 6  ;;  %v107_v44 = vperm.slane %v101_v22, 4 }
  0x8a   :  { %v81_v19 = vpop.f32.mrf.mxu0 }
  0x8b   :  { %v82_v20 = vadd.f32 %v327_v18, %v81_v19 }
  0x8d   :  { %v84_v21 = vmax.f32 %v82_v20, 0.0 }
  0x8f   :  { %315 = vmatmul.msk.f32.vlgmr.msra.gmra.mxu1 %vm119_vm2, %v84_v21  ;;  %316 = vmatmul.msk.f32.vlgmr.msra.gmra.mxu2 %vm119_vm2, %v84_v21 }
  0x90   :  { %317 = vmatmul.msk.f32.vlgmr.msra.gmra.mxu3 %vm119_vm2, %v84_v21  ;;  %318 = vmatmul.msk.f32.vlgmr.msrb.gmra.mxu0 %vm119_vm2, %v84_v21 }
  0x97   :  { %319 = vmatmul.msk.f32.vlgmr.msrb.gmra.mxu1 %vm119_vm2, %v84_v21  ;;  %320 = vmatmul.msk.f32.vlgmr.msrb.gmra.mxu2 %vm119_vm2, %v84_v21 }
  0x98   :  { %321 = vmatmul.msk.f32.vlgmr.msrb.gmra.mxu3 %vm119_vm2, %v84_v21  ;;  %322 = vmatmul.msk.f32.vlgmr.msra.gmra.mxu0 %vm119_vm2, %v84_v21 }
 0x10c   :  { %v140_v26 = vpop.f32.mrf.mxu1 }
 0x10d   :  { %v200_v24 = vpop.f32.mrf.mxu0  ;;  %v141_v36 = vadd.f32 %v140_v26, %v103_v29 }
 0x10e   :  { %v201_v27 = vadd.f32 %v200_v24, %v106_v23 }
 0x110   :  { %v292_v33 = vrot.slane %v201_v27, 4 }
 0x112   :  { %v160_v30 = vpop.f32.mrf.mxu2 }
 0x113   :  { %v161_v31 = vadd.f32 %v160_v30, %v104_v25  ;;  %v180_v32 = vpop.f32.mrf.mxu3 }
 0x114   :  { %v181_v34 = vadd.f32 %v180_v32, %v105_v28  ;;  %v220_v45 = vpop.f32.mrf.mxu1 }
 0x115   :  { %v291_v37 = vrot.slane %v161_v31, 4  ;;  %v280_v38 = vpop.f32.mrf.mxu0  ;;  %v221_v51 = vadd.f32 %v220_v45, %v107_v44 }
 0x116   :  { %v296_v39 = vsel %vm60_vm0, %v181_v34, %v292_v33  ;;  %v281_v42 = vadd.f32 %v280_v38, %v110_v35 }
 0x117   :  { %v295_v40 = vsel %vm60_vm0, %v141_v36, %v291_v37  ;;  %304 = vst [vmem:[%s451_s5 + $0x8] sm:$0xff] %v296_v39 }
 0x118   :  { %303 = vst [vmem:[%s451_s5] sm:$0xff] %v295_v40  ;;  %v294_v49 = vrot.slane %v281_v42, 4 }
 0x11a   :  { %v240_v46 = vpop.f32.mrf.mxu2 }
 0x11b   :  { %v241_v47 = vadd.f32 %v240_v46, %v108_v41  ;;  %v260_v48 = vpop.f32.mrf.mxu3 }
 0x11c   :  { %v261_v50 = vadd.f32 %v260_v48, %v109_v43 }
 0x11d   :  { %v293_v52 = vrot.slane %v241_v47, 4 }
 0x11e   :  { %v298_v53 = vsel %vm60_vm0, %v261_v50, %v294_v49 }
 0x11f   :  { %v297_v54 = vsel %vm60_vm0, %v221_v51, %v293_v52  ;;  %306 = vst [vmem:[%s451_s5 + $0x18] sm:$0xff] %v298_v53 }
 0x120   :  { %305 = vst [vmem:[%s451_s5 + $0x10] sm:$0xff] %v297_v54 }
 0x121   :  { %311 = vsyncpa [#allocation3], 1 }
 0x122   :  { %312 = vsyncpa [#allocation5], 1 }

// kernel: _lambda_.3
= control target key start
LH: loop header
LB: loop body
LE: loop exit
PB: predicated region body
PF: predicated region fallthrough
CT: control target
= control target key end

     0   :  { %s5442_s0 = inlined_call_operand.vmem [shape: f32[2,96,4], index: 0, kind: input, shape index: {}]   ;;  %s5443_s1 = inlined_call_operand.vmem [shape: bf16[4,32], index: 1, kind: input, shape index: {}]   ;;  %s5444_s2 = inlined_call_operand.vmem [shape: f32[1,32], index: 2, kind: input, shape index: {}]   ;;  %s5445_s3 = inlined_call_operand.vmem [shape: bf16[32,32], index: 3, kind: input, shape index: {}]   ;;  %s5446_s4 = inlined_call_operand.vmem [shape: f32[1,32], index: 4, kind: input, shape index: {}]   ;;  %s5447_s5 = inlined_call_operand.vmem [shape: bf16[4,96,96], index: 5, kind: input, shape index: {}]   ;;  %s5448_s6 = inlined_call_operand.vmem [shape: bf16[4,32,32], index: 6, kind: input, shape index: {}]   ;;  %s5449_s7 = inlined_call_operand.vmem [shape: f32[1,32], index: 7, kind: input, shape index: {}]   ;;  %s5450_s8 = inlined_call_operand.vmem [shape: bf16[32,96], index: 8, kind: input, shape index: {}]   ;;  %s5451_s9 = inlined_call_operand.vmem [shape: bf16[32,96], index: 9, kind: input, shape index: {}]   ;;  %s5452_s10 = inlined_call_operand.vmem [shape: f32[1,96], index: 10, kind: input, shape index: {}]   ;;  %s5453_s11 = inlined_call_operand.vmem [shape: f32[1,96], index: 11, kind: input, shape index: {}]   ;;  %s5454_s12 = inlined_call_operand.hbm [shape: f32[2,96,32], index: 12, kind: output, shape index: {}]  }
   0x1   :  { %5457 = sst [smem:[#allocation5_spill]] %s5442_s0 }
   0x2   :  { %5458 = sst [smem:[#allocation6_spill]] %s5443_s1 }
   0x3   :  { %17 = vsyncpa [#allocation3], 0 }
   0x4   :  { %19 = vsyncpa [#allocation3 + $0x1], 0  ;;  %s4053_s21 = smov 0   ;;  %s4055_s22 = smov 0  }
   0x5   :  { %s4057_s23 = smov 0   ;;  %s4059_s24 = smov 0  }
   0x6 LB: > { %s4074_s25 = sadd.s32 4294967295, %s3981_s24   ;;  %s3283_s26 = sadd.s32 4294967294, %s3981_s24   ;;  %s3981_s24 = sphi %s4059_s24, %s5471_s24   ;;  %s3977_s23 = sphi %s4057_s23, %s5470_s23   ;;  %s3973_s22 = sphi %s4055_s22, %s5469_s22   ;;  %s3969_s21 = sphi %s4053_s21, %s5468_s21  }
   0x7   : > { %s4078_s27 = sadd.s32 1, %s3981_s24   ;;  %s289_s28 = sadd.s32 1, %s3977_s23 }
   0x8   : > { %s286_s29 = ssub.s32 %s3981_s24, %s4078_s27  ;;  %p299_p0 = scmp.ne.s32.totalorder %s3977_s23, %s3973_s22 }
   0x9   : > { %p287_p1 = scmp.eq.s32.totalorder %s286_s29, 0  ;;  %p300_p2 = scmp.eq.s32.totalorder %s4074_s25, 1 }
   0xa   : > { %p305_p3 = scmp.ne.s32.totalorder %s3973_s22, %s3969_s21  ;;  %p306_p4 = scmp.eq.s32.totalorder %s3283_s26, 1 }
   0xb   : > { %s4089_s30 = scalar_select %p287_p1, %s3977_s23, %s289_s28  }
   0xc   : > { %p4091_p5 = por %p300_p2, %p299_p0  ;;  %p4095_p6 = por %p306_p4, %p305_p3 }
   0xd   : > { %p3286_p7 = scmp.ge.s32.totalorder %s3981_s24, 1  ;;  %p365_p8 = scmp.lt.s32.totalorder %s3981_s24, 3 }
   0xf   : > { %p366_p9 = pnand %p3286_p7, %p365_p8 }
  0x10   : > { %s5461_s1 = sld [smem:[#allocation6_spill]] (!%p366_p9)  ;;  %p407_p10 = scmp.lt.s32.totalorder (!%p366_p9), %s4074_s25, 1 }
  0x11   : > { %369 = sbr.rel (%p366_p9) target bundleno = 2652 (0xa5c), region = 68  ;;  %s5462_s0 = sld [smem:[#allocation5_spill]] (!%p366_p9) }
  0x12   : > { %s3983_s16 = smov (!%p366_p9), 64   ;;  %s3984_s19 = smov (!%p366_p9), 32  }
  0x13   : > { %s5455_s20 = smov (!%p366_p9), 96   ;;  %s5467_s29 = smov (!%p366_p9), 96  }
  0x16   : > { %v431_v0 = vld [vmem:[%s5461_s1] sm:$0x3]  ;;  %vm455_vm0 = vcmask 1041408   ;;  %s408_s17 = scalar_select %p407_p10, %s4074_s25, 1  ;;  %vm436_vm1 = vcmask 31744   ;;  %v3648_v20 = vld [vmem:[%s5445_s3 + $0x8] sm:$0xff] }
  0x17   : > { %v457_v1 = vsel %vm455_vm0, %v431_v0, 0  ;;  %561 = vmatpush.bf16.msra.mxu1 %v3648_v20  ;;  %3686 = vmatpush.bf16.msra.mxu2 %v3648_v20  ;;  %v3647_v21 = vld [vmem:[%s5445_s3] sm:$0xff]  ;;  %vm536_vm2 = vcmask 261120   ;;  %vm642_vm3 = vcmask 785408  }
  0x18   : > { %466 = vmatpush.bf16.msra.mxu0 %v457_v1  ;;  %3685 = vmatpush.bf16.msra.mxu3 %v457_v1  ;;  %s3691_s18 = smul.u32 96, %s408_s17  ;;  %v3737_v23 = vld [vmem:[%s5444_s2] ss:$0 sm:$0xff] }
  0x1a   : > { %s411_s26 = scalar_lea.vmem %s5462_s0, %s3691_s18  ;;  %s3939_s18 = scalar_lea.hbm %s5454_s12, 192 }
  0x1b   : > { %v413_v2 = vld [vmem:[%s411_s26] sm:$0xff]  ;;  %v414_v3 = vld [vmem:[%s411_s26 + $0x8] sm:$0xff]  ;;  %v415_v8 = vld [vmem:[%s411_s26 + $0x10] sm:$0xff]  ;;  %562 = vmatpush.bf16.msra.mxu1 %v3647_v21  ;;  %3687 = vmatpush.bf16.msra.mxu2 %v3647_v21 }
  0x1c   : > { %v421_v4 = vld [vmem:[%s411_s26 + $0x40] sm:$0xff]  ;;  %v425_v5 = vpack.c.bf16 %v414_v3, %v413_v2  ;;  %v422_v6 = vld [vmem:[%s411_s26 + $0x48] sm:$0xff]  ;;  %v416_v9 = vld [vmem:[%s411_s26 + $0x18] sm:$0xff] }
  0x1d   : > { %v429_v7 = vpack.c.bf16 %v422_v6, %v421_v4  ;;  %v423_v10 = vld [vmem:[%s411_s26 + $0x50] sm:$0xff]  ;;  %v424_v11 = vld [vmem:[%s411_s26 + $0x58] sm:$0xff]  ;;  %v426_v12 = vpack.c.bf16 %v416_v9, %v415_v8  ;;  %v417_v14 = vld [vmem:[%s411_s26 + $0x20] sm:$0xff] }
  0x1e   : > { %3288 = vmatmul.msk.bf16.vlgmr.msra.gmra.mxu0 %vm436_vm1, %v425_v5  ;;  %v430_v13 = vpack.c.bf16 %v424_v11, %v423_v10  ;;  %v418_v15 = vld [vmem:[%s411_s26 + $0x28] sm:$0xff]  ;;  %v419_v17 = vld [vmem:[%s411_s26 + $0x30] sm:$0xff]  ;;  %v420_v18 = vld [vmem:[%s411_s26 + $0x38] sm:$0xff] }
  0x1f   : > { %3292 = vmatmul.msk.bf16.vlgmr.msra.gmra.mxu3 %vm436_vm1, %v429_v7  ;;  %v427_v16 = vpack.c.bf16 %v418_v15, %v417_v14  ;;  %v428_v19 = vpack.c.bf16 %v420_v18, %v419_v17  ;;  %v4133_v2 = vld [vmem:[%s5448_s6 + $0x18] sm:$0xff]  ;;  %v4139_v3 = vld [vmem:[%s5448_s6 + $0x10] sm:$0xff]  ;;  %v3738_v11 = vld [vmem:[%s5446_s4] ss:$0 sm:$0xff] }
  0x20   : > { %857 = vmatpush.bf16.msrb.mxu0 %v4133_v2 }
  0x24   : > { %858 = vmatpush.bf16.msrb.mxu0 %v4139_v3 }
  0x2e   : > { %3289 = vmatmul.msk.bf16.gmra.mxu0 %vm436_vm1, %v426_v12 }
  0x2f   : > { %3293 = vmatmul.msk.bf16.gmra.mxu3 %vm436_vm1, %v430_v13 }
  0x3e   : > { %3290 = vmatmul.msk.bf16.gmra.mxu0 %vm436_vm1, %v427_v16 }
  0x4e   : > { %3291 = vmatmul.msk.bf16.gmra.mxu0 %vm436_vm1, %v428_v19 }
  0x9b   : > { %v468_v22 = vpop.f32.mrf.mxu0 }
  0x9c   : > { %v469_v24 = vadd.f32 %v3737_v23, %v468_v22 }
  0x9e   : > { %v498_v28 = vmax.f32 %v469_v24, 0.0 }
  0xa2   : > { %v488_v25 = vpop.f32.mrf.mxu3 }
  0xa3   : > { %v470_v26 = vpop.f32.mrf.mxu0  ;;  %v489_v30 = vadd.f32 %v3737_v23, %v488_v25 }
  0xa4   : > { %v471_v27 = vadd.f32 %v3737_v23, %v470_v26 }
  0xa5   : > { %v506_v33 = vmax.f32 %v489_v30, 0.0 }
  0xa6   : > { %v499_v29 = vmax.f32 %v471_v27, 0.0 }
  0xa8   : > { %v510_v31 = vpack.c.bf16 %v499_v29, %v498_v28 }
  0xaa   : > { %v490_v32 = vpop.f32.mrf.mxu3  ;;  %3302 = vmatmul.msk.bf16.vlgmr.msra.gmra.mxu1 %vm536_vm2, %v510_v31 }
  0xab   : > { %v491_v34 = vadd.f32 %v3737_v23, %v490_v32  ;;  %v473_v35 = vpop.f32.mrf.mxu0 }
  0xac   : > { %v474_v38 = vadd.f32 %v3737_v23, %v473_v35  ;;  %v3657_v35 = vld [vmem:[%s5447_s5 + $0x30] sm:$0xff] }
  0xad   : > { %v507_v36 = vmax.f32 %v491_v34, 0.0  ;;  %v3649_v34 = vld [vmem:[%s5447_s5] sm:$0xff] }
  0xae   : > { %v500_v42 = vmax.f32 %v474_v38, 0.0  ;;  %v3651_v38 = vld [vmem:[%s5447_s5 + $0x10] sm:$0xff] }
  0xaf   : > { %v514_v37 = vpack.c.bf16 %v507_v36, %v506_v33  ;;  %v3650_v36 = vld [vmem:[%s5447_s5 + $0x8] sm:$0xff] }
  0xb1   : > { %3306 = vmatmul.msk.bf16.vlgmr.msra.gmra.mxu2 %vm536_vm2, %v514_v37  ;;  %v3658_v37 = vld [vmem:[%s5447_s5 + $0x38] sm:$0xff] }
  0xb2   : > { %v493_v39 = vpop.f32.mrf.mxu3 }
  0xb3   : > { %v475_v40 = vpop.f32.mrf.mxu0  ;;  %v494_v44 = vadd.f32 %v3737_v23, %v493_v39  ;;  %v3659_v39 = vld [vmem:[%s5447_s5 + $0x40] sm:$0xff] }
  0xb4   : > { %v476_v41 = vadd.f32 %v3737_v23, %v475_v40  ;;  %v3652_v40 = vld [vmem:[%s5447_s5 + $0x18] sm:$0xff] }
  0xb5   : > { %v508_v47 = vmax.f32 %v494_v44, 0.0  ;;  %v3654_v44 = vld [vmem:[%s5447_s5 + $0x28] sm:$0xff] }
  0xb6   : > { %v501_v43 = vmax.f32 %v476_v41, 0.0  ;;  %v3660_v41 = vld [vmem:[%s5447_s5 + $0x48] sm:$0xff] }
  0xb8   : > { %v511_v45 = vpack.c.bf16 %v501_v43, %v500_v42  ;;  %v3653_v42 = vld [vmem:[%s5447_s5 + $0x20] sm:$0xff]  ;;  %v3661_v43 = vld [vmem:[%s5447_s5 + $0x50] sm:$0xff] }
  0xba   : > { %v495_v46 = vpop.f32.mrf.mxu3  ;;  %3303 = vmatmul.msk.bf16.gmra.mxu1 %vm536_vm2, %v511_v45  ;;  %v3662_v45 = vld [vmem:[%s5447_s5 + $0x58] sm:$0xff] }
  0xbb   : > { %v496_v48 = vadd.f32 %v3737_v23, %v495_v46  ;;  %v478_v49 = vpop.f32.mrf.mxu0  ;;  %v3665_v46 = vld [vmem:[%s5447_s5 + $0x60] sm:$0xff] }
  0xbc   : > { %v479_v52 = vadd.f32 %v3737_v23, %v478_v49  ;;  %v3666_v49 = vld [vmem:[%s5447_s5 + $0x68] sm:$0xff] }
  0xbd   : > { %v509_v50 = vmax.f32 %v496_v48, 0.0  ;;  %v4279_v48 = vld [vmem:[%s5448_s6] sm:$0xff] }
  0xbe   : > { %v502_v55 = vmax.f32 %v479_v52, 0.0 }
  0xbf   : > { %v515_v51 = vpack.c.bf16 %v509_v50, %v508_v47  ;;  %v4272_v47 = vld [vmem:[%s5448_s6 + $0x8] sm:$0xff]  ;;  %v3667_v50 = vld [vmem:[%s5447_s5 + $0x70] sm:$0xff] }
  0xc0   : > { %926 = vmatpush.bf16.msrb.mxu1 %v4272_v47 }
  0xc1   : > { %3307 = vmatmul.msk.bf16.gmra.mxu2 %vm536_vm2, %v515_v51 }
  0xc3   : > { %v480_v53 = vpop.f32.mrf.mxu0 }
  0xc4   : > { %v481_v54 = vadd.f32 %v3737_v23, %v480_v53  ;;  %927 = vmatpush.bf16.msrb.mxu1 %v4279_v48 }
  0xc6   : > { %v503_v56 = vmax.f32 %v481_v54, 0.0 }
  0xc8   : > { %v512_v57 = vpack.c.bf16 %v503_v56, %v502_v55 }
  0xca   : > { %3304 = vmatmul.msk.bf16.gmra.mxu1 %vm536_vm2, %v512_v57  ;;  %v3668_v57 = vld [vmem:[%s5447_s5 + $0x78] sm:$0xff] }
  0xcb   : > { %v483_v58 = vpop.f32.mrf.mxu0 }
  0xcc   : > { %v484_v59 = vadd.f32 %v3737_v23, %v483_v58 }
  0xce   : > { %v504_v62 = vmax.f32 %v484_v59, 0.0 }
  0xd3   : > { %v485_v60 = vpop.f32.mrf.mxu0 }
  0xd4   : > { %v486_v61 = vadd.f32 %v3737_v23, %v485_v60 }
  0xd6   : > { %v505_v63 = vmax.f32 %v486_v61, 0.0 }
  0xd8   : > { %v513_v0 = vpack.c.bf16 %v505_v63, %v504_v62 }
  0xda   : > { %3305 = vmatmul.msk.bf16.gmra.mxu1 %vm536_vm2, %v513_v0  ;;  %v3669_v0 = vld [vmem:[%s5447_s5 + $0x80] sm:$0xff] }
 0x127   : > { %v564_v1 = vpop.f32.mrf.mxu1 }
 0x128   : > { %v4199_v32 = vadd.f32 %v3738_v11, %v564_v1 }
 0x12f   : > { %v566_v4 = vpop.f32.mrf.mxu1 }
 0x130   : > { %v4193_v30 = vadd.f32 %v3738_v11, %v566_v4 }
 0x132   : > { %v4206_v33 = vpack.c.bf16 %v4193_v30, %v4199_v32 }
 0x134   : > { %v584_v5 = vpop.f32.mrf.mxu2 }
 0x135   : > { %v4155_v18 = vadd.f32 %v3738_v11, %v584_v5 }
 0x137   : > { %v569_v6 = vpop.f32.mrf.mxu1 }
 0x138   : > { %v4188_v29 = vadd.f32 %v3738_v11, %v569_v6 }
 0x13c   : > { %v586_v7 = vpop.f32.mrf.mxu2 }
 0x13d   : > { %v4149_v15 = vadd.f32 %v3738_v11, %v586_v7 }
 0x13f   : > { %v571_v8 = vpop.f32.mrf.mxu1  ;;  %v4162_v19 = vpack.c.bf16 %v4149_v15, %v4155_v18 }
 0x140   : > { %v4182_v27 = vadd.f32 %v3738_v11, %v571_v8 }
 0x142   : > { %v4197_v31 = vpack.c.bf16 %v4182_v27, %v4188_v29 }
 0x144   : > { %v589_v9 = vpop.f32.mrf.mxu2 }
 0x145   : > { %v4145_v13 = vadd.f32 %v3738_v11, %v589_v9  ;;  %v3670_v9 = vld [vmem:[%s5447_s5 + $0x88] sm:$0xff] }
 0x147   : > { %v574_v10 = vpop.f32.mrf.mxu1 }
 0x148   : > { %v4177_v26 = vadd.f32 %v3738_v11, %v574_v10 }
 0x14c   : > { %v591_v12 = vpop.f32.mrf.mxu2 }
 0x14d   : > { %v4147_v14 = vadd.f32 %v3738_v11, %v591_v12 }
 0x14f   : > { %v4153_v16 = vpack.c.bf16 %v4147_v14, %v4145_v13  ;;  %v576_v17 = vpop.f32.mrf.mxu1 }
 0x150   : > { %v4171_v24 = vadd.f32 %v3738_v11, %v576_v17 }
 0x151   : > { %663 = vmatpush.bf16.msrb.mxu2 %v4153_v16  ;;  %773 = vmatpush.bf16.msrb.mxu3 %v4153_v16 }
 0x152   : > { %1214 = vmatpush.bf16.msra.mxu0 %v4153_v16  ;;  %v4186_v28 = vpack.c.bf16 %v4171_v24, %v4177_v26 }
 0x155   : > { %664 = vmatpush.bf16.msrb.mxu2 %v4162_v19  ;;  %774 = vmatpush.bf16.msrb.mxu3 %v4162_v19 }
 0x156   : > { %1215 = vmatpush.bf16.msra.mxu0 %v4162_v19 }
 0x157   : > { %v579_v20 = vpop.f32.mrf.mxu1 }
 0x158   : > { %v4167_v22 = vadd.f32 %v3738_v11, %v579_v20 }
 0x15f   : > { %v581_v21 = vpop.f32.mrf.mxu1 }
 0x160   : > { %v4169_v23 = vadd.f32 %v3738_v11, %v581_v21 }
 0x162   : > { %v4175_v25 = vpack.c.bf16 %v4169_v23, %v4167_v22 }
 0x164   : > { %665 = vmatpush.bf16.msrb.mxu2 %v4175_v25  ;;  %775 = vmatpush.bf16.msrb.mxu3 %v4175_v25 }
 0x165   : > { %1216 = vmatpush.bf16.msra.mxu0 %v4175_v25 }
 0x168   : > { %666 = vmatpush.bf16.msrb.mxu2 %v4186_v28  ;;  %776 = vmatpush.bf16.msrb.mxu3 %v4186_v28 }
 0x169   : > { %1217 = vmatpush.bf16.msra.mxu0 %v4186_v28 }
 0x16c   : > { %667 = vmatpush.bf16.msrb.mxu2 %v4197_v31  ;;  %777 = vmatpush.bf16.msrb.mxu3 %v4197_v31 }
 0x16d   : > { %1218 = vmatpush.bf16.msra.mxu0 %v4197_v31 }
 0x170   : > { %668 = vmatpush.bf16.msrb.mxu2 %v4206_v33  ;;  %778 = vmatpush.bf16.msrb.mxu3 %v4206_v33 }
 0x171   : > { %1219 = vmatpush.bf16.msra.mxu0 %v4206_v33 }
 0x173   : > { %3332 = vmatmul.msk.bf16.vlgmr.msrb.gmra.mxu2 %vm642_vm3, %v3649_v34  ;;  %3374 = vmatmul.msk.bf16.vlgmr.msrb.gmra.mxu3 %vm642_vm3, %v3657_v35 }
 0x174   : > { %1022 = vmatpush.bf16.msra.mxu2 %v4153_v16  ;;  %3688 = vmatpush.bf16.msra.mxu3 %v4272_v47 }
 0x178   : > { %1023 = vmatpush.bf16.msra.mxu2 %v4162_v19  ;;  %3689 = vmatpush.bf16.msra.mxu3 %v4279_v48 }
 0x17c   : > { %1024 = vmatpush.bf16.msra.mxu2 %v4175_v25 }
 0x180   : > { %1025 = vmatpush.bf16.msra.mxu2 %v4186_v28 }
 0x183   : > { %3333 = vmatmul.msk.bf16.gmra.mxu2 %vm642_vm3, %v3650_v36  ;;  %3375 = vmatmul.msk.bf16.gmra.mxu3 %vm642_vm3, %v3658_v37  ;;  %v3672_v36 = vld [vmem:[%s5448_s6 + $0x28] sm:$0xff] }
 0x184   : > { %1026 = vmatpush.bf16.msra.mxu2 %v4197_v31  ;;  %1106 = vmatpush.bf16.msrb.mxu3 %v3672_v36 }
 0x188   : > { %1027 = vmatpush.bf16.msra.mxu2 %v4206_v33 }
 0x193   : > { %3334 = vmatmul.msk.bf16.gmra.mxu2 %vm642_vm3, %v3651_v38  ;;  %3376 = vmatmul.msk.bf16.gmra.mxu3 %vm642_vm3, %v3659_v39  ;;  %v3671_v39 = vld [vmem:[%s5448_s6 + $0x20] sm:$0xff] }
 0x194   : > { %1107 = vmatpush.bf16.msrb.mxu3 %v3671_v39 }
 0x1a3   : > { %3335 = vmatmul.msk.bf16.gmra.mxu2 %vm642_vm3, %v3652_v40  ;;  %3377 = vmatmul.msk.bf16.gmra.mxu3 %vm642_vm3, %v3660_v41 }
 0x1b3   : > { %3336 = vmatmul.msk.bf16.gmra.mxu2 %vm642_vm3, %v3653_v42  ;;  %3378 = vmatmul.msk.bf16.gmra.mxu3 %vm642_vm3, %v3661_v43 }
 0x1c3   : > { %3337 = vmatmul.msk.bf16.gmra.mxu2 %vm642_vm3, %v3654_v44  ;;  %3379 = vmatmul.msk.bf16.gmra.mxu3 %vm642_vm3, %v3662_v45 }
 0x1d3   : > { %3448 = vmatmul.msk.bf16.vlgmr.msra.gmra.mxu2 %vm642_vm3, %v3665_v46 }
 0x1e3   : > { %3449 = vmatmul.msk.bf16.gmra.mxu2 %vm642_vm3, %v3666_v49 }
 0x1f3   : > { %3450 = vmatmul.msk.bf16.gmra.mxu2 %vm642_vm3, %v3667_v50 }
 0x1f6   : > { %v670_v51 = vpop.f32.mrf.mxu2  ;;  %v780_v52 = vpop.f32.mrf.mxu3 }
 0x1fe   : > { %v672_v53 = vpop.f32.mrf.mxu2  ;;  %v782_v54 = vpop.f32.mrf.mxu3 }
 0x1ff   : > { %v700_v55 = vpack.c.bf16 %v672_v53, %v670_v51  ;;  %v810_v56 = vpack.c.bf16 %v782_v54, %v780_v52  ;;  %v3673_v51 = vld [vmem:[%s5447_s5 + $0x90] sm:$0xff] }
 0x201   : > { %3392 = vmatmul.msk.bf16.vlgmr.msrb.gmra.mxu0 %vm536_vm2, %v810_v56  ;;  %3406 = vmatmul.msk.bf16.vlgmr.msrb.gmra.mxu1 %vm536_vm2, %v700_v55  ;;  %v3674_v55 = vld [vmem:[%s5447_s5 + $0x98] sm:$0xff] }
 0x203   : > { %3451 = vmatmul.msk.bf16.gmra.mxu2 %vm642_vm3, %v3668_v57 }
 0x206   : > { %v675_v58 = vpop.f32.mrf.mxu2  ;;  %v785_v59 = vpop.f32.mrf.mxu3 }
 0x20e   : > { %v677_v60 = vpop.f32.mrf.mxu2  ;;  %v787_v61 = vpop.f32.mrf.mxu3 }
 0x20f   : > { %v701_v62 = vpack.c.bf16 %v677_v60, %v675_v58  ;;  %v811_v63 = vpack.c.bf16 %v787_v61, %v785_v59  ;;  %v3675_v59 = vld [vmem:[%s5447_s5 + $0xa0] sm:$0xff] }
 0x211   : > { %3393 = vmatmul.msk.bf16.gmra.mxu0 %vm536_vm2, %v811_v63  ;;  %3407 = vmatmul.msk.bf16.gmra.mxu1 %vm536_vm2, %v701_v62 }
 0x213   : > { %3452 = vmatmul.msk.bf16.gmra.mxu2 %vm642_vm3, %v3669_v0 }
 0x216   : > { %v680_v1 = vpop.f32.mrf.mxu2  ;;  %v790_v4 = vpop.f32.mrf.mxu3 }
 0x21e   : > { %v682_v5 = vpop.f32.mrf.mxu2  ;;  %v792_v6 = vpop.f32.mrf.mxu3 }
 0x21f   : > { %v702_v7 = vpack.c.bf16 %v682_v5, %v680_v1  ;;  %v812_v8 = vpack.c.bf16 %v792_v6, %v790_v4  ;;  %v3676_v6 = vld [vmem:[%s5447_s5 + $0xa8] sm:$0xff] }
 0x221   : > { %3394 = vmatmul.msk.bf16.gmra.mxu0 %vm536_vm2, %v812_v8  ;;  %3408 = vmatmul.msk.bf16.gmra.mxu1 %vm536_vm2, %v702_v7 }
 0x223   : > { %3453 = vmatmul.msk.bf16.gmra.mxu2 %vm642_vm3, %v3670_v9 }
 0x226   : > { %v685_v10 = vpop.f32.mrf.mxu2  ;;  %v795_v11 = vpop.f32.mrf.mxu3 }
 0x22e   : > { %v687_v12 = vpop.f32.mrf.mxu2  ;;  %v797_v17 = vpop.f32.mrf.mxu3 }
 0x22f   : > { %v703_v20 = vpack.c.bf16 %v687_v12, %v685_v10  ;;  %v813_v21 = vpack.c.bf16 %v797_v17, %v795_v11 }
 0x231   : > { %3395 = vmatmul.msk.bf16.gmra.mxu0 %vm536_vm2, %v813_v21  ;;  %3409 = vmatmul.msk.bf16.gmra.mxu1 %vm536_vm2, %v703_v20  ;;  %v3684_v21 = vld [vmem:[%s5451_s9 + $0x8] sm:$0xff] }
 0x236   : > { %v690_v34 = vpop.f32.mrf.mxu2  ;;  %v800_v35 = vpop.f32.mrf.mxu3 }
 0x23e   : > { %v692_v37 = vpop.f32.mrf.mxu2  ;;  %v802_v38 = vpop.f32.mrf.mxu3 }
 0x23f   : > { %v704_v40 = vpack.c.bf16 %v692_v37, %v690_v34  ;;  %v814_v41 = vpack.c.bf16 %v802_v38, %v800_v35  ;;  %v3677_v34 = vld [vmem:[%s5447_s5 + $0xb0] sm:$0xff]  ;;  %v3683_v37 = vld [vmem:[%s5451_s9] sm:$0xff] }
 0x241   : > { %3396 = vmatmul.msk.bf16.gmra.mxu0 %vm536_vm2, %v814_v41  ;;  %3410 = vmatmul.msk.bf16.gmra.mxu1 %vm536_vm2, %v704_v40 }
 0x246   : > { %v695_v42 = vpop.f32.mrf.mxu2  ;;  %v805_v43 = vpop.f32.mrf.mxu3 }
 0x24e   : > { %v697_v44 = vpop.f32.mrf.mxu2  ;;  %v807_v45 = vpop.f32.mrf.mxu3 }
 0x24f   : > { %v705_v46 = vpack.c.bf16 %v697_v44, %v695_v42  ;;  %v815_v49 = vpack.c.bf16 %v807_v45, %v805_v43  ;;  %v3678_v44 = vld [vmem:[%s5447_s5 + $0xb8] sm:$0xff] }
 0x251   : > { %3397 = vmatmul.msk.bf16.gmra.mxu0 %vm536_vm2, %v815_v49  ;;  %3411 = vmatmul.msk.bf16.vlgmr.msra.gmra.mxu3 %vm536_vm2, %v705_v46 }
 0x252   : > { %1510 = vmatpush.bf16.msra.mxu3 %v3684_v21 }
 0x256   : > { %v1029_v50 = vpop.f32.mrf.mxu2  ;;  %1511 = vmatpush.bf16.msra.mxu3 %v3683_v37 }
 0x25e   : > { %v1031_v52 = vpop.f32.mrf.mxu2 }
 0x25f   : > { %v1059_v53 = vpack.c.bf16 %v1031_v52, %v1029_v50 }
 0x261   : > { %3466 = vmatmul.msk.bf16.vlgmr.msrb.gmra.mxu3 %vm536_vm2, %v1059_v53  ;;  %3508 = vmatmul.msk.bf16.vlgmr.msra.gmra.mxu0 %vm642_vm3, %v3673_v51 }
 0x262   : > { %2260 = vmatpush.bf16.msrb.mxu3 %v4272_v47 }
 0x266   : > { %v1034_v54 = vpop.f32.mrf.mxu2  ;;  %2261 = vmatpush.bf16.msrb.mxu3 %v4279_v48 }
 0x26e   : > { %v1036_v56 = vpop.f32.mrf.mxu2 }
 0x26f   : > { %v1060_v57 = vpack.c.bf16 %v1036_v56, %v1034_v54 }
 0x271   : > { %3467 = vmatmul.msk.bf16.gmra.mxu3 %vm536_vm2, %v1060_v57  ;;  %3509 = vmatmul.msk.bf16.gmra.mxu0 %vm642_vm3, %v3674_v55  ;;  %v3680_v55 = vld [vmem:[%s5448_s6 + $0x38] sm:$0xff]  ;;  %v3679_v57 = vld [vmem:[%s5448_s6 + $0x30] sm:$0xff] }
 0x272   : > { %1298 = vmatpush.bf16.msra.mxu1 %v3680_v55 }
 0x276   : > { %v1039_v58 = vpop.f32.mrf.mxu2  ;;  %1299 = vmatpush.bf16.msra.mxu1 %v3679_v57 }
 0x27e   : > { %v860_v60 = vpop.f32.mrf.mxu0  ;;  %v929_v61 = vpop.f32.mrf.mxu1 }
 0x27f   : > { %v4334_v62 = vadd.f32 %v929_v61, %v860_v60  ;;  %v1041_v63 = vpop.f32.mrf.mxu2 }
 0x280   : > { %v1061_v0 = vpack.c.bf16 %v1041_v63, %v1039_v58 }
 0x281   : > { %3510 = vmatmul.msk.bf16.gmra.mxu0 %vm642_vm3, %v3675_v59 }
 0x282   : > { %3468 = vmatmul.msk.bf16.gmra.mxu3 %vm536_vm2, %v1061_v0 }
 0x286   : > { %v4338_v1 = vpop.f32.mrf.mxu0  ;;  %v4340_v4 = vpop.f32.mrf.mxu1 }
 0x287   : > { %v1044_v5 = vpop.f32.mrf.mxu2 }
 0x28e   : > { %v865_v7 = vpop.f32.mrf.mxu0  ;;  %v934_v8 = vpop.f32.mrf.mxu1 }
 0x28f   : > { %v4345_v9 = vadd.f32 %v934_v8, %v865_v7  ;;  %v1046_v10 = vpop.f32.mrf.mxu2 }
 0x290   : > { %v1062_v11 = vpack.c.bf16 %v1046_v10, %v1044_v5 }
 0x291   : > { %3511 = vmatmul.msk.bf16.gmra.mxu0 %vm642_vm3, %v3676_v6 }
 0x292   : > { %3469 = vmatmul.msk.bf16.gmra.mxu3 %vm536_vm2, %v1062_v11 }
 0x296   : > { %v4349_v12 = vpop.f32.mrf.mxu0  ;;  %v4351_v17 = vpop.f32.mrf.mxu1 }
 0x297   : > { %v1049_v20 = vpop.f32.mrf.mxu2 }
 0x29e   : > { %v870_v35 = vpop.f32.mrf.mxu0  ;;  %v939_v36 = vpop.f32.mrf.mxu1 }
 0x29f   : > { %v940_v38 = vadd.f32 %v939_v36, %v870_v35  ;;  %v1051_v39 = vpop.f32.mrf.mxu2 }
 0x2a0   : > { %v1063_v40 = vpack.c.bf16 %v1051_v39, %v1049_v20 }
 0x2a1   : > { %3512 = vmatmul.msk.bf16.gmra.mxu0 %vm642_vm3, %v3677_v34 }
 0x2a2   : > { %3470 = vmatmul.msk.bf16.gmra.mxu3 %vm536_vm2, %v1063_v40 }
 0x2a6   : > { %v4366_v41 = vpop.f32.mrf.mxu0  ;;  %v4368_v42 = vpop.f32.mrf.mxu1 }
 0x2a7   : > { %v1054_v43 = vpop.f32.mrf.mxu2 }
 0x2ae   : > { %v875_v45 = vpop.f32.mrf.mxu0  ;;  %v944_v46 = vpop.f32.mrf.mxu1 }
 0x2af   : > { %v945_v49 = vadd.f32 %v944_v46, %v875_v45  ;;  %v1056_v50 = vpop.f32.mrf.mxu2 }
 0x2b0   : > { %v1064_v51 = vpack.c.bf16 %v1056_v50, %v1054_v43 }
 0x2b1   : > { %3513 = vmatmul.msk.bf16.gmra.mxu0 %vm642_vm3, %v3678_v44 }
 0x2b2   : > { %3471 = vmatmul.msk.bf16.gmra.mxu3 %vm536_vm2, %v1064_v51 }
 0x2b6   : > { %v4375_v47 = vpop.f32.mrf.mxu0  ;;  %v4377_v48 = vpop.f32.mrf.mxu1 }
 0x2be   : > { %v880_v52 = vpop.f32.mrf.mxu0  ;;  %v949_v53 = vpop.f32.mrf.mxu1 }
 0x2bf   : > { %v950_v54 = vadd.f32 %v949_v53, %v880_v52 }
 0x2c2   : > { %3554 = vmatmul.msk.bf16.vlgmr.msra.gmra.mxu3 %vm536_vm2, %v4206_v33 }
 0x2c3   : > { %2476 = vmatpush.bf16.msra.mxu3 %v3680_v55 }
 0x2c6   : > { %v4384_v56 = vpop.f32.mrf.mxu0 }
 0x2c7   : > { %2477 = vmatpush.bf16.msra.mxu3 %v3679_v57 }
 0x2ce   : > { %v885_v58 = vpop.f32.mrf.mxu0 }
 0x2d2   : > { %3555 = vmatmul.msk.bf16.gmra.mxu3 %vm536_vm2, %v4197_v31 }
 0x2d4   : > { %v954_v59 = vpop.f32.mrf.mxu3 }
 0x2d5   : > { %v955_v33 = vadd.f32 %v954_v59, %v885_v58 }
 0x2d6   : > { %v4391_v60 = vpop.f32.mrf.mxu0 }
 0x2dc   : > { %v4393_v61 = vpop.f32.mrf.mxu3 }
 0x2de   : > { %v1221_v63 = vpop.f32.mrf.mxu0 }
 0x2e2   : > { %3556 = vmatmul.msk.bf16.gmra.mxu3 %vm536_vm2, %v4186_v28 }
 0x2e4   : > { %v1109_v0 = vpop.f32.mrf.mxu3 }
 0x2e5   : > { %v1139_v5 = vadd.f32 %v1109_v0, %v4334_v62 }
 0x2e6   : > { %v1223_v6 = vpop.f32.mrf.mxu0 }
 0x2e7   : > { %v1251_v7 = vpack.c.bf16 %v1223_v6, %v1221_v63 }
 0x2e9   : > { %3526 = vmatmul.msk.bf16.vlgmr.msra.gmra.mxu1 %vm536_vm2, %v1251_v7  ;;  %v4443_v7 = vpop.f32.mrf.mxu1 }
 0x2ec   : > { %v1111_v8 = vpop.f32.mrf.mxu3 }
 0x2ee   : > { %v1226_v10 = vpop.f32.mrf.mxu0 }
 0x2f2   : > { %3557 = vmatmul.msk.bf16.gmra.mxu3 %vm536_vm2, %v4175_v25 }
 0x2f4   : > { %v1114_v31 = vpop.f32.mrf.mxu3 }
 0x2f5   : > { %v4402_v11 = vadd.f32 %v1114_v31, %v4345_v9 }
 0x2f6   : > { %v1228_v20 = vpop.f32.mrf.mxu0 }
 0x2f7   : > { %v1252_v21 = vpack.c.bf16 %v1228_v20, %v1226_v10 }
 0x2f9   : > { %3527 = vmatmul.msk.bf16.gmra.mxu1 %vm536_vm2, %v1252_v21  ;;  %v932_v21 = vadd.f32 %v4340_v4, %v4338_v1 }
 0x2fc   : > { %v4405_v28 = vpop.f32.mrf.mxu3 }
 0x2fe   : > { %v1231_v62 = vpop.f32.mrf.mxu0 }
 0x302   : > { %3558 = vmatmul.msk.bf16.gmra.mxu3 %vm536_vm2, %v4162_v19 }
 0x305   : > { %v1119_v34 = vpop.f32.mrf.mxu3 }
 0x306   : > { %v4409_v35 = vadd.f32 %v1119_v34, %v940_v38  ;;  %v1233_v36 = vpop.f32.mrf.mxu0 }
 0x307   : > { %v1253_v37 = vpack.c.bf16 %v1233_v36, %v1231_v62  ;;  %v1140_v62 = vadd.f32 %v1111_v8, %v932_v21  ;;  %v4452_v36 = vld [vmem:[%s5449_s7] ss:$0 sm:$0xff] }
 0x309   : > { %3528 = vmatmul.msk.bf16.gmra.mxu1 %vm536_vm2, %v1253_v37 }
 0x30d   : > { %v4412_v25 = vpop.f32.mrf.mxu3 }
 0x30e   : > { %v1236_v9 = vpop.f32.mrf.mxu0 }
 0x312   : > { %3559 = vmatmul.msk.bf16.gmra.mxu3 %vm536_vm2, %v4153_v16 }
 0x315   : > { %v1124_v39 = vpop.f32.mrf.mxu3 }
 0x316   : > { %v4416_v40 = vadd.f32 %v1124_v39, %v945_v49  ;;  %v1238_v43 = vpop.f32.mrf.mxu0 }
 0x317   : > { %v1254_v44 = vpack.c.bf16 %v1238_v43, %v1236_v9 }
 0x319   : > { %3529 = vmatmul.msk.bf16.gmra.mxu1 %vm536_vm2, %v1254_v44 }
 0x31d   : > { %v4419_v19 = vpop.f32.mrf.mxu3 }
 0x31e   : > { %v1241_v38 = vpop.f32.mrf.mxu0 }
 0x325   : > { %v1129_v45 = vpop.f32.mrf.mxu3 }
 0x326   : > { %v4421_v46 = vadd.f32 %v1129_v45, %v950_v54  ;;  %v1243_v50 = vpop.f32.mrf.mxu0  ;;  %v3682_v54 = vld [vmem:[%s5450_s8 + $0x8] sm:$0xff] }
 0x327   : > { %v1255_v51 = vpack.c.bf16 %v1243_v50, %v1241_v38  ;;  %1433 = vmatpush.bf16.msrb.mxu2 %v3682_v54 }
 0x329   : > { %3530 = vmatmul.msk.bf16.gmra.mxu1 %vm536_vm2, %v1255_v51  ;;  %v937_v51 = vadd.f32 %v4351_v17, %v4349_v12 }
 0x32d   : > { %v4424_v52 = vpop.f32.mrf.mxu3 }
 0x32e   : > { %v1246_v16 = vpop.f32.mrf.mxu0 }
 0x335   : > { %v1134_v53 = vpop.f32.mrf.mxu3 }
 0x336   : > { %v4426_v49 = vadd.f32 %v1134_v53, %v955_v33  ;;  %v1248_v55 = vpop.f32.mrf.mxu0  ;;  %v3681_v33 = vld [vmem:[%s5450_s8] sm:$0xff] }
 0x337   : > { %v1256_v57 = vpack.c.bf16 %v1248_v55, %v1246_v16  ;;  %1434 = vmatpush.bf16.msrb.mxu2 %v3681_v33  ;;  %v1142_v16 = vadd.f32 %v4405_v28, %v937_v51 }
 0x339   : > { %3531 = vmatmul.msk.bf16.gmra.mxu1 %vm536_vm2, %v1256_v57 }
 0x33b   : > { %2203 = vmatpush.bf16.msra.mxu2 %v4133_v2 }
 0x33d   : > { %v4429_v58 = vpop.f32.mrf.mxu3 }
 0x33f   : > { %2204 = vmatpush.bf16.msra.mxu2 %v4139_v3 }
 0x345   : > { %v4434_v59 = vpop.f32.mrf.mxu3 }
 0x34d   : > { %v1515_v63 = vpop.f32.mrf.mxu3 }
 0x355   : > { %v1518_v0 = vpop.f32.mrf.mxu3 }
 0x35d   : > { %v4440_v6 = vpop.f32.mrf.mxu3 }
 0x365   : > { %v4445_v10 = vpop.f32.mrf.mxu3 }
 0x366   : > { %v1301_v31 = vpop.f32.mrf.mxu1 }
 0x367   : > { %v1331_v20 = vadd.f32 %v1301_v31, %v1139_v5  ;;  %v4459_v5 = vld [vmem:[%s5453_s11] ss:$0 sm:$0xff] }
 0x368   : > { %v4479_v17 = vadd.f32 %v4459_v5, %v1518_v0 }
 0x369   : > { %v1343_v34 = vmul.f32 0.25, %v1331_v20 }
 0x36b   : > { %v1359_v3 = vadd.f32 %v4452_v36, %v1343_v34 }
 0x36d   : > { %v1525_v2 = vpop.f32.mrf.mxu3  ;;  %v1371_v1 = vmax.f32 %v1359_v3, 0.0  ;;  %v942_v3 = vadd.f32 %v4368_v42, %v4366_v41 }
 0x36e   : > { %v1303_v37 = vpop.f32.mrf.mxu1 }
 0x36f   : > { %v1332_v9 = vadd.f32 %v1303_v37, %v1140_v62  ;;  %v1144_v0 = vadd.f32 %v4412_v25, %v942_v3  ;;  %v952_v3 = vadd.f32 %v4443_v7, %v4384_v56 }
 0x371   : > { %v1344_v39 = vmul.f32 0.25, %v1332_v9 }
 0x373   : > { %v1360_v43 = vadd.f32 %v4452_v36, %v1344_v39 }
 0x375   : > { %v1372_v4 = vmax.f32 %v1360_v43, 0.0  ;;  %v1528_v8 = vpop.f32.mrf.mxu3 }
 0x376   : > { %v4462_v44 = vadd.f32 %v4459_v5, %v1528_v8  ;;  %v1306_v38 = vpop.f32.mrf.mxu1 }
 0x377   : > { %v1383_v45 = vpack.c.bf16 %v1372_v4, %v1371_v1  ;;  %v1333_v50 = vadd.f32 %v1306_v38, %v4402_v11  ;;  %v4494_v1 = vadd.f32 %v4459_v5, %v1515_v63 }
 0x378   : > { %1807 = vrot.lane.b32.xlu2 %v4462_v44, %s3983_s16 }
 0x379   : > { %3540 = vmatmul.msk.bf16.vlgmr.msrb.gmra.mxu2 %vm536_vm2, %v1383_v45  ;;  %v1345_v53 = vmul.f32 0.25, %v1333_v50  ;;  %v4506_v50 = vadd.f32 %v4459_v5, %v1525_v2 }
 0x37b   : > { %v1361_v31 = vadd.f32 %v4452_v36, %v1345_v53 }
 0x37d   : > { %v1530_v55 = vpop.f32.mrf.mxu3  ;;  %v1373_v21 = vmax.f32 %v1361_v31, 0.0 }
 0x37e   : > { %v4472_v57 = vadd.f32 %v4459_v5, %v1530_v55  ;;  %v1308_v54 = vpop.f32.mrf.mxu1 }
 0x37f   : > { %v1334_v33 = vadd.f32 %v1308_v54, %v1142_v16  ;;  %v947_v54 = vadd.f32 %v4377_v48, %v4375_v47 }
 0x380   : > { %1809 = vrot.lane.b32.xlu2 %v4472_v57, %s3983_s16 }
 0x381   : > { %v1346_v11 = vmul.f32 0.25, %v1334_v33  ;;  %v1146_v2 = vadd.f32 %v4419_v19, %v947_v54 }
 0x383   : > { %v1362_v20 = vadd.f32 %v4452_v36, %v1346_v11  ;;  %v4522_v11 = vadd.f32 %v4459_v5, %v4434_v59  ;;  %v1524_v59 = vadd.f32 %v4459_v5, %v4445_v10 }
 0x385   : > { %v1374_v62 = vmax.f32 %v1362_v20, 0.0  ;;  %v1533_v12 = vpop.f32.mrf.mxu3 }
 0x386   : > { %v4482_v28 = vadd.f32 %v4459_v5, %v1533_v12  ;;  %v1311_v34 = vpop.f32.mrf.mxu1 }
 0x387   : > { %v1384_v37 = vpack.c.bf16 %v1374_v62, %v1373_v21  ;;  %v1335_v9 = vadd.f32 %v1311_v34, %v4409_v35 }
 0x388   : > { %1811 = vrot.lane.b32.xlu1 %v4482_v28, %s3983_s16  ;;  %1799 = vrot.lane.b32.xlu2 %v4479_v17, %s3983_s16 }
 0x389   : > { %3541 = vmatmul.msk.bf16.gmra.mxu2 %vm536_vm2, %v1384_v37  ;;  %v1347_v39 = vmul.f32 0.25, %v1335_v9 }
 0x38b   : > { %v1363_v41 = vadd.f32 %v4452_v36, %v1347_v39 }
 0x38d   : > { %v1535_v43 = vpop.f32.mrf.mxu3  ;;  %v1375_v25 = vmax.f32 %v1363_v41, 0.0 }
 0x38e   : > { %v4497_v4 = vadd.f32 %v4459_v5, %v1535_v43  ;;  %v1313_v8 = vpop.f32.mrf.mxu1  ;;  %v4543_v43 = vadd.f32 %v4459_v5, %v4440_v6  ;;  %v957_v6 = vadd.f32 %v4393_v61, %v4391_v60  ;;  %v4562_v60 = vld [vmem:[%s5452_s10] ss:$0 sm:$0xff] }
 0x38f   : > { %v1336_v38 = vadd.f32 %v1313_v8, %v1144_v0  ;;  %v1148_v0 = vadd.f32 %v4424_v52, %v952_v3 }
 0x390   : > { %1813 = vrot.lane.b32.xlu1 %v4497_v4, %s3983_s16  ;;  %1797 = vrot.lane.b32.xlu2 %v4494_v1, %s3983_s16 }
 0x391   : > { %v1348_v42 = vmul.f32 0.25, %v1336_v38 }
 0x393   : > { %v1364_v35 = vadd.f32 %v4452_v36, %v1348_v42 }
 0x395   : > { %v1376_v45 = vmax.f32 %v1364_v35, 0.0  ;;  %v1538_v63 = vpop.f32.mrf.mxu3 }
 0x396   : > { %v4509_v51 = vadd.f32 %v4459_v5, %v1538_v63  ;;  %v1316_v16 = vpop.f32.mrf.mxu1 }
 0x397   : > { %v1385_v53 = vpack.c.bf16 %v1376_v45, %v1375_v25  ;;  %v1337_v55 = vadd.f32 %v1316_v16, %v4416_v40 }
 0x398   : > { %1815 = vrot.lane.b32.xlu0 %v4509_v51, %s3983_s16  ;;  %1805 = vrot.lane.b32.xlu1 %v4506_v50, %s3983_s16 }
 0x399   : > { %3542 = vmatmul.msk.bf16.gmra.mxu2 %vm536_vm2, %v1385_v53  ;;  %v1349_v33 = vmul.f32 0.25, %v1337_v55 }
 0x39b   : > { %v1365_v47 = vadd.f32 %v4452_v36, %v1349_v33 }
 0x39d   : > { %v1540_v31 = vpop.f32.mrf.mxu3  ;;  %v1377_v19 = vmax.f32 %v1365_v47, 0.0 }
 0x39e   : > { %v4525_v20 = vadd.f32 %v4459_v5, %v1540_v31  ;;  %v1318_v21 = vpop.f32.mrf.mxu1  ;;  %v1150_v5 = vadd.f32 %v4429_v58, %v957_v6 }
 0x39f   : > { %v1338_v62 = vadd.f32 %v1318_v21, %v1146_v2 }
 0x3a0   : > { %1817 = vrot.lane.b32.xlu0 %v4525_v20, %s3983_s16  ;;  %1795 = vrot.lane.b32.xlu1 %v4522_v11, %s3983_s16 }
 0x3a1   : > { %v1350_v48 = vmul.f32 0.25, %v1338_v62 }
 0x3a3   : > { %v1366_v40 = vadd.f32 %v4452_v36, %v1350_v48 }
 0x3a5   : > { %v1378_v12 = vmax.f32 %v1366_v40, 0.0 }
 0x3a6   : > { %v1321_v34 = vpop.f32.mrf.mxu1 }
 0x3a7   : > { %v1386_v37 = vpack.c.bf16 %v1378_v12, %v1377_v19  ;;  %v1339_v9 = vadd.f32 %v1321_v34, %v4421_v46 }
 0x3a8   : > { %1803 = vrot.lane.b32.xlu0 %v1524_v59, %s3983_s16 }
 0x3a9   : > { %3543 = vmatmul.msk.bf16.gmra.mxu2 %vm536_vm2, %v1386_v37  ;;  %v1351_v39 = vmul.f32 0.25, %v1339_v9 }
 0x3ab   : > { %v1367_v38 = vadd.f32 %v4452_v36, %v1351_v39 }
 0x3ad   : > { %v1379_v42 = vmax.f32 %v1367_v38, 0.0 }
 0x3ae   : > { %v1323_v8 = vpop.f32.mrf.mxu1 }
 0x3af   : > { %v1340_v10 = vadd.f32 %v1323_v8, %v1148_v0 }
 0x3b0   : > { %1801 = vrot.lane.b32.xlu0 %v4543_v43, %s3983_s16 }
 0x3b1   : > { %v1352_v46 = vmul.f32 0.25, %v1340_v10 }
 0x3b3   : > { %v1368_v41 = vadd.f32 %v4452_v36, %v1352_v46 }
 0x3b5   : > { %v1380_v35 = vmax.f32 %v1368_v41, 0.0 }
 0x3b6   : > { %v1326_v56 = vpop.f32.mrf.mxu1 }
 0x3b7   : > { %v1387_v7 = vpack.c.bf16 %v1380_v35, %v1379_v42  ;;  %v1341_v52 = vadd.f32 %v1326_v56, %v4426_v49 }
 0x3b9   : > { %3544 = vmatmul.msk.bf16.gmra.mxu2 %vm536_vm2, %v1387_v7  ;;  %v1353_v25 = vmul.f32 0.25, %v1341_v52 }
 0x3bb   : > { %v1369_v16 = vadd.f32 %v4452_v36, %v1353_v25 }
 0x3bd   : > { %v1381_v54 = vmax.f32 %v1369_v16, 0.0 }
 0x3be   : > { %v1328_v45 = vpop.f32.mrf.mxu1 }
 0x3bf   : > { %v1342_v63 = vadd.f32 %v1328_v45, %v1150_v5 }
 0x3c1   : > { %v1354_v53 = vmul.f32 0.25, %v1342_v63 }
 0x3c3   : > { %v1370_v55 = vadd.f32 %v4452_v36, %v1354_v53 }
 0x3c5   : > { %v1382_v2 = vmax.f32 %v1370_v55, 0.0 }
 0x3c7   : > { %v1388_v33 = vpack.c.bf16 %v1382_v2, %v1381_v54 }
 0x3c9   : > { %3545 = vmatmul.msk.bf16.gmra.mxu2 %vm536_vm2, %v1388_v33 }
 0x3d2   : > { %v4571_v47 = vpop.permute.xlu2 %1807 }
 0x3da   : > { %v4577_v3 = vpop.permute.xlu2 %1809 }
 0x3e2   : > { %v1800_v25 = vpop.permute.xlu2 %1799 }
 0x3fa   : > { %v4600_v54 = vpop.permute.xlu1 %1811 }
 0x3fc   : > { %v4557_v49 = vpop.f32.mrf.mxu2 }
 0x404   : > { %v1438_v31 = vpop.f32.mrf.mxu2 }
 0x405   : > { %v4587_v35 = vadd.f32 %v4562_v60, %v1438_v31 }
 0x407   : > { %v1544_v63 = vadd.f32 %v4494_v1, %v4587_v35 }
 0x409   : > { %v3561_v33 = vmul.f32 -1.442695, %v1544_v63 }
 0x40a   : > { %v4584_v42 = vpop.permute.xlu0 %1815 }
 0x40c   : > { %v1441_v61 = vpop.f32.mrf.mxu2 }
 0x40d   : > { %v4565_v58 = vadd.f32 %v4562_v60, %v1441_v61 }
 0x40f   : > { %v1545_v36 = vadd.f32 %v4479_v17, %v4565_v58 }
 0x411   : > { %v3562_v21 = vmul.f32 -1.442695, %v1545_v36 }
 0x412   : > { %v4602_v36 = vpop.permute.xlu0 %1817 }
 0x413   : > { %3742 = vpow2.f32 %v3562_v21 }
 0x414   : > { %v4569_v62 = vpop.f32.mrf.mxu2 }
 0x419   : > { %v3743_v48 = vpop.eup %3742 }
 0x41a   : > { %v1593_v40 = vadd.f32 1.0, %v3743_v48 }
 0x41c   : > { %3744 = vrcp.f32 %v1593_v40  ;;  %v1446_v19 = vpop.f32.mrf.mxu2  ;;  %v1644_v10 = vand.u32 2147483648, %v1593_v40  ;;  %v1642_v41 = vand.u32 2147483647, %v1593_v40  ;;  %vm1638_vm5 = vweird.f32 %v1593_v40 }
 0x41d   : > { %v4574_v12 = vadd.f32 %v4562_v60, %v1446_v19 }
 0x41e   : > { %v1645_v6 = vor.u32 1.1754944e-38, %v1644_v10  ;;  %vm1643_vm7 = vcmp.eq.f32.partialorder %v1642_v41, 8.507059e+37 }
 0x41f   : > { %v1547_v34 = vadd.f32 %v1524_v59, %v4574_v12 }
 0x421   : > { %v3564_v37 = vmul.f32 -1.442695, %v1547_v34 }
 0x422   : > { %v3745_v9 = vpop.eup %3744 }
 0x423   : > { %3746 = vpow2.f32 %v3564_v37  ;;  %v1634_v17 = vmul.f32 %v3745_v9, %v1593_v40  ;;  %vm1639_vm4 = vweird.f32 %v3745_v9 }
 0x424   : > { %v1448_v0 = vpop.f32.mrf.mxu2  ;;  %vm1640_vm6 = vmor %vm1638_vm5, %vm1639_vm4 }
 0x425   : > { %v4580_v39 = vadd.f32 %v4562_v60, %v1448_v0  ;;  %v1635_v8 = vsub.f32 1.0, %v1634_v17 }
 0x427   : > { %v1548_v38 = vadd.f32 %v4506_v50, %v4580_v39  ;;  %v1636_v46 = vmul.f32 %v3745_v9, %v1635_v8 }
 0x429   : > { %v3747_v59 = vpop.eup %3746  ;;  %v3565_v56 = vmul.f32 -1.442695, %v1548_v38  ;;  %v1637_v7 = vadd.f32 %v3745_v9, %v1636_v46  ;;  %v4609_v38 = vpop.permute.xlu1 %1813 }
 0x42a   : > { %v1595_v52 = vadd.f32 1.0, %v3747_v59 }
 0x42b   : > { %3748 = vpow2.f32 %v3565_v56  ;;  %v1641_v5 = vsel %vm1640_vm6, %v3745_v9, %v1637_v7 }
 0x42c   : > { %3750 = vrcp.f32 %v1595_v52  ;;  %v1451_v50 = vpop.f32.mrf.mxu2  ;;  %v4589_v45 = vsel %vm1643_vm7, %v1645_v6, %v1641_v5  ;;  %v1674_v19 = vand.u32 2147483648, %v1595_v52  ;;  %v1672_v9 = vand.u32 2147483647, %v1595_v52 }
 0x42d   : > { %v4594_v16 = vadd.f32 %v4562_v60, %v1451_v50  ;;  %v1833_v53 = vmul.f32 %v1800_v25, %v4589_v45  ;;  %vm1668_vm9 = vweird.f32 %v1595_v52 }
 0x42e   : > { %v1675_v41 = vor.u32 1.1754944e-38, %v1674_v19  ;;  %vm1673_vm11 = vcmp.eq.f32.partialorder %v1672_v9, 8.507059e+37  ;;  %v4637_v9 = vadd.f32 %v4562_v60, %v4557_v49 }
 0x42f   : > { %v1549_v55 = vadd.f32 %v4462_v44, %v4594_v16  ;;  %1859 = vrot.lane.b32.xlu2 %v1833_v53, %s3983_s16 }
 0x431   : > { %v3749_v2 = vpop.eup %3748  ;;  %v3566_v31 = vmul.f32 -1.442695, %v1549_v55 }
 0x432   : > { %v3751_v61 = vpop.eup %3750  ;;  %v1596_v21 = vadd.f32 1.0, %v3749_v2 }
 0x433   : > { %3752 = vpow2.f32 %v3566_v31  ;;  %v1664_v1 = vmul.f32 %v3751_v61, %v1595_v52  ;;  %vm1669_vm8 = vweird.f32 %v3751_v61  ;;  %v4618_v52 = vadd.f32 %v4562_v60, %v4569_v62 }
 0x434   : > { %3754 = vrcp.f32 %v1596_v21  ;;  %v1453_v48 = vpop.f32.mrf.mxu2  ;;  %vm1670_vm10 = vmor %vm1668_vm9, %vm1669_vm8  ;;  %v1689_v55 = vand.u32 2147483648, %v1596_v21  ;;  %v1687_v31 = vand.u32 2147483647, %v1596_v21  ;;  %vm1683_vm13 = vweird.f32 %v1596_v21 }
 0x435   : > { %3756 = vpow2.f32 %v3561_v33  ;;  %v4605_v40 = vadd.f32 %v4562_v60, %v1453_v48  ;;  %v1665_v44 = vsub.f32 1.0, %v1664_v1  ;;  %v1546_v62 = vadd.f32 %v4543_v43, %v4618_v52  ;;  %v1806_v43 = vpop.permute.xlu1 %1805 }
 0x436   : > { %vm1688_vm15 = vcmp.eq.f32.partialorder %v1687_v31, 8.507059e+37 }
 0x437   : > { %v1550_v34 = vadd.f32 %v4472_v57, %v4605_v40  ;;  %v1666_v37 = vmul.f32 %v3751_v61, %v1665_v44  ;;  %v1804_v57 = vpop.permute.xlu0 %1803 }
 0x439   : > { %v3753_v17 = vpop.eup %3752  ;;  %v3567_v0 = vmul.f32 -1.442695, %v1550_v34  ;;  %v1667_v8 = vadd.f32 %v3751_v61, %v1666_v37  ;;  %v1690_v34 = vor.u32 1.1754944e-38, %v1689_v55 }
 0x43a   : > { %v3755_v10 = vpop.eup %3754  ;;  %v4611_v46 = vadd.f32 1.0, %v3753_v17 }
 0x43b   : > { %v3757_v59 = vpop.eup %3756  ;;  %3758 = vpow2.f32 %v3567_v0  ;;  %v1671_v56 = vsel %vm1670_vm10, %v3751_v61, %v1667_v8  ;;  %v1679_v7 = vmul.f32 %v3755_v10, %v1596_v21  ;;  %vm1684_vm12 = vweird.f32 %v3755_v10 }
 0x43c   : > { %3760 = vrcp.f32 %v4611_v46  ;;  %v1456_v6 = vpop.f32.mrf.mxu2  ;;  %v4614_v5 = vsel %vm1673_vm11, %v1675_v41, %v1671_v56  ;;  %v4624_v53 = vadd.f32 1.0, %v3757_v59  ;;  %vm1685_vm14 = vmor %vm1683_vm13, %vm1684_vm12  ;;  %v3563_v0 = vmul.f32 -1.442695, %v1546_v62 }
 0x43d   : > { %v4621_v25 = vadd.f32 %v4562_v60, %v1456_v6  ;;  %v1835_v50 = vmul.f32 %v1804_v57, %v4614_v5  ;;  %v1680_v63 = vsub.f32 1.0, %v1679_v7  ;;  %v1704_v59 = vand.u32 2147483648, %v4611_v46 }
 0x43e   : > { %3762 = vrcp.f32 %v4624_v53  ;;  %v1702_v7 = vand.u32 2147483647, %v4611_v46  ;;  %v1543_v6 = vadd.f32 %v4522_v11, %v4637_v9  ;;  %vm1698_vm1 = vweird.f32 %v4611_v46 }
 0x43f   : > { %v1551_v2 = vadd.f32 %v4482_v28, %v4621_v25  ;;  %1863 = vrot.lane.b32.xlu0 %v1835_v50, %s3983_s16  ;;  %v1681_v33 = vmul.f32 %v3755_v10, %v1680_v63 }
 0x440   : > { %vm1703_vm5 = vcmp.eq.f32.partialorder %v1702_v7, 8.507059e+37  ;;  %v3560_v62 = vmul.f32 -1.442695, %v1543_v6 }
 0x441   : > { %v3759_v61 = vpop.eup %3758  ;;  %v3568_v1 = vmul.f32 -1.442695, %v1551_v2  ;;  %v1682_v48 = vadd.f32 %v3755_v10, %v1681_v33 }
 0x442   : > { %v3761_v44 = vpop.eup %3760  ;;  %v4632_v19 = vadd.f32 1.0, %v3759_v61 }
 0x443   : > { %3764 = vpow2.f32 %v3568_v1  ;;  %v1686_v28 = vsel %vm1685_vm14, %v3755_v10, %v1682_v48  ;;  %v1694_v37 = vmul.f32 %v3761_v44, %v4611_v46  ;;  %vm1699_vm0 = vweird.f32 %v3761_v44 }
 0x444   : > { %3766 = vrcp.f32 %v4632_v19  ;;  %v1458_v21 = vpop.f32.mrf.mxu2  ;;  %v4640_v17 = vsel %vm1688_vm15, %v1690_v34, %v1686_v28  ;;  %v4651_v57 = vpop.eup %3762  ;;  %vm1700_vm4 = vmor %vm1698_vm1, %vm1699_vm0  ;;  %v1719_v28 = vand.u32 2147483648, %v4632_v19  ;;  %vm1713_vm7 = vweird.f32 %v4632_v19 }
 0x445   : > { %v4643_v8 = vadd.f32 %v4562_v60, %v1458_v21  ;;  %v1836_v41 = vmul.f32 %v1806_v43, %v4640_v17  ;;  %v1695_v10 = vsub.f32 1.0, %v1694_v37  ;;  %3768 = vpow2.f32 %v3563_v0 }
 0x446   : > { %v1717_v0 = vand.u32 2147483647, %v4632_v19  ;;  %v1720_v7 = vor.u32 1.1754944e-38, %v1719_v28  ;;  %vm1624_vm13 = vweird.f32 %v4651_v57  ;;  %vm1623_vm15 = vweird.f32 %v4624_v53 }
 0x447   : > { %v1552_v56 = vadd.f32 %v4497_v4, %v4643_v8  ;;  %1865 = vrot.lane.b32.xlu1 %v1836_v41, %s3983_s16  ;;  %v1696_v49 = vmul.f32 %v3761_v44, %v1695_v10  ;;  %v1705_v4 = vor.u32 1.1754944e-38, %v1704_v59  ;;  %vm4717_vm0 = vmor %vm1623_vm15, %vm1624_vm13 }
 0x448   : > { %vm1718_vm9 = vcmp.eq.f32.partialorder %v1717_v0, 8.507059e+37 }
 0x449   : > { %v3765_v50 = vpop.eup %3764  ;;  %v3569_v63 = vmul.f32 -1.442695, %v1552_v56  ;;  %v1697_v55 = vadd.f32 %v3761_v44, %v1696_v49 }
 0x44a   : > { %v3767_v2 = vpop.eup %3766  ;;  %v4656_v33 = vadd.f32 1.0, %v3765_v50 }
 0x44b   : > { %3770 = vpow2.f32 %v3569_v63  ;;  %v1701_v31 = vsel %vm1700_vm4, %v3761_v44, %v1697_v55  ;;  %v1709_v61 = vmul.f32 %v3767_v2, %v4632_v19  ;;  %v1619_v44 = vmul.f32 %v4651_v57, %v4624_v53  ;;  %v3769_v37 = vpop.eup %3768 }
 0x44c   : > { %3772 = vrcp.f32 %v4656_v33  ;;  %v1461_v11 = vpop.f32.mrf.mxu2  ;;  %v4660_v1 = vsel %vm1703_vm5, %v1705_v4, %v1701_v31  ;;  %vm1714_vm6 = vweird.f32 %v3767_v2  ;;  %v4675_v56 = vadd.f32 1.0, %v3769_v37 }
 0x44d   : > { %v4663_v48 = vadd.f32 %v4562_v60, %v1461_v11  ;;  %v1837_v46 = vmul.f32 %v4571_v47, %v4660_v1  ;;  %v1710_v34 = vsub.f32 1.0, %v1709_v61  ;;  %3774 = vpow2.f32 %v3560_v62  ;;  %vm1715_vm8 = vmor %vm1713_vm7, %vm1714_vm6 }
 0x44e   : > { %vm1728_vm11 = vweird.f32 %v4656_v33  ;;  %vm1653_vm13 = vweird.f32 %v4675_v56 }
 0x44f   : > { %v1553_v43 = vadd.f32 %v4509_v51, %v4663_v48  ;;  %1867 = vrot.lane.b32.xlu1 %v1837_v46, %s3983_s16  ;;  %v1711_v21 = vmul.f32 %v3767_v2, %v1710_v34  ;;  %v1620_v51 = vsub.f32 1.0, %v1619_v44 }
 0x451   : > { %v3771_v41 = vpop.eup %3770  ;;  %v3570_v10 = vmul.f32 -1.442695, %v1553_v43  ;;  %v1712_v47 = vadd.f32 %v3767_v2, %v1711_v21  ;;  %v1621_v62 = vmul.f32 %v4651_v57, %v1620_v51 }
 0x452   : > { %v3773_v59 = vpop.eup %3772  ;;  %v4677_v49 = vadd.f32 1.0, %v3771_v41 }
 0x453   : > { %3776 = vpow2.f32 %v3570_v10  ;;  %v1716_v6 = vsel %vm1715_vm8, %v3767_v2, %v1712_v47  ;;  %v1724_v50 = vmul.f32 %v3773_v59, %v4656_v33  ;;  %v3775_v61 = vpop.eup %3774  ;;  %v1734_v2 = vand.u32 2147483648, %v4656_v33 }
 0x454   : > { %3778 = vrcp.f32 %v4677_v49  ;;  %v1463_v63 = vpop.f32.mrf.mxu2  ;;  %v4681_v55 = vsel %vm1718_vm9, %v1720_v7, %v1716_v6  ;;  %vm1729_vm10 = vweird.f32 %v3773_v59  ;;  %v4695_v28 = vadd.f32 1.0, %v3775_v61 }
 0x455   : > { %v4684_v19 = vadd.f32 %v4562_v60, %v1463_v63  ;;  %v1838_v4 = vmul.f32 %v4577_v3, %v4681_v55  ;;  %v1725_v31 = vsub.f32 1.0, %v1724_v50  ;;  %3780 = vrcp.f32 %v4675_v56  ;;  %vm1730_vm12 = vmor %vm1728_vm11, %vm1729_vm10 }
 0x456   : > { %v1732_v60 = vand.u32 2147483647, %v4656_v33  ;;  %v1735_v21 = vor.u32 1.1754944e-38, %v1734_v2  ;;  %v1629_v33 = vand.u32 2147483648, %v4624_v53  ;;  %v1627_v6 = vand.u32 2147483647, %v4624_v53 }
 0x457   : > { %v1554_v11 = vadd.f32 %v4525_v20, %v4684_v19  ;;  %1869 = vrot.lane.b32.xlu2 %v1838_v4, %s3983_s16  ;;  %v1726_v46 = vmul.f32 %v3773_v59, %v1725_v31  ;;  %v1622_v20 = vadd.f32 %v4651_v57, %v1621_v62  ;;  %vm1743_vm4 = vweird.f32 %v4677_v49 }
 0x458   : > { %vm1733_vm14 = vcmp.eq.f32.partialorder %v1732_v60, 8.507059e+37  ;;  %v1630_v31 = vor.u32 1.1754944e-38, %v1629_v33  ;;  %vm1628_vm5 = vcmp.eq.f32.partialorder %v1627_v6, 8.507059e+37 }
 0x459   : > { %v3777_v34 = vpop.eup %3776  ;;  %v3571_v3 = vmul.f32 -1.442695, %v1554_v11  ;;  %v1727_v44 = vadd.f32 %v3773_v59, %v1726_v46  ;;  %v1626_v53 = vsel %vm4717_vm0, %v4651_v57, %v1622_v20 }
 0x45a   : > { %v3779_v37 = vpop.eup %3778  ;;  %v4698_v43 = vadd.f32 1.0, %v3777_v34  ;;  %v4729_v60 = vsel %vm1628_vm5, %v1630_v31, %v1626_v53 }
 0x45b   : > { %3782 = vpow2.f32 %v3571_v3  ;;  %v1731_v0 = vsel %vm1730_vm12, %v3773_v59, %v1727_v44  ;;  %v1739_v41 = vmul.f32 %v3779_v37, %v4677_v49  ;;  %v4703_v10 = vpop.eup %3780  ;;  %v1749_v59 = vand.u32 2147483648, %v4677_v49  ;;  %v1798_v44 = vpop.permute.xlu2 %1797 }
 0x45c   : > { %3784 = vrcp.f32 %v4698_v43  ;;  %v4706_v47 = vsel %vm1733_vm14, %v1735_v21, %v1731_v0  ;;  %vm1744_vm1 = vweird.f32 %v3779_v37  ;;  %v1649_v4 = vmul.f32 %v4703_v10, %v4675_v56 }
 0x45d   : > { %v1839_v7 = vmul.f32 %v4600_v54, %v4706_v47  ;;  %v1740_v51 = vsub.f32 1.0, %v1739_v41  ;;  %3786 = vrcp.f32 %v4695_v28  ;;  %v1747_v54 = vand.u32 2147483647, %v4677_v49  ;;  %vm1745_vm6 = vmor %vm1743_vm4, %vm1744_vm1 }
 0x45e   : > { %v1750_v46 = vor.u32 1.1754944e-38, %v1749_v59  ;;  %v1650_v21 = vsub.f32 1.0, %v1649_v4  ;;  %v1832_v0 = vmul.f32 %v1798_v44, %v4729_v60  ;;  %v1764_v33 = vand.u32 2147483648, %v4698_v43 }
 0x45f   : > { %1871 = vrot.lane.b32.xlu2 %v1839_v7, %s3983_s16  ;;  %v1741_v63 = vmul.f32 %v3779_v37, %v1740_v51  ;;  %vm1748_vm7 = vcmp.eq.f32.partialorder %v1747_v54, 8.507059e+37  ;;  %v1762_v51 = vand.u32 2147483647, %v4698_v43  ;;  %vm1758_vm9 = vweird.f32 %v4698_v43 }
 0x460   : > { %v1651_v6 = vmul.f32 %v4703_v10, %v1650_v21  ;;  %v1765_v50 = vor.u32 1.1754944e-38, %v1764_v33  ;;  %vm1654_vm12 = vweird.f32 %v4703_v10 }
 0x461   : > { %v3783_v61 = vpop.eup %3782  ;;  %v1742_v2 = vadd.f32 %v3779_v37, %v1741_v63  ;;  %vm1763_vm11 = vcmp.eq.f32.partialorder %v1762_v51, 8.507059e+37  ;;  %vm4757_vm14 = vmor %vm1653_vm13, %vm1654_vm12 }
 0x462   : > { %v3785_v62 = vpop.eup %3784  ;;  %v1602_v11 = vadd.f32 1.0, %v3783_v61  ;;  %v1652_v4 = vadd.f32 %v4703_v10, %v1651_v6  ;;  %v1659_v61 = vand.u32 2147483648, %v4675_v56 }
 0x463   : > { %v1746_v34 = vsel %vm1745_vm6, %v3779_v37, %v1742_v2  ;;  %v1754_v3 = vmul.f32 %v3785_v62, %v4698_v43  ;;  %v4732_v57 = vpop.eup %3786  ;;  %vm1759_vm8 = vweird.f32 %v3785_v62  ;;  %v1657_v43 = vand.u32 2147483647, %v4675_v56 }
 0x464   : > { %3788 = vrcp.f32 %v1602_v11  ;;  %v4734_v20 = vsel %vm1748_vm7, %v1750_v46, %v1746_v34  ;;  %v1604_v37 = vmul.f32 %v4732_v57, %v4695_v28  ;;  %vm1760_vm10 = vmor %vm1758_vm9, %vm1759_vm8  ;;  %v1779_v34 = vand.u32 2147483648, %v1602_v11 }
 0x465   : > { %v1840_v49 = vmul.f32 %v4609_v38, %v4734_v20  ;;  %v1755_v41 = vsub.f32 1.0, %v1754_v3  ;;  %v1656_v56 = vsel %vm4757_vm14, %v4703_v10, %v1652_v4  ;;  %v1660_v21 = vor.u32 1.1754944e-38, %v1659_v61 }
 0x466   : > { %v1605_v63 = vsub.f32 1.0, %v1604_v37  ;;  %vm1773_vm0 = vweird.f32 %v1602_v11  ;;  %vm1609_vm1 = vweird.f32 %v4732_v57  ;;  %vm1658_vm4 = vcmp.eq.f32.partialorder %v1657_v43, 8.507059e+37 }
 0x467   : > { %1873 = vrot.lane.b32.xlu0 %v1840_v49, %s3983_s16  ;;  %1857 = vrot.lane.b32.xlu2 %v1832_v0, %s3983_s16  ;;  %v1756_v7 = vmul.f32 %v3785_v62, %v1755_v41  ;;  %v1780_v0 = vor.u32 1.1754944e-38, %v1779_v34  ;;  %v1614_v37 = vand.u32 2147483648, %v4695_v28  ;;  %vm1608_vm7 = vweird.f32 %v4695_v28 }
 0x468   : > { %v1612_v10 = vand.u32 2147483647, %v4695_v28  ;;  %vm1610_vm8 = vmor %vm1608_vm7, %vm1609_vm1  ;;  %v1796_v28 = vpop.permute.xlu1 %1795 }
 0x469   : > { %v1757_v59 = vadd.f32 %v3785_v62, %v1756_v7 }
 0x46a   : > { %v3789_v38 = vpop.eup %3788  ;;  %vm1613_vm9 = vcmp.eq.f32.partialorder %v1612_v10, 8.507059e+37 }
 0x46b   : > { %v1761_v54 = vsel %vm1760_vm10, %v3785_v62, %v1757_v59  ;;  %v1769_v53 = vmul.f32 %v3789_v38, %v1602_v11  ;;  %v1606_v62 = vmul.f32 %v4732_v57, %v1605_v63  ;;  %vm1774_vm15 = vweird.f32 %v3789_v38 }
 0x46c   : > { %v4749_v31 = vsel %vm1763_vm11, %v1765_v50, %v1761_v54  ;;  %vm1775_vm5 = vmor %vm1773_vm0, %vm1774_vm15 }
 0x46d   : > { %v1841_v2 = vmul.f32 %v4584_v42, %v4749_v31  ;;  %v1770_v46 = vsub.f32 1.0, %v1769_v53  ;;  %v1777_v42 = vand.u32 2147483647, %v1602_v11  ;;  %v1607_v41 = vadd.f32 %v4732_v57, %v1606_v62  ;;  %v1802_v11 = vpop.permute.xlu0 %1801 }
 0x46f   : > { %2019 = vrot.lane.b32.xlu2 %v4145_v13, %s3984_s19  ;;  %1875 = vrot.lane.b32.xlu0 %v1841_v2, %s3983_s16  ;;  %v1771_v44 = vmul.f32 %v3789_v38, %v1770_v46  ;;  %v4769_v13 = vsel %vm1658_vm4, %v1660_v21, %v1656_v56  ;;  %vm1778_vm6 = vcmp.eq.f32.partialorder %v1777_v42, 8.507059e+37  ;;  %v1611_v59 = vsel %vm1610_vm8, %v4732_v57, %v1607_v41 }
 0x470   : > { %v1834_v6 = vmul.f32 %v1802_v11, %v4769_v13  ;;  %v1919_v11 = vsub.f32 1.0, %v4614_v5 }
 0x471   : > { %v1772_v49 = vadd.f32 %v3789_v38, %v1771_v44 }
 0x473   : > { %v1776_v33 = vsel %vm1775_vm5, %v3789_v38, %v1772_v49  ;;  %v1615_v38 = vor.u32 1.1754944e-38, %v1614_v37 }
 0x474   : > { %v4772_v7 = vsel %vm1778_vm6, %v1780_v0, %v1776_v33 }
 0x475   : > { %v1842_v51 = vmul.f32 %v4602_v36, %v4772_v7  ;;  %v4784_v50 = vsel %vm1613_vm9, %v1615_v38, %v1611_v59 }
 0x476   : > { %v1831_v63 = vmul.f32 %v1796_v28, %v4784_v50 }
 0x477   : > { %2013 = vrot.lane.b32.xlu2 %v4169_v23, %s3984_s19  ;;  %1877 = vrot.lane.b32.xlu1 %v1842_v51, %s3983_s16 }
 0x478   : > { %1861 = vrot.lane.b32.xlu0 %v1834_v6, %s3983_s16 }
 0x47f   : > { %2007 = vrot.lane.b32.xlu2 %v4177_v26, %s3984_s19  ;;  %1855 = vrot.lane.b32.xlu1 %v1831_v63, %s3983_s16 }
 0x480   : > { %2021 = vrot.lane.b32.xlu0 %v4147_v14, %s3984_s19 }
 0x487   : > { %2017 = vrot.lane.b32.xlu1 %v4149_v15, %s3984_s19 }
 0x488   : > { %2015 = vrot.lane.b32.xlu0 %v4155_v18, %s3984_s19 }
 0x489   : > { %v1860_v23 = vpop.permute.xlu2 %1859 }
 0x48f   : > { %2011 = vrot.lane.b32.xlu1 %v4167_v22, %s3984_s19 }
 0x4b1   : > { %v1864_v36 = vpop.permute.xlu0 %1863  ;;  %v1870_v54 = vpop.permute.xlu2 %1869 }
 0x4b2   : > { %v1895_v57 = vadd.f32 %v1864_v36, %v4574_v12  ;;  %v1898_v26 = vadd.f32 %v1870_v54, %v4605_v40 }
 0x4b4   : > { %3790 = vtanh.f32 %v1895_v57 }
 0x4b5   : > { %3792 = vtanh.f32 %v1898_v26 }
 0x4b9   : > { %v1866_v53 = vpop.permute.xlu1 %1865  ;;  %v1872_v15 = vpop.permute.xlu2 %1871 }
 0x4ba   : > { %v3791_v4 = vpop.eup %3790  ;;  %v1896_v14 = vadd.f32 %v1866_v53, %v4580_v39  ;;  %v1899_v18 = vadd.f32 %v1872_v15, %v4621_v25 }
 0x4bb   : > { %1947 = vrot.lane.b32.xlu0 %v3791_v4, %s5455_s20  ;;  %v3793_v61 = vpop.eup %3792 }
 0x4bc   : > { %3794 = vtanh.f32 %v1896_v14  ;;  %v1924_v14 = vsub.f32 1.0, %v4734_v20 }
 0x4bd   : > { %3796 = vtanh.f32 %v1899_v18  ;;  %v1923_v18 = vsub.f32 1.0, %v4706_v47 }
 0x4c1   : > { %v1868_v22 = vpop.permute.xlu1 %1867 }
 0x4c2   : > { %v1897_v12 = vadd.f32 %v1868_v22, %v4594_v16  ;;  %v3795_v2 = vpop.eup %3794 }
 0x4c3   : > { %1953 = vrot.lane.b32.xlu0 %v3793_v61, %s5455_s20  ;;  %1949 = vrot.lane.b32.xlu1 %v3795_v2, %s5455_s20  ;;  %v3797_v39 = vpop.eup %3796 }
 0x4c4   : > { %3798 = vtanh.f32 %v1897_v12 }
 0x4ca   : > { %v3799_v40 = vpop.eup %3798 }
 0x4cb   : > { %1951 = vrot.lane.b32.xlu2 %v3799_v40, %s5455_s20  ;;  %1955 = vrot.lane.b32.xlu1 %v3797_v39, %s5455_s20 }
 0x4d9   : > { %v1874_v46 = vpop.permute.xlu0 %1873 }
 0x4da   : > { %v1900_v25 = vadd.f32 %v1874_v46, %v4643_v8  ;;  %v1893_v8 = vadd.f32 %v1860_v23, %v4565_v58 }
 0x4dc   : > { %3800 = vtanh.f32 %v1900_v25  ;;  %v1925_v25 = vsub.f32 1.0, %v4749_v31 }
 0x4e1   : > { %v1876_v43 = vpop.permute.xlu0 %1875 }
 0x4e2   : > { %v3801_v34 = vpop.eup %3800  ;;  %v1901_v16 = vadd.f32 %v1876_v43, %v4663_v48 }
 0x4e3   : > { %1957 = vrot.lane.b32.xlu2 %v3801_v34, %s5455_s20 }
 0x4e4   : > { %3802 = vtanh.f32 %v1901_v16 }
 0x4e9   : > { %v1878_v62 = vpop.permute.xlu1 %1877 }
 0x4ea   : > { %v3803_v3 = vpop.eup %3802  ;;  %v1902_v44 = vadd.f32 %v1878_v62, %v4684_v19  ;;  %v1862_v42 = vpop.permute.xlu0 %1861 }
 0x4eb   : > { %v1894_v56 = vadd.f32 %v1862_v42, %v4618_v52  ;;  %1959 = vrot.lane.b32.xlu0 %v3803_v3, %s5455_s20  ;;  %v1858_v52 = vpop.permute.xlu2 %1857 }
 0x4ec   : > { %3804 = vtanh.f32 %v1902_v44  ;;  %v1892_v19 = vadd.f32 %v1858_v52, %v4587_v35 }
 0x4ed   : > { %3806 = vtanh.f32 %v1894_v56 }
 0x4ee   : > { %3808 = vtanh.f32 %v1893_v8  ;;  %v1920_v8 = vsub.f32 1.0, %v4640_v17 }
 0x4f1   : > { %v1856_v21 = vpop.permute.xlu1 %1855 }
 0x4f2   : > { %v3805_v49 = vpop.eup %3804  ;;  %v1891_v48 = vadd.f32 %v1856_v21, %v4637_v9  ;;  %v2022_v35 = vpop.permute.xlu0 %2021 }
 0x4f3   : > { %v3807_v0 = vpop.eup %3806  ;;  %1961 = vrot.lane.b32.xlu1 %v3805_v49, %s5455_s20  ;;  %2009 = vrot.lane.b32.xlu0 %v4171_v24, %s3984_s19  ;;  %v2020_v24 = vpop.permute.xlu2 %2019  ;;  %v2046_v62 = vmul.f32 %v2022_v35, %v4772_v7 }
 0x4f4   : > { %3810 = vtanh.f32 %v1891_v48  ;;  %1945 = vrot.lane.b32.xlu2 %v3807_v0, %s5455_s20  ;;  %v3809_v41 = vpop.eup %3808 }
 0x4f5   : > { %3812 = vtanh.f32 %v1892_v19  ;;  %v1917_v19 = vsub.f32 1.0, %v4589_v45 }
 0x4f9   : > { %v2018_v37 = vpop.permute.xlu1 %2017 }
 0x4fa   : > { %v3811_v33 = vpop.eup %3810 }
 0x4fb   : > { %1943 = vrot.lane.b32.xlu1 %v3809_v41, %s5455_s20  ;;  %2003 = vrot.lane.b32.xlu0 %v4188_v29, %s3984_s19  ;;  %v3813_v58 = vpop.eup %3812  ;;  %v2014_v9 = vpop.permute.xlu2 %2013 }
 0x4fc   : > { %1939 = vrot.lane.b32.xlu2 %v3811_v33, %s5455_s20  ;;  %v2016_v29 = vpop.permute.xlu0 %2015  ;;  %v2042_v36 = vmul.f32 %v2014_v9, %v4681_v55  ;;  %v1918_v33 = vsub.f32 1.0, %v4769_v13 }
 0x4fd   : > { %v2043_v61 = vmul.f32 %v2016_v29, %v4706_v47  ;;  %v2045_v47 = vmul.f32 %v2020_v24, %v4749_v31 }
 0x503   : > { %2005 = vrot.lane.b32.xlu1 %v4182_v27, %s3984_s19  ;;  %1941 = vrot.lane.b32.xlu0 %v3813_v58, %s5455_s20  ;;  %v2008_v10 = vpop.permute.xlu2 %2007  ;;  %v2012_v27 = vpop.permute.xlu1 %2011 }
 0x504   : > { %2001 = vrot.lane.b32.xlu2 %v4193_v30, %s3984_s19  ;;  %v2039_v6 = vmul.f32 %v2008_v10, %v4614_v5  ;;  %v1921_v30 = vsub.f32 1.0, %v4660_v1  ;;  %v2041_v57 = vmul.f32 %v2012_v27, %v4660_v1  ;;  %v1915_v27 = vsub.f32 1.0, %v4784_v50 }
 0x50b   : > { %1999 = vrot.lane.b32.xlu1 %v4199_v32, %s3984_s19  ;;  %v1922_v32 = vsub.f32 1.0, %v4681_v55  ;;  %v2044_v55 = vmul.f32 %v2018_v37, %v4734_v20  ;;  %v1926_v20 = vsub.f32 1.0, %v4772_v7 }
 0x525   : > { %v1952_v28 = vpop.permute.xlu2 %1951 }
 0x526   : > { %v1981_v63 = vmul.f32 %v1952_v28, %v1921_v30 }
 0x528   : > { %v4840_v53 = vadd.f32 %v2041_v57, %v1981_v63 }
 0x52d   : > { %v1948_v51 = vpop.permute.xlu0 %1947 }
 0x52e   : > { %v1979_v59 = vmul.f32 %v1948_v51, %v1919_v11  ;;  %v1916_v11 = vsub.f32 1.0, %v4729_v60 }
 0x530   : > { %v4834_v38 = vadd.f32 %v2039_v6, %v1979_v59 }
 0x535   : > { %v1954_v23 = vpop.permute.xlu0 %1953  ;;  %v1950_v54 = vpop.permute.xlu1 %1949 }
 0x536   : > { %v1982_v26 = vmul.f32 %v1954_v23, %v1922_v32  ;;  %v1980_v48 = vmul.f32 %v1950_v54, %v1920_v8 }
 0x538   : > { %v4842_v5 = vadd.f32 %v2042_v36, %v1982_v26 }
 0x53a   : > { %v2062_v4 = vpack.c.bf16 %v4842_v5, %v4840_v53 }
 0x53c   : > { %2077 = vrot.lane.b32.xlu2 %v2062_v4, %s5455_s20  ;;  %v3886_v4 = vld [vmem:[%s5448_s6 + $0x28] sm:$0xff] }
 0x53d   : > { %v1958_v15 = vpop.permute.xlu2 %1957  ;;  %v1956_v1 = vpop.permute.xlu1 %1955 }
 0x53e   : > { %v1984_v22 = vmul.f32 %v1958_v15, %v1924_v14  ;;  %v1983_v12 = vmul.f32 %v1956_v1, %v1923_v18  ;;  %v3887_v14 = vld [vmem:[%s5447_s5] sm:$0xff]  ;;  %v3888_v15 = vld [vmem:[%s5447_s5 + $0x30] sm:$0xff]  ;;  %v3892_v1 = vld [vmem:[%s5447_s5 + $0x8] sm:$0xff] }
 0x53f   : > { %v3889_v18 = vld [vmem:[%s5448_s6 + $0x20] sm:$0xff] }
 0x540   : > { %v4851_v2 = vadd.f32 %v2044_v55, %v1984_v22  ;;  %v4853_v39 = vadd.f32 %v2043_v61, %v1983_v12  ;;  %v3890_v55 = vld [vmem:[%s5451_s9 + $0x8] sm:$0xff]  ;;  %v3891_v22 = vld [vmem:[%s5451_s9] sm:$0xff]  ;;  %v3893_v61 = vld [vmem:[%s5447_s5 + $0x38] sm:$0xff] }
 0x541   : > { %v3894_v12 = vld [vmem:[%s5450_s8 + $0x8] sm:$0xff] }
 0x542   : > { %v2063_v40 = vpack.c.bf16 %v4851_v2, %v4853_v39 }
 0x544   : > { %2079 = vrot.lane.b32.xlu1 %v2063_v40, %s5455_s20  ;;  %v3895_v40 = vld [vmem:[%s5450_s8] sm:$0xff] }
 0x54e   : > { %v1946_v44 = vpop.permute.xlu2 %1945 }
 0x54f   : > { %v1978_v35 = vmul.f32 %v1946_v44, %v1918_v33  ;;  %v3905_v44 = vld [vmem:[%s5447_s5 + $0x68] sm:$0xff]  ;;  %v3907_v33 = vld [vmem:[%s5447_s5 + $0x78] sm:$0xff] }
 0x556   : > { %v1940_v52 = vpop.permute.xlu2 %1939 }
 0x557   : > { %v1975_v28 = vmul.f32 %v1940_v52, %v1915_v27 }
 0x55d   : > { %v1960_v46 = vpop.permute.xlu0 %1959 }
 0x55e   : > { %v1985_v43 = vmul.f32 %v1960_v46, %v1925_v25  ;;  %v2002_v6 = vpop.permute.xlu2 %2001  ;;  %v3896_v46 = vld [vmem:[%s5447_s5 + $0x10] sm:$0xff]  ;;  %v3897_v25 = vld [vmem:[%s5447_s5 + $0x40] sm:$0xff] }
 0x560   : > { %v4862_v42 = vadd.f32 %v2045_v47, %v1985_v43  ;;  %v3898_v43 = vld [vmem:[%s5447_s5 + $0x18] sm:$0xff]  ;;  %v3902_v47 = vld [vmem:[%s5447_s5 + $0x28] sm:$0xff] }
 0x565   : > { %v1962_v34 = vpop.permute.xlu1 %1961  ;;  %v2010_v16 = vpop.permute.xlu0 %2009 }
 0x566   : > { %v1986_v3 = vmul.f32 %v1962_v34, %v1926_v20  ;;  %v2040_v21 = vmul.f32 %v2010_v16, %v4640_v17  ;;  %v3899_v20 = vld [vmem:[%s5447_s5 + $0x48] sm:$0xff]  ;;  %v3900_v34 = vld [vmem:[%s5447_s5 + $0x20] sm:$0xff]  ;;  %v3901_v16 = vld [vmem:[%s5447_s5 + $0x50] sm:$0xff] }
 0x568   : > { %v4864_v56 = vadd.f32 %v2046_v62, %v1986_v3  ;;  %v4871_v31 = vadd.f32 %v2040_v21, %v1980_v48  ;;  %v3903_v62 = vld [vmem:[%s5447_s5 + $0x58] sm:$0xff]  ;;  %v3904_v3 = vld [vmem:[%s5447_s5 + $0x60] sm:$0xff] }
 0x56a   : > { %v2064_v49 = vpack.c.bf16 %v4864_v56, %v4862_v42  ;;  %v2061_v41 = vpack.c.bf16 %v4871_v31, %v4834_v38 }
 0x56c   : > { %2081 = vrot.lane.b32.xlu0 %v2064_v49, %s5455_s20  ;;  %v3906_v49 = vld [vmem:[%s5447_s5 + $0x70] sm:$0xff] }
 0x56d   : > { %v1944_v0 = vpop.permute.xlu1 %1943  ;;  %v2004_v7 = vpop.permute.xlu0 %2003 }
 0x56e   : > { %v1977_v58 = vmul.f32 %v1944_v0, %v1917_v19  ;;  %v2037_v17 = vmul.f32 %v2004_v7, %v4589_v45 }
 0x570   : > { %v4880_v37 = vadd.f32 %v2037_v17, %v1977_v58 }
 0x574   : > { %2075 = vrot.lane.b32.xlu0 %v2061_v41, %s5455_s20 }
 0x575   : > { %v2006_v24 = vpop.permute.xlu1 %2005  ;;  %v1942_v10 = vpop.permute.xlu0 %1941 }
 0x576   : > { %v2038_v9 = vmul.f32 %v2006_v24, %v4769_v13  ;;  %v1976_v45 = vmul.f32 %v1942_v10, %v1916_v11  ;;  %v2036_v13 = vmul.f32 %v2002_v6, %v4729_v60  ;;  %v3908_v11 = vld [vmem:[%s5447_s5 + $0x80] sm:$0xff] }
 0x578   : > { %v4882_v29 = vadd.f32 %v2038_v9, %v1978_v35  ;;  %v4891_v63 = vadd.f32 %v2036_v13, %v1976_v45  ;;  %v3909_v13 = vld [vmem:[%s5447_s5 + $0x88] sm:$0xff] }
 0x57a   : > { %v2060_v51 = vpack.c.bf16 %v4882_v29, %v4880_v37 }
 0x57c   : > { %2073 = vrot.lane.b32.xlu1 %v2060_v51, %s5455_s20 }
 0x57d   : > { %v2000_v59 = vpop.permute.xlu1 %1999 }
 0x57e   : > { %v2035_v30 = vmul.f32 %v2000_v59, %v4784_v50 }
 0x580   : > { %v4893_v32 = vadd.f32 %v2035_v30, %v1975_v28 }
 0x582   : > { %v2059_v23 = vpack.c.bf16 %v4891_v63, %v4893_v32 }
 0x584   : > { %2071 = vrot.lane.b32.xlu2 %v2059_v23, %s5455_s20  ;;  %s3692_s20 = smul.u32 96, %s4074_s25 }
 0x586   : > { %s3217_s26 = scalar_lea.hbm %s5454_s12, %s3692_s20 }
 0x596   : > { %v4908_v50 = vpop.permute.xlu2 %2077 }
 0x5b6   : > { %v4903_v60 = vpop.permute.xlu1 %2079 }
 0x5de   : > { %v4898_v36 = vpop.permute.xlu0 %2081  ;;  %v4923_v26 = vpop.permute.xlu2 %2071 }
 0x5df   : > { %2091 = vmatpush.bf16.msrb.mxu0 %v4898_v36  ;;  %2136 = vmatpush.bf16.msrb.mxu1 %v4898_v36 }
 0x5e0   : > { %2409 = vmatpush.bf16.msrb.mxu2 %v4898_v36 }
 0x5e3   : > { %2092 = vmatpush.bf16.msrb.mxu0 %v4903_v60  ;;  %2137 = vmatpush.bf16.msrb.mxu1 %v4903_v60 }
 0x5e4   : > { %2410 = vmatpush.bf16.msrb.mxu2 %v4903_v60 }
 0x5e6   : > { %v4913_v57 = vpop.permute.xlu0 %2075 }
 0x5e7   : > { %2093 = vmatpush.bf16.msrb.mxu0 %v4908_v50  ;;  %2138 = vmatpush.bf16.msrb.mxu1 %v4908_v50 }
 0x5e8   : > { %2411 = vmatpush.bf16.msrb.mxu2 %v4908_v50 }
 0x5eb   : > { %2094 = vmatpush.bf16.msrb.mxu0 %v4913_v57  ;;  %2139 = vmatpush.bf16.msrb.mxu1 %v4913_v57 }
 0x5ec   : > { %2412 = vmatpush.bf16.msrb.mxu2 %v4913_v57 }
 0x5ee   : > { %v4918_v54 = vpop.permute.xlu1 %2073 }
 0x5ef   : > { %2095 = vmatpush.bf16.msrb.mxu0 %v4918_v54  ;;  %2140 = vmatpush.bf16.msrb.mxu1 %v4918_v54 }
 0x5f0   : > { %2413 = vmatpush.bf16.msrb.mxu2 %v4918_v54 }
 0x5f3   : > { %2096 = vmatpush.bf16.msrb.mxu0 %v4923_v26  ;;  %2141 = vmatpush.bf16.msrb.mxu1 %v4923_v26 }
 0x5f4   : > { %2414 = vmatpush.bf16.msrb.mxu2 %v4923_v26 }
 0x5f6   : > { %3572 = vmatmul.msk.bf16.vlgmr.msrb.gmra.mxu0 %vm642_vm3, %v3887_v14  ;;  %3578 = vmatmul.msk.bf16.vlgmr.msrb.gmra.mxu1 %vm642_vm3, %v3888_v15 }
 0x5f7   : > { %2295 = vmatpush.bf16.msra.mxu0 %v4898_v36  ;;  %2362 = vmatpush.bf16.msra.mxu1 %v3886_v4 }
 0x5fb   : > { %2296 = vmatpush.bf16.msra.mxu0 %v4903_v60  ;;  %2363 = vmatpush.bf16.msra.mxu1 %v3889_v18 }
 0x5ff   : > { %2644 = vmatpush.bf16.msrb.mxu1 %v3890_v55  ;;  %2297 = vmatpush.bf16.msra.mxu0 %v4908_v50 }
 0x603   : > { %2645 = vmatpush.bf16.msrb.mxu1 %v3891_v22  ;;  %2298 = vmatpush.bf16.msra.mxu0 %v4913_v57 }
 0x606   : > { %3573 = vmatmul.msk.bf16.gmra.mxu0 %vm642_vm3, %v3892_v1  ;;  %3579 = vmatmul.msk.bf16.gmra.mxu1 %vm642_vm3, %v3893_v61 }
 0x607   : > { %2299 = vmatpush.bf16.msra.mxu0 %v4918_v54 }
 0x60b   : > { %2300 = vmatpush.bf16.msra.mxu0 %v4923_v26 }
 0x60f   : > { %2587 = vmatpush.bf16.msrb.mxu0 %v3894_v12 }
 0x613   : > { %2588 = vmatpush.bf16.msrb.mxu0 %v3895_v40 }
 0x616   : > { %3574 = vmatmul.msk.bf16.gmra.mxu0 %vm642_vm3, %v3896_v46  ;;  %3580 = vmatmul.msk.bf16.gmra.mxu1 %vm642_vm3, %v3897_v25 }
 0x626   : > { %3575 = vmatmul.msk.bf16.gmra.mxu0 %vm642_vm3, %v3898_v43  ;;  %3581 = vmatmul.msk.bf16.gmra.mxu1 %vm642_vm3, %v3899_v20 }
 0x636   : > { %3576 = vmatmul.msk.bf16.gmra.mxu0 %vm642_vm3, %v3900_v34  ;;  %3582 = vmatmul.msk.bf16.gmra.mxu1 %vm642_vm3, %v3901_v16 }
 0x646   : > { %3577 = vmatmul.msk.bf16.gmra.mxu0 %vm642_vm3, %v3902_v47  ;;  %3583 = vmatmul.msk.bf16.gmra.mxu1 %vm642_vm3, %v3903_v62  ;;  %v3910_v62 = vld [vmem:[%s5447_s5 + $0x90] sm:$0xff] }
 0x656   : > { %3596 = vmatmul.msk.bf16.vlgmr.msra.gmra.mxu0 %vm642_vm3, %v3904_v3 }
 0x666   : > { %3597 = vmatmul.msk.bf16.gmra.mxu0 %vm642_vm3, %v3905_v44 }
 0x673   : > { %v2098_v8 = vpop.f32.mrf.mxu0  ;;  %v2143_v21 = vpop.f32.mrf.mxu1 }
 0x676   : > { %3598 = vmatmul.msk.bf16.gmra.mxu0 %vm642_vm3, %v3906_v49 }
 0x67b   : > { %v2100_v48 = vpop.f32.mrf.mxu0  ;;  %v2145_v0 = vpop.f32.mrf.mxu1 }
 0x67c   : > { %v2128_v7 = vpack.c.bf16 %v2100_v48, %v2098_v8  ;;  %v2173_v52 = vpack.c.bf16 %v2145_v0, %v2143_v21  ;;  %v3911_v21 = vld [vmem:[%s5447_s5 + $0x98] sm:$0xff] }
 0x67e   : > { %3584 = vmatmul.msk.bf16.vlgmr.msra.gmra.mxu2 %vm536_vm2, %v2173_v52  ;;  %3590 = vmatmul.msk.bf16.vlgmr.msrb.gmra.mxu3 %vm536_vm2, %v2128_v7  ;;  %v3912_v7 = vld [vmem:[%s5447_s5 + $0xa0] sm:$0xff] }
 0x683   : > { %v2103_v19 = vpop.f32.mrf.mxu0  ;;  %v2148_v41 = vpop.f32.mrf.mxu1 }
 0x686   : > { %3599 = vmatmul.msk.bf16.gmra.mxu0 %vm642_vm3, %v3907_v33 }
 0x68b   : > { %v2105_v58 = vpop.f32.mrf.mxu0  ;;  %v2150_v17 = vpop.f32.mrf.mxu1 }
 0x68c   : > { %v2129_v24 = vpack.c.bf16 %v2105_v58, %v2103_v19  ;;  %v2174_v35 = vpack.c.bf16 %v2150_v17, %v2148_v41 }
 0x68e   : > { %3585 = vmatmul.msk.bf16.gmra.mxu2 %vm536_vm2, %v2174_v35  ;;  %3591 = vmatmul.msk.bf16.gmra.mxu3 %vm536_vm2, %v2129_v24 }
 0x693   : > { %v2108_v9 = vpop.f32.mrf.mxu0  ;;  %v2153_v10 = vpop.f32.mrf.mxu1 }
 0x696   : > { %3600 = vmatmul.msk.bf16.gmra.mxu0 %vm642_vm3, %v3908_v11 }
 0x69b   : > { %v2110_v51 = vpop.f32.mrf.mxu0  ;;  %v2155_v6 = vpop.f32.mrf.mxu1 }
 0x69c   : > { %v2130_v27 = vpack.c.bf16 %v2110_v51, %v2108_v9  ;;  %v2175_v45 = vpack.c.bf16 %v2155_v6, %v2153_v10  ;;  %v3913_v10 = vld [vmem:[%s5447_s5 + $0xa8] sm:$0xff] }
 0x69e   : > { %3586 = vmatmul.msk.bf16.gmra.mxu2 %vm536_vm2, %v2175_v45  ;;  %3592 = vmatmul.msk.bf16.gmra.mxu3 %vm536_vm2, %v2130_v27 }
 0x6a3   : > { %v2113_v59 = vpop.f32.mrf.mxu0  ;;  %v2158_v28 = vpop.f32.mrf.mxu1 }
 0x6a6   : > { %3601 = vmatmul.msk.bf16.gmra.mxu0 %vm642_vm3, %v3909_v13 }
 0x6ab   : > { %v2115_v30 = vpop.f32.mrf.mxu0  ;;  %v2160_v23 = vpop.f32.mrf.mxu1 }
 0x6ac   : > { %v2131_v4 = vpack.c.bf16 %v2115_v30, %v2113_v59  ;;  %v2176_v14 = vpack.c.bf16 %v2160_v23, %v2158_v28  ;;  %v3914_v23 = vld [vmem:[%s5447_s5 + $0xb0] sm:$0xff] }
 0x6ae   : > { %3587 = vmatmul.msk.bf16.gmra.mxu2 %vm536_vm2, %v2176_v14  ;;  %3593 = vmatmul.msk.bf16.gmra.mxu3 %vm536_vm2, %v2131_v4 }
 0x6b3   : > { %v2118_v15 = vpop.f32.mrf.mxu0  ;;  %v2163_v18 = vpop.f32.mrf.mxu1 }
 0x6bb   : > { %v2120_v55 = vpop.f32.mrf.mxu0  ;;  %v2165_v22 = vpop.f32.mrf.mxu1 }
 0x6bc   : > { %v2132_v1 = vpack.c.bf16 %v2120_v55, %v2118_v15  ;;  %v2177_v61 = vpack.c.bf16 %v2165_v22, %v2163_v18 }
 0x6be   : > { %3588 = vmatmul.msk.bf16.gmra.mxu2 %vm536_vm2, %v2177_v61  ;;  %3594 = vmatmul.msk.bf16.gmra.mxu3 %vm536_vm2, %v2132_v1 }
 0x6c3   : > { %v2123_v12 = vpop.f32.mrf.mxu0  ;;  %v2168_v40 = vpop.f32.mrf.mxu1 }
 0x6cb   : > { %v2125_v46 = vpop.f32.mrf.mxu0  ;;  %v2170_v25 = vpop.f32.mrf.mxu1 }
 0x6cc   : > { %v2133_v43 = vpack.c.bf16 %v2125_v46, %v2123_v12  ;;  %v2178_v20 = vpack.c.bf16 %v2170_v25, %v2168_v40  ;;  %v3915_v40 = vld [vmem:[%s5447_s5 + $0xb8] sm:$0xff] }
 0x6ce   : > { %3589 = vmatmul.msk.bf16.gmra.mxu2 %vm536_vm2, %v2178_v20  ;;  %3595 = vmatmul.msk.bf16.gmra.mxu3 %vm536_vm2, %v2133_v43 }
 0x6d3   : > { %v2302_v34 = vpop.f32.mrf.mxu0 }
 0x6db   : > { %v2304_v16 = vpop.f32.mrf.mxu0 }
 0x6dc   : > { %v2332_v47 = vpack.c.bf16 %v2304_v16, %v2302_v34 }
 0x6de   : > { %3602 = vmatmul.msk.bf16.vlgmr.msra.gmra.mxu1 %vm536_vm2, %v2332_v47  ;;  %3608 = vmatmul.msk.bf16.vlgmr.msrb.gmra.mxu2 %vm642_vm3, %v3910_v62 }
 0x6e3   : > { %v2307_v3 = vpop.f32.mrf.mxu0 }
 0x6eb   : > { %v2309_v44 = vpop.f32.mrf.mxu0 }
 0x6ec   : > { %v2333_v8 = vpack.c.bf16 %v2309_v44, %v2307_v3 }
 0x6ee   : > { %3603 = vmatmul.msk.bf16.gmra.mxu1 %vm536_vm2, %v2333_v8  ;;  %3609 = vmatmul.msk.bf16.gmra.mxu2 %vm642_vm3, %v3911_v21 }
 0x6f3   : > { %v2312_v49 = vpop.f32.mrf.mxu0 }
 0x6fb   : > { %v2314_v48 = vpop.f32.mrf.mxu0 }
 0x6fc   : > { %v2334_v0 = vpack.c.bf16 %v2314_v48, %v2312_v49 }
 0x6fe   : > { %3604 = vmatmul.msk.bf16.gmra.mxu1 %vm536_vm2, %v2334_v0  ;;  %3610 = vmatmul.msk.bf16.gmra.mxu2 %vm642_vm3, %v3912_v7 }
 0x701   : > { %v2206_v52 = vpop.f32.mrf.mxu2  ;;  %v2263_v19 = vpop.f32.mrf.mxu3 }
 0x702   : > { %v2264_v41 = vadd.f32 %v2263_v19, %v2206_v52 }
 0x703   : > { %v2317_v33 = vpop.f32.mrf.mxu0 }
 0x709   : > { %v2208_v58 = vpop.f32.mrf.mxu2  ;;  %v2265_v17 = vpop.f32.mrf.mxu3 }
 0x70a   : > { %v2266_v24 = vadd.f32 %v2265_v17, %v2208_v58 }
 0x70b   : > { %v2319_v35 = vpop.f32.mrf.mxu0 }
 0x70c   : > { %v2335_v9 = vpack.c.bf16 %v2319_v35, %v2317_v33 }
 0x70e   : > { %3605 = vmatmul.msk.bf16.gmra.mxu1 %vm536_vm2, %v2335_v9  ;;  %3611 = vmatmul.msk.bf16.gmra.mxu2 %vm642_vm3, %v3913_v10 }
 0x711   : > { %v2211_v11 = vpop.f32.mrf.mxu2  ;;  %v2268_v51 = vpop.f32.mrf.mxu3 }
 0x712   : > { %v2269_v6 = vadd.f32 %v2268_v51, %v2211_v11 }
 0x713   : > { %v2322_v27 = vpop.f32.mrf.mxu0 }
 0x719   : > { %v2213_v45 = vpop.f32.mrf.mxu2  ;;  %v2270_v59 = vpop.f32.mrf.mxu3 }
 0x71a   : > { %v2271_v28 = vadd.f32 %v2270_v59, %v2213_v45 }
 0x71b   : > { %v2324_v13 = vpop.f32.mrf.mxu0 }
 0x71c   : > { %v2336_v30 = vpack.c.bf16 %v2324_v13, %v2322_v27 }
 0x71e   : > { %3606 = vmatmul.msk.bf16.gmra.mxu1 %vm536_vm2, %v2336_v30  ;;  %3612 = vmatmul.msk.bf16.gmra.mxu2 %vm642_vm3, %v3914_v23 }
 0x721   : > { %v2216_v4 = vpop.f32.mrf.mxu2  ;;  %v2273_v14 = vpop.f32.mrf.mxu3 }
 0x722   : > { %v2274_v15 = vadd.f32 %v2273_v14, %v2216_v4 }
 0x723   : > { %v2327_v18 = vpop.f32.mrf.mxu0 }
 0x729   : > { %v2218_v55 = vpop.f32.mrf.mxu2  ;;  %v2275_v22 = vpop.f32.mrf.mxu3 }
 0x72a   : > { %v2276_v1 = vadd.f32 %v2275_v22, %v2218_v55 }
 0x72b   : > { %v2329_v61 = vpop.f32.mrf.mxu0 }
 0x72c   : > { %v2337_v12 = vpack.c.bf16 %v2329_v61, %v2327_v18 }
 0x72e   : > { %3607 = vmatmul.msk.bf16.gmra.mxu1 %vm536_vm2, %v2337_v12  ;;  %3613 = vmatmul.msk.bf16.gmra.mxu2 %vm642_vm3, %v3915_v40 }
 0x731   : > { %v2221_v46 = vpop.f32.mrf.mxu2  ;;  %v2278_v25 = vpop.f32.mrf.mxu3 }
 0x732   : > { %v2279_v43 = vadd.f32 %v2278_v25, %v2221_v46 }
 0x739   : > { %v2223_v20 = vpop.f32.mrf.mxu2  ;;  %v2280_v34 = vpop.f32.mrf.mxu3 }
 0x73a   : > { %v2281_v16 = vadd.f32 %v2280_v34, %v2223_v20 }
 0x73e   : > { %3626 = vmatmul.msk.bf16.vlgmr.msrb.gmra.mxu1 %vm536_vm2, %v4923_v26 }
 0x741   : > { %v2226_v47 = vpop.f32.mrf.mxu2  ;;  %v2283_v62 = vpop.f32.mrf.mxu3 }
 0x742   : > { %v2284_v3 = vadd.f32 %v2283_v62, %v2226_v47 }
 0x749   : > { %v2228_v44 = vpop.f32.mrf.mxu2  ;;  %v2285_v8 = vpop.f32.mrf.mxu3 }
 0x74a   : > { %v2286_v21 = vadd.f32 %v2285_v8, %v2228_v44  ;;  %v3916_v44 = vld [vmem:[%s5453_s11] ss:$0 sm:$0xff] }
 0x74e   : > { %3627 = vmatmul.msk.bf16.gmra.mxu1 %vm536_vm2, %v4918_v54 }
 0x751   : > { %v2231_v49 = vpop.f32.mrf.mxu2  ;;  %v2288_v48 = vpop.f32.mrf.mxu3 }
 0x752   : > { %v2289_v0 = vadd.f32 %v2288_v48, %v2231_v49 }
 0x759   : > { %v2233_v7 = vpop.f32.mrf.mxu2 }
 0x75b   : > { %v2365_v52 = vpop.f32.mrf.mxu1 }
 0x75c   : > { %v5070_v19 = vadd.f32 %v2365_v52, %v2264_v41 }
 0x75e   : > { %3628 = vmatmul.msk.bf16.gmra.mxu1 %vm536_vm2, %v4913_v57 }
 0x761   : > { %v2416_v26 = vpop.f32.mrf.mxu2 }
 0x763   : > { %v2367_v33 = vpop.f32.mrf.mxu1 }
 0x764   : > { %v5074_v58 = vadd.f32 %v2367_v33, %v2266_v24 }
 0x769   : > { %v2418_v17 = vpop.f32.mrf.mxu2 }
 0x76a   : > { %v2446_v35 = vpack.c.bf16 %v2418_v17, %v2416_v26 }
 0x76b   : > { %v2370_v9 = vpop.f32.mrf.mxu1 }
 0x76c   : > { %v5076_v10 = vadd.f32 %v2370_v9, %v2269_v6  ;;  %3614 = vmatmul.msk.bf16.vlgmr.msra.gmra.mxu3 %vm536_vm2, %v2446_v35 }
 0x76e   : > { %3629 = vmatmul.msk.bf16.gmra.mxu1 %vm536_vm2, %v4908_v50 }
 0x771   : > { %v2421_v54 = vpop.f32.mrf.mxu2 }
 0x773   : > { %v2372_v41 = vpop.f32.mrf.mxu1 }
 0x774   : > { %v5081_v11 = vadd.f32 %v2372_v41, %v2271_v28 }
 0x779   : > { %v2423_v51 = vpop.f32.mrf.mxu2 }
 0x77a   : > { %v2447_v57 = vpack.c.bf16 %v2423_v51, %v2421_v54 }
 0x77b   : > { %v2375_v27 = vpop.f32.mrf.mxu1 }
 0x77c   : > { %v5083_v45 = vadd.f32 %v2375_v27, %v2274_v15  ;;  %3615 = vmatmul.msk.bf16.gmra.mxu3 %vm536_vm2, %v2447_v57 }
 0x77e   : > { %3630 = vmatmul.msk.bf16.gmra.mxu1 %vm536_vm2, %v4903_v60 }
 0x781   : > { %v2426_v24 = vpop.f32.mrf.mxu2 }
 0x783   : > { %v2377_v6 = vpop.f32.mrf.mxu1 }
 0x784   : > { %v5088_v59 = vadd.f32 %v2377_v6, %v2276_v1 }
 0x789   : > { %v2428_v13 = vpop.f32.mrf.mxu2 }
 0x78a   : > { %v2448_v50 = vpack.c.bf16 %v2428_v13, %v2426_v24 }
 0x78b   : > { %v2380_v30 = vpop.f32.mrf.mxu1 }
 0x78c   : > { %v5090_v23 = vadd.f32 %v2380_v30, %v2279_v43  ;;  %3616 = vmatmul.msk.bf16.gmra.mxu3 %vm536_vm2, %v2448_v50  ;;  %v5148_v50 = vld [vmem:[%s5449_s7] ss:$0 sm:$0xff] }
 0x78e   : > { %3631 = vmatmul.msk.bf16.gmra.mxu1 %vm536_vm2, %v4898_v36  ;;  %v2290_v36 = vpop.f32.mrf.mxu3 }
 0x78f   : > { %v2291_v20 = vadd.f32 %v2290_v36, %v2233_v7 }
 0x791   : > { %v2431_v28 = vpop.f32.mrf.mxu2 }
 0x793   : > { %v2382_v4 = vpop.f32.mrf.mxu1 }
 0x794   : > { %v5095_v14 = vadd.f32 %v2382_v4, %v2281_v16 }
 0x799   : > { %v2433_v15 = vpop.f32.mrf.mxu2 }
 0x79a   : > { %v2449_v60 = vpack.c.bf16 %v2433_v15, %v2431_v28 }
 0x79b   : > { %v2385_v18 = vpop.f32.mrf.mxu1 }
 0x79c   : > { %v5097_v55 = vadd.f32 %v2385_v18, %v2284_v3  ;;  %3617 = vmatmul.msk.bf16.gmra.mxu3 %vm536_vm2, %v2449_v60 }
 0x7a1   : > { %v2436_v22 = vpop.f32.mrf.mxu2 }
 0x7a3   : > { %v2387_v1 = vpop.f32.mrf.mxu1 }
 0x7a4   : > { %v5100_v61 = vadd.f32 %v2387_v1, %v2286_v21 }
 0x7a9   : > { %v2438_v12 = vpop.f32.mrf.mxu2 }
 0x7aa   : > { %v2450_v40 = vpack.c.bf16 %v2438_v12, %v2436_v22 }
 0x7ab   : > { %v2390_v46 = vpop.f32.mrf.mxu1 }
 0x7ac   : > { %v5102_v25 = vadd.f32 %v2390_v46, %v2289_v0  ;;  %3618 = vmatmul.msk.bf16.gmra.mxu3 %vm536_vm2, %v2450_v40 }
 0x7b1   : > { %v2441_v43 = vpop.f32.mrf.mxu2 }
 0x7b3   : > { %v2392_v34 = vpop.f32.mrf.mxu1 }
 0x7b4   : > { %v5105_v16 = vadd.f32 %v2392_v34, %v2291_v20 }
 0x7b9   : > { %v2443_v47 = vpop.f32.mrf.mxu2 }
 0x7ba   : > { %v2451_v62 = vpack.c.bf16 %v2443_v47, %v2441_v43 }
 0x7bb   : > { %v2647_v3 = vpop.f32.mrf.mxu1 }
 0x7bc   : > { %v5110_v8 = vadd.f32 %v3916_v44, %v2647_v3  ;;  %3619 = vmatmul.msk.bf16.gmra.mxu3 %vm536_vm2, %v2451_v62 }
 0x7be   : > { %2929 = vrot.lane.b32.xlu0 %v5110_v8, %s3983_s16 }
 0x7c3   : > { %v2649_v21 = vpop.f32.mrf.mxu1 }
 0x7c4   : > { %v5115_v49 = vadd.f32 %v3916_v44, %v2649_v21 }
 0x7c6   : > { %2931 = vrot.lane.b32.xlu1 %v5115_v49, %s3983_s16 }
 0x7cb   : > { %v2652_v48 = vpop.f32.mrf.mxu1 }
 0x7cc   : > { %v5119_v0 = vadd.f32 %v3916_v44, %v2652_v48 }
 0x7ce   : > { %2933 = vrot.lane.b32.xlu2 %v5119_v0, %s3983_s16 }
 0x7d3   : > { %v2654_v7 = vpop.f32.mrf.mxu1 }
 0x7d4   : > { %v5123_v52 = vadd.f32 %v3916_v44, %v2654_v7 }
 0x7d6   : > { %2935 = vrot.lane.b32.xlu0 %v5123_v52, %s3983_s16 }
 0x7db   : > { %v2657_v26 = vpop.f32.mrf.mxu1 }
 0x7dc   : > { %v5127_v33 = vadd.f32 %v3916_v44, %v2657_v26 }
 0x7de   : > { %2937 = vrot.lane.b32.xlu1 %v5127_v33, %s3983_s16 }
 0x7e3   : > { %v2659_v17 = vpop.f32.mrf.mxu1 }
 0x7e4   : > { %v5131_v35 = vadd.f32 %v3916_v44, %v2659_v17 }
 0x7e6   : > { %2939 = vrot.lane.b32.xlu2 %v5131_v35, %s3983_s16 }
 0x7eb   : > { %v2662_v9 = vpop.f32.mrf.mxu1 }
 0x7ec   : > { %v5135_v54 = vadd.f32 %v3916_v44, %v2662_v9 }
 0x7ee   : > { %2941 = vrot.lane.b32.xlu0 %v5135_v54, %s3983_s16 }
 0x7ef   : > { %v2479_v41 = vpop.f32.mrf.mxu3 }
 0x7f0   : > { %v2509_v51 = vadd.f32 %v2479_v41, %v5070_v19 }
 0x7f2   : > { %v2521_v24 = vmul.f32 0.25, %v2509_v51 }
 0x7f3   : > { %v2664_v57 = vpop.f32.mrf.mxu1 }
 0x7f4   : > { %v5140_v27 = vadd.f32 %v3916_v44, %v2664_v57  ;;  %v2533_v30 = vadd.f32 %v5148_v50, %v2521_v24 }
 0x7f6   : > { %2943 = vrot.lane.b32.xlu1 %v5140_v27, %s3983_s16  ;;  %v2545_v60 = vmax.f32 %v2533_v30, 0.0 }
 0x7f7   : > { %v2481_v6 = vpop.f32.mrf.mxu3 }
 0x7f8   : > { %v2510_v13 = vadd.f32 %v2481_v6, %v5074_v58 }
 0x7fa   : > { %v2522_v28 = vmul.f32 0.25, %v2510_v13 }
 0x7fb   : > { %v2667_v4 = vpop.f32.mrf.mxu1 }
 0x7fc   : > { %v2534_v19 = vadd.f32 %v5148_v50, %v2522_v28  ;;  %v5152_v15 = vadd.f32 %v3916_v44, %v2667_v4 }
 0x7fe   : > { %v2546_v18 = vmax.f32 %v2534_v19, 0.0  ;;  %2945 = vrot.lane.b32.xlu2 %v5152_v15, %s3983_s16 }
 0x7ff   : > { %v2484_v22 = vpop.f32.mrf.mxu3 }
 0x800   : > { %v2557_v58 = vpack.c.bf16 %v2546_v18, %v2545_v60  ;;  %v2511_v1 = vadd.f32 %v2484_v22, %v5076_v10 }
 0x802   : > { %3620 = vmatmul.msk.bf16.vlgmr.msrb.gmra.mxu0 %vm536_vm2, %v2557_v58  ;;  %v2523_v46 = vmul.f32 0.25, %v2511_v1 }
 0x803   : > { %v2669_v12 = vpop.f32.mrf.mxu1 }
 0x804   : > { %v5158_v40 = vadd.f32 %v3916_v44, %v2669_v12  ;;  %v2535_v20 = vadd.f32 %v5148_v50, %v2523_v46 }
 0x806   : > { %2947 = vrot.lane.b32.xlu0 %v5158_v40, %s3983_s16  ;;  %v2547_v10 = vmax.f32 %v2535_v20, 0.0 }
 0x807   : > { %v2486_v36 = vpop.f32.mrf.mxu3 }
 0x808   : > { %v2512_v43 = vadd.f32 %v2486_v36, %v5081_v11 }
 0x80a   : > { %v2524_v34 = vmul.f32 0.25, %v2512_v43 }
 0x80b   : > { %v2672_v47 = vpop.f32.mrf.mxu1 }
 0x80c   : > { %v2536_v62 = vadd.f32 %v5148_v50, %v2524_v34  ;;  %v5165_v3 = vadd.f32 %v3916_v44, %v2672_v47 }
 0x80e   : > { %v2548_v21 = vmax.f32 %v2536_v62, 0.0  ;;  %2949 = vrot.lane.b32.xlu1 %v5165_v3, %s3983_s16 }
 0x80f   : > { %v2489_v48 = vpop.f32.mrf.mxu3 }
 0x810   : > { %v2558_v7 = vpack.c.bf16 %v2548_v21, %v2547_v10  ;;  %v2513_v26 = vadd.f32 %v2489_v48, %v5083_v45 }
 0x812   : > { %3621 = vmatmul.msk.bf16.gmra.mxu0 %vm536_vm2, %v2558_v7  ;;  %v2525_v9 = vmul.f32 0.25, %v2513_v26 }
 0x813   : > { %v2674_v11 = vpop.f32.mrf.mxu1 }
 0x814   : > { %v5171_v17 = vadd.f32 %v3916_v44, %v2674_v11  ;;  %v2537_v57 = vadd.f32 %v5148_v50, %v2525_v9 }
 0x816   : > { %2951 = vrot.lane.b32.xlu2 %v5171_v17, %s3983_s16  ;;  %v2549_v13 = vmax.f32 %v2537_v57, 0.0 }
 0x817   : > { %v2491_v41 = vpop.f32.mrf.mxu3 }
 0x818   : > { %v2514_v51 = vadd.f32 %v2491_v41, %v5088_v59 }
 0x81a   : > { %v2526_v24 = vmul.f32 0.25, %v2514_v51 }
 0x81c   : > { %v2538_v6 = vadd.f32 %v5148_v50, %v2526_v24 }
 0x81e   : > { %v2550_v30 = vmax.f32 %v2538_v6, 0.0 }
 0x81f   : > { %v2494_v45 = vpop.f32.mrf.mxu3 }
 0x820   : > { %v2559_v28 = vpack.c.bf16 %v2550_v30, %v2549_v13  ;;  %v2515_v4 = vadd.f32 %v2494_v45, %v5090_v23 }
 0x822   : > { %3622 = vmatmul.msk.bf16.gmra.mxu0 %vm536_vm2, %v2559_v28  ;;  %v2527_v44 = vmul.f32 0.25, %v2515_v4 }
 0x824   : > { %v2539_v18 = vadd.f32 %v5148_v50, %v2527_v44 }
 0x826   : > { %v2551_v58 = vmax.f32 %v2539_v18, 0.0 }
 0x827   : > { %v2496_v19 = vpop.f32.mrf.mxu3 }
 0x828   : > { %v2516_v60 = vadd.f32 %v2496_v19, %v5095_v14 }
 0x82a   : > { %v2528_v59 = vmul.f32 0.25, %v2516_v60 }
 0x82c   : > { %v2540_v22 = vadd.f32 %v5148_v50, %v2528_v59 }
 0x82e   : > { %v2552_v1 = vmax.f32 %v2540_v22, 0.0 }
 0x82f   : > { %v2499_v12 = vpop.f32.mrf.mxu3 }
 0x830   : > { %v2560_v46 = vpack.c.bf16 %v2552_v1, %v2551_v58  ;;  %v2517_v36 = vadd.f32 %v2499_v12, %v5097_v55 }
 0x832   : > { %3623 = vmatmul.msk.bf16.gmra.mxu0 %vm536_vm2, %v2560_v46  ;;  %v2529_v23 = vmul.f32 0.25, %v2517_v36 }
 0x834   : > { %v2541_v34 = vadd.f32 %v5148_v50, %v2529_v23 }
 0x836   : > { %v2553_v62 = vmax.f32 %v2541_v34, 0.0 }
 0x837   : > { %v2501_v43 = vpop.f32.mrf.mxu3 }
 0x838   : > { %v2518_v20 = vadd.f32 %v2501_v43, %v5100_v61 }
 0x83a   : > { %v2530_v14 = vmul.f32 0.25, %v2518_v20 }
 0x83c   : > { %v2542_v47 = vadd.f32 %v5148_v50, %v2530_v14 }
 0x83e   : > { %v2554_v10 = vmax.f32 %v2542_v47, 0.0 }
 0x83f   : > { %v2504_v21 = vpop.f32.mrf.mxu3 }
 0x840   : > { %v2561_v48 = vpack.c.bf16 %v2554_v10, %v2553_v62  ;;  %v2519_v7 = vadd.f32 %v2504_v21, %v5102_v25  ;;  %v5197_v25 = vld [vmem:[%s5452_s10] ss:$0 sm:$0xff] }
 0x842   : > { %3624 = vmatmul.msk.bf16.gmra.mxu0 %vm536_vm2, %v2561_v48  ;;  %v2531_v55 = vmul.f32 0.25, %v2519_v7 }
 0x844   : > { %v2543_v9 = vadd.f32 %v5148_v50, %v2531_v55  ;;  %v2930_v55 = vpop.permute.xlu0 %2929 }
 0x846   : > { %v2555_v51 = vmax.f32 %v2543_v9, 0.0 }
 0x847   : > { %v2506_v26 = vpop.f32.mrf.mxu3 }
 0x848   : > { %v2520_v11 = vadd.f32 %v2506_v26, %v5105_v16 }
 0x84a   : > { %v2532_v61 = vmul.f32 0.25, %v2520_v11 }
 0x84c   : > { %v2544_v41 = vadd.f32 %v5148_v50, %v2532_v61 }
 0x84e   : > { %v2556_v57 = vmax.f32 %v2544_v41, 0.0 }
 0x850   : > { %v2562_v24 = vpack.c.bf16 %v2556_v57, %v2555_v51 }
 0x852   : > { %3625 = vmatmul.msk.bf16.gmra.mxu0 %vm536_vm2, %v2562_v24 }
 0x87f   : > { %v2590_v6 = vpop.f32.mrf.mxu0 }
 0x880   : > { %v5200_v13 = vadd.f32 %v5197_v25, %v2590_v6 }
 0x882   : > { %v2677_v16 = vadd.f32 %v5110_v8, %v5200_v13 }
 0x884   : > { %v3632_v30 = vmul.f32 -1.442695, %v2677_v16 }
 0x886   : > { %3814 = vpow2.f32 %v3632_v30 }
 0x887   : > { %v2592_v50 = vpop.f32.mrf.mxu0 }
 0x888   : > { %v5205_v45 = vadd.f32 %v5197_v25, %v2592_v50 }
 0x88a   : > { %v2678_v28 = vadd.f32 %v5115_v49, %v5205_v45 }
 0x88c   : > { %v3815_v4 = vpop.eup %3814  ;;  %v3633_v44 = vmul.f32 -1.442695, %v2678_v28 }
 0x88d   : > { %v2725_v19 = vadd.f32 1.0, %v3815_v4 }
 0x88e   : > { %3816 = vpow2.f32 %v3633_v44 }
 0x88f   : > { %3818 = vrcp.f32 %v2725_v19  ;;  %v2595_v60 = vpop.f32.mrf.mxu0  ;;  %v2748_v23 = vand.u32 2147483648, %v2725_v19  ;;  %v2746_v34 = vand.u32 2147483647, %v2725_v19  ;;  %vm2742_vm10 = vweird.f32 %v2725_v19 }
 0x890   : > { %v5210_v18 = vadd.f32 %v5197_v25, %v2595_v60  ;;  %v2932_v60 = vpop.permute.xlu1 %2931 }
 0x891   : > { %v2749_v21 = vor.u32 1.1754944e-38, %v2748_v23  ;;  %vm2747_vm12 = vcmp.eq.f32.partialorder %v2746_v34, 8.507059e+37 }
 0x892   : > { %v2679_v8 = vadd.f32 %v5119_v0, %v5210_v18 }
 0x894   : > { %v3817_v59 = vpop.eup %3816  ;;  %v3634_v22 = vmul.f32 -1.442695, %v2679_v8 }
 0x895   : > { %v3819_v58 = vpop.eup %3818  ;;  %v2726_v1 = vadd.f32 1.0, %v3817_v59 }
 0x896   : > { %3820 = vpow2.f32 %v3634_v22  ;;  %v2738_v12 = vmul.f32 %v3819_v58, %v2725_v19  ;;  %vm2743_vm3 = vweird.f32 %v3819_v58 }
 0x897   : > { %3822 = vrcp.f32 %v2726_v1  ;;  %v2597_v49 = vpop.f32.mrf.mxu0  ;;  %vm2744_vm11 = vmor %vm2742_vm10, %vm2743_vm3  ;;  %v2763_v41 = vand.u32 2147483648, %v2726_v1  ;;  %v2761_v24 = vand.u32 2147483647, %v2726_v1  ;;  %vm2757_vm14 = vweird.f32 %v2726_v1 }
 0x898   : > { %v5215_v46 = vadd.f32 %v5197_v25, %v2597_v49  ;;  %v2739_v36 = vsub.f32 1.0, %v2738_v12 }
 0x899   : > { %v2764_v4 = vor.u32 1.1754944e-38, %v2763_v41  ;;  %vm2762_vm0 = vcmp.eq.f32.partialorder %v2761_v24, 8.507059e+37 }
 0x89a   : > { %v2680_v43 = vadd.f32 %v5123_v52, %v5215_v46  ;;  %v2740_v20 = vmul.f32 %v3819_v58, %v2739_v36 }
 0x89c   : > { %v3821_v0 = vpop.eup %3820  ;;  %v3635_v14 = vmul.f32 -1.442695, %v2680_v43  ;;  %v2741_v47 = vadd.f32 %v3819_v58, %v2740_v20 }
 0x89d   : > { %v3823_v62 = vpop.eup %3822  ;;  %v2727_v10 = vadd.f32 1.0, %v3821_v0 }
 0x89e   : > { %3824 = vpow2.f32 %v3635_v14  ;;  %v2745_v48 = vsel %vm2744_vm11, %v3819_v58, %v2741_v47  ;;  %v2753_v7 = vmul.f32 %v3823_v62, %v2726_v1  ;;  %vm2758_vm13 = vweird.f32 %v3823_v62 }
 0x89f   : > { %3826 = vrcp.f32 %v2727_v10  ;;  %v2600_v26 = vpop.f32.mrf.mxu0  ;;  %v5219_v11 = vsel %vm2747_vm12, %v2749_v21, %v2745_v48  ;;  %vm2759_vm15 = vmor %vm2757_vm14, %vm2758_vm13  ;;  %v2778_v1 = vand.u32 2147483648, %v2727_v10  ;;  %v2776_v36 = vand.u32 2147483647, %v2727_v10  ;;  %v2934_v21 = vpop.permute.xlu2 %2933 }
 0x8a0   : > { %v5222_v52 = vadd.f32 %v5197_v25, %v2600_v26  ;;  %v2965_v9 = vmul.f32 %v2930_v55, %v5219_v11  ;;  %v2754_v61 = vsub.f32 1.0, %v2753_v7  ;;  %vm2772_vm4 = vweird.f32 %v2727_v10 }
 0x8a1   : > { %v2779_v14 = vor.u32 1.1754944e-38, %v2778_v1  ;;  %vm2777_vm6 = vcmp.eq.f32.partialorder %v2776_v36, 8.507059e+37 }
 0x8a2   : > { %v2681_v51 = vadd.f32 %v5127_v33, %v5222_v52  ;;  %2989 = vrot.lane.b32.xlu0 %v2965_v9, %s3983_s16  ;;  %v2755_v57 = vmul.f32 %v3823_v62, %v2754_v61 }
 0x8a4   : > { %v3825_v6 = vpop.eup %3824  ;;  %v3636_v16 = vmul.f32 -1.442695, %v2681_v51  ;;  %v2756_v30 = vadd.f32 %v3823_v62, %v2755_v57 }
 0x8a5   : > { %v3827_v50 = vpop.eup %3826  ;;  %v2728_v28 = vadd.f32 1.0, %v3825_v6 }
 0x8a6   : > { %3828 = vpow2.f32 %v3636_v16  ;;  %v2760_v44 = vsel %vm2759_vm15, %v3823_v62, %v2756_v30  ;;  %v2768_v19 = vmul.f32 %v3827_v50, %v2727_v10  ;;  %vm2773_vm1 = vweird.f32 %v3827_v50 }
 0x8a7   : > { %3830 = vrcp.f32 %v2728_v28  ;;  %v2602_v33 = vpop.f32.mrf.mxu0  ;;  %v5228_v8 = vsel %vm2762_vm0, %v2764_v4, %v2760_v44  ;;  %vm2774_vm5 = vmor %vm2772_vm4, %vm2773_vm1  ;;  %v2793_v10 = vand.u32 2147483648, %v2728_v28  ;;  %v2791_v41 = vand.u32 2147483647, %v2728_v28  ;;  %v2936_v44 = vpop.permute.xlu0 %2935 }
 0x8a8   : > { %v5231_v59 = vadd.f32 %v5197_v25, %v2602_v33  ;;  %v2966_v22 = vmul.f32 %v2932_v60, %v5228_v8  ;;  %v2769_v58 = vsub.f32 1.0, %v2768_v19  ;;  %vm2787_vm8 = vweird.f32 %v2728_v28 }
 0x8a9   : > { %v2794_v30 = vor.u32 1.1754944e-38, %v2793_v10  ;;  %vm2792_vm3 = vcmp.eq.f32.partialorder %v2791_v41, 8.507059e+37 }
 0x8aa   : > { %v2682_v12 = vadd.f32 %v5131_v35, %v5231_v59  ;;  %2991 = vrot.lane.b32.xlu1 %v2966_v22, %s3983_s16  ;;  %v2770_v49 = vmul.f32 %v3827_v50, %v2769_v58 }
 0x8ac   : > { %v3829_v23 = vpop.eup %3828  ;;  %v3637_v43 = vmul.f32 -1.442695, %v2682_v12  ;;  %v2771_v20 = vadd.f32 %v3827_v50, %v2770_v49 }
 0x8ad   : > { %v3831_v34 = vpop.eup %3830  ;;  %v2729_v0 = vadd.f32 1.0, %v3829_v23 }
 0x8ae   : > { %3832 = vpow2.f32 %v3637_v43  ;;  %v2775_v47 = vsel %vm2774_vm5, %v3827_v50, %v2771_v20  ;;  %v2783_v62 = vmul.f32 %v3831_v34, %v2728_v28  ;;  %vm2788_vm7 = vweird.f32 %v3831_v34 }
 0x8af   : > { %3834 = vrcp.f32 %v2729_v0  ;;  %v2605_v35 = vpop.f32.mrf.mxu0  ;;  %v5237_v48 = vsel %vm2777_vm6, %v2779_v14, %v2775_v47  ;;  %vm2789_vm9 = vmor %vm2787_vm8, %vm2788_vm7  ;;  %v2808_v28 = vand.u32 2147483648, %v2729_v0  ;;  %v2806_v12 = vand.u32 2147483647, %v2729_v0 }
 0x8b0   : > { %v5240_v7 = vadd.f32 %v5197_v25, %v2605_v35  ;;  %v2967_v55 = vmul.f32 %v2934_v21, %v5237_v48  ;;  %v2784_v26 = vsub.f32 1.0, %v2783_v62  ;;  %vm2802_vm11 = vweird.f32 %v2729_v0  ;;  %v2938_v62 = vpop.permute.xlu1 %2937 }
 0x8b1   : > { %vm2807_vm13 = vcmp.eq.f32.partialorder %v2806_v12, 8.507059e+37 }
 0x8b2   : > { %v2683_v9 = vadd.f32 %v5135_v54, %v5240_v7  ;;  %2993 = vrot.lane.b32.xlu2 %v2967_v55, %s3983_s16  ;;  %v2785_v61 = vmul.f32 %v3831_v34, %v2784_v26 }
 0x8b4   : > { %v3833_v51 = vpop.eup %3832  ;;  %v3638_v57 = vmul.f32 -1.442695, %v2683_v9  ;;  %v2786_v24 = vadd.f32 %v3831_v34, %v2785_v61 }
 0x8b5   : > { %v3835_v6 = vpop.eup %3834  ;;  %v2730_v16 = vadd.f32 1.0, %v3833_v51 }
 0x8b6   : > { %3836 = vpow2.f32 %v3638_v57  ;;  %v2790_v50 = vsel %vm2789_vm9, %v3831_v34, %v2786_v24  ;;  %v2798_v4 = vmul.f32 %v3835_v6, %v2729_v0  ;;  %vm2803_vm10 = vweird.f32 %v3835_v6 }
 0x8b7   : > { %3838 = vrcp.f32 %v2730_v16  ;;  %v2607_v54 = vpop.f32.mrf.mxu0  ;;  %v5246_v19 = vsel %vm2792_vm3, %v2794_v30, %v2790_v50  ;;  %vm2804_vm12 = vmor %vm2802_vm11, %vm2803_vm10  ;;  %v2809_v34 = vor.u32 1.1754944e-38, %v2808_v28  ;;  %v2823_v0 = vand.u32 2147483648, %v2730_v16 }
 0x8b8   : > { %v5249_v60 = vadd.f32 %v5197_v25, %v2607_v54  ;;  %v2968_v33 = vmul.f32 %v2936_v44, %v5246_v19  ;;  %v2799_v22 = vsub.f32 1.0, %v2798_v4  ;;  %v2821_v61 = vand.u32 2147483647, %v2730_v16  ;;  %v2940_v44 = vpop.permute.xlu2 %2939 }
 0x8b9   : > { %vm2817_vm15 = vweird.f32 %v2730_v16  ;;  %v2824_v30 = vor.u32 1.1754944e-38, %v2823_v0 }
 0x8ba   : > { %v2684_v58 = vadd.f32 %v5140_v27, %v5249_v60  ;;  %2995 = vrot.lane.b32.xlu0 %v2968_v33, %s3983_s16  ;;  %v2800_v1 = vmul.f32 %v3835_v6, %v2799_v22  ;;  %vm2822_vm1 = vcmp.eq.f32.partialorder %v2821_v61, 8.507059e+37 }
 0x8bc   : > { %v3837_v49 = vpop.eup %3836  ;;  %v3639_v36 = vmul.f32 -1.442695, %v2684_v58  ;;  %v2801_v23 = vadd.f32 %v3835_v6, %v2800_v1 }
 0x8bd   : > { %v3839_v43 = vpop.eup %3838  ;;  %v2731_v20 = vadd.f32 1.0, %v3837_v49 }
 0x8be   : > { %3840 = vpow2.f32 %v3639_v36  ;;  %v2805_v14 = vsel %vm2804_vm12, %v3835_v6, %v2801_v23  ;;  %v2813_v47 = vmul.f32 %v3839_v43, %v2730_v16  ;;  %vm2818_vm14 = vweird.f32 %v3839_v43 }
 0x8bf   : > { %3842 = vrcp.f32 %v2731_v20  ;;  %v2610_v27 = vpop.f32.mrf.mxu0  ;;  %v5255_v21 = vsel %vm2807_vm13, %v2809_v34, %v2805_v14  ;;  %vm2819_vm0 = vmor %vm2817_vm15, %vm2818_vm14  ;;  %v2838_v16 = vand.u32 2147483648, %v2731_v20  ;;  %v2836_v12 = vand.u32 2147483647, %v2731_v20 }
 0x8c0   : > { %v5258_v35 = vadd.f32 %v5197_v25, %v2610_v27  ;;  %v2969_v55 = vmul.f32 %v2938_v62, %v5255_v21  ;;  %v2814_v26 = vsub.f32 1.0, %v2813_v47  ;;  %vm2832_vm5 = vweird.f32 %v2731_v20  ;;  %v2942_v27 = vpop.permute.xlu0 %2941 }
 0x8c1   : > { %v2839_v14 = vor.u32 1.1754944e-38, %v2838_v16  ;;  %vm2837_vm7 = vcmp.eq.f32.partialorder %v2836_v12, 8.507059e+37 }
 0x8c2   : > { %v2685_v10 = vadd.f32 %v5152_v15, %v5258_v35  ;;  %2997 = vrot.lane.b32.xlu1 %v2969_v55, %s3983_s16  ;;  %v2815_v9 = vmul.f32 %v3839_v43, %v2814_v26 }
 0x8c4   : > { %v3841_v41 = vpop.eup %3840  ;;  %v3640_v51 = vmul.f32 -1.442695, %v2685_v10  ;;  %v2816_v57 = vadd.f32 %v3839_v43, %v2815_v9 }
 0x8c5   : > { %v3843_v24 = vpop.eup %3842  ;;  %v2732_v6 = vadd.f32 1.0, %v3841_v41 }
 0x8c6   : > { %3844 = vpow2.f32 %v3640_v51  ;;  %v2820_v50 = vsel %vm2819_vm0, %v3839_v43, %v2816_v57  ;;  %v2828_v4 = vmul.f32 %v3843_v24, %v2731_v20  ;;  %vm2833_vm4 = vweird.f32 %v3843_v24 }
 0x8c7   : > { %3846 = vrcp.f32 %v2732_v6  ;;  %v2612_v15 = vpop.f32.mrf.mxu0  ;;  %v5264_v54 = vsel %vm2822_vm1, %v2824_v30, %v2820_v50  ;;  %vm2834_vm6 = vmor %vm2832_vm5, %vm2833_vm4  ;;  %v2853_v20 = vand.u32 2147483648, %v2732_v6  ;;  %v2851_v41 = vand.u32 2147483647, %v2732_v6 }
 0x8c8   : > { %v5267_v33 = vadd.f32 %v5197_v25, %v2612_v15  ;;  %v2970_v22 = vmul.f32 %v2940_v44, %v5264_v54  ;;  %v2829_v28 = vsub.f32 1.0, %v2828_v4  ;;  %vm2847_vm9 = vweird.f32 %v2732_v6 }
 0x8c9   : > { %v2854_v4 = vor.u32 1.1754944e-38, %v2853_v20  ;;  %vm2852_vm10 = vcmp.eq.f32.partialorder %v2851_v41, 8.507059e+37 }
 0x8ca   : > { %v2686_v58 = vadd.f32 %v5158_v40, %v5267_v33  ;;  %2999 = vrot.lane.b32.xlu2 %v2970_v22, %s3983_s16  ;;  %v2830_v1 = vmul.f32 %v3843_v24, %v2829_v28  ;;  %v2944_v22 = vpop.permute.xlu1 %2943 }
 0x8cc   : > { %v3845_v49 = vpop.eup %3844  ;;  %v3641_v36 = vmul.f32 -1.442695, %v2686_v58  ;;  %v2831_v23 = vadd.f32 %v3843_v24, %v2830_v1 }
 0x8cd   : > { %v3847_v43 = vpop.eup %3846  ;;  %v2733_v34 = vadd.f32 1.0, %v3845_v49 }
 0x8ce   : > { %3848 = vpow2.f32 %v3641_v36  ;;  %v2835_v47 = vsel %vm2834_vm6, %v3843_v24, %v2831_v23  ;;  %v2843_v62 = vmul.f32 %v3847_v43, %v2732_v6  ;;  %vm2848_vm8 = vweird.f32 %v3847_v43 }
 0x8cf   : > { %3850 = vrcp.f32 %v2733_v34  ;;  %v2615_v40 = vpop.f32.mrf.mxu0  ;;  %v5273_v55 = vsel %vm2837_vm7, %v2839_v14, %v2835_v47  ;;  %vm2849_vm3 = vmor %vm2847_vm9, %vm2848_vm8  ;;  %v2868_v6 = vand.u32 2147483648, %v2733_v34  ;;  %v2866_v36 = vand.u32 2147483647, %v2733_v34 }
 0x8d0   : > { %v5276_v26 = vadd.f32 %v5197_v25, %v2615_v40  ;;  %v2971_v0 = vmul.f32 %v2942_v27, %v5273_v55  ;;  %v2844_v10 = vsub.f32 1.0, %v2843_v62  ;;  %vm2862_vm12 = vweird.f32 %v2733_v34 }
 0x8d1   : > { %vm2867_vm14 = vcmp.eq.f32.partialorder %v2866_v36, 8.507059e+37 }
 0x8d2   : > { %v2687_v9 = vadd.f32 %v5165_v3, %v5276_v26  ;;  %3001 = vrot.lane.b32.xlu0 %v2971_v0, %s3983_s16  ;;  %v2845_v61 = vmul.f32 %v3847_v43, %v2844_v10  ;;  %v2946_v0 = vpop.permute.xlu2 %2945 }
 0x8d4   : > { %v3849_v51 = vpop.eup %3848  ;;  %v3642_v57 = vmul.f32 -1.442695, %v2687_v9  ;;  %v2846_v24 = vadd.f32 %v3847_v43, %v2845_v61 }
 0x8d5   : > { %v3851_v30 = vpop.eup %3850  ;;  %v2734_v50 = vadd.f32 1.0, %v3849_v51 }
 0x8d6   : > { %3852 = vpow2.f32 %v3642_v57  ;;  %v2850_v44 = vsel %vm2849_vm3, %v3847_v43, %v2846_v24  ;;  %v2858_v15 = vmul.f32 %v3851_v30, %v2733_v34  ;;  %vm2863_vm11 = vweird.f32 %v3851_v30 }
 0x8d7   : > { %3854 = vrcp.f32 %v2734_v50  ;;  %v2617_v3 = vpop.f32.mrf.mxu0  ;;  %v5282_v28 = vsel %vm2852_vm10, %v2854_v4, %v2850_v44  ;;  %vm2864_vm13 = vmor %vm2862_vm12, %vm2863_vm11  ;;  %v2883_v9 = vand.u32 2147483648, %v2734_v50  ;;  %v2881_v34 = vand.u32 2147483647, %v2734_v50 }
 0x8d8   : > { %v5285_v16 = vadd.f32 %v5197_v25, %v2617_v3  ;;  %v2972_v58 = vmul.f32 %v2944_v22, %v5282_v28  ;;  %v2859_v1 = vsub.f32 1.0, %v2858_v15  ;;  %v2869_v25 = vor.u32 1.1754944e-38, %v2868_v6  ;;  %v2948_v15 = vpop.permute.xlu0 %2947 }
 0x8d9   : > { %vm2877_vm0 = vweird.f32 %v2734_v50  ;;  %vm2882_vm4 = vcmp.eq.f32.partialorder %v2881_v34, 8.507059e+37 }
 0x8da   : > { %v2688_v12 = vadd.f32 %v5171_v17, %v5285_v16  ;;  %3003 = vrot.lane.b32.xlu1 %v2972_v58, %s3983_s16  ;;  %v2860_v49 = vmul.f32 %v3851_v30, %v2859_v1 }
 0x8dc   : > { %v3853_v23 = vpop.eup %3852  ;;  %v3643_v43 = vmul.f32 -1.442695, %v2688_v12  ;;  %v2861_v14 = vadd.f32 %v3851_v30, %v2860_v49 }
 0x8dd   : > { %v3855_v47 = vpop.eup %3854  ;;  %v2735_v62 = vadd.f32 1.0, %v3853_v23 }
 0x8de   : > { %3856 = vpow2.f32 %v3643_v43  ;;  %v2865_v27 = vsel %vm2864_vm13, %v3851_v30, %v2861_v14  ;;  %v2873_v40 = vmul.f32 %v3855_v47, %v2734_v50  ;;  %vm2878_vm15 = vweird.f32 %v3855_v47  ;;  %v2950_v14 = vpop.permute.xlu1 %2949 }
 0x8df   : > { %3858 = vrcp.f32 %v2735_v62  ;;  %v5291_v17 = vsel %vm2867_vm14, %v2869_v25, %v2865_v27  ;;  %vm2879_vm1 = vmor %vm2877_vm0, %vm2878_vm15  ;;  %v2884_v30 = vor.u32 1.1754944e-38, %v2883_v9  ;;  %v2898_v1 = vand.u32 2147483648, %v2735_v62 }
 0x8e0   : > { %v2973_v10 = vmul.f32 %v2946_v0, %v5291_v17  ;;  %v2874_v20 = vsub.f32 1.0, %v2873_v40  ;;  %v2896_v50 = vand.u32 2147483647, %v2735_v62  ;;  %vm2892_vm6 = vweird.f32 %v2735_v62 }
 0x8e1   : > { %v2899_v36 = vor.u32 1.1754944e-38, %v2898_v1 }
 0x8e2   : > { %3005 = vrot.lane.b32.xlu2 %v2973_v10, %s3983_s16  ;;  %v2875_v61 = vmul.f32 %v3855_v47, %v2874_v20  ;;  %vm2897_vm8 = vcmp.eq.f32.partialorder %v2896_v50, 8.507059e+37 }
 0x8e4   : > { %v3857_v41 = vpop.eup %3856  ;;  %v2876_v51 = vadd.f32 %v3855_v47, %v2875_v61  ;;  %v2952_v61 = vpop.permute.xlu2 %2951 }
 0x8e5   : > { %v3859_v57 = vpop.eup %3858  ;;  %v2736_v24 = vadd.f32 1.0, %v3857_v41 }
 0x8e6   : > { %v2880_v4 = vsel %vm2879_vm1, %v3855_v47, %v2876_v51  ;;  %v2888_v44 = vmul.f32 %v3859_v57, %v2735_v62  ;;  %vm2893_vm5 = vweird.f32 %v3859_v57 }
 0x8e7   : > { %3860 = vrcp.f32 %v2736_v24  ;;  %v5295_v22 = vsel %vm2882_vm4, %v2884_v30, %v2880_v4  ;;  %vm2894_vm7 = vmor %vm2892_vm6, %vm2893_vm5  ;;  %v2913_v40 = vand.u32 2147483648, %v2736_v24  ;;  %v2911_v10 = vand.u32 2147483647, %v2736_v24 }
 0x8e8   : > { %v2974_v3 = vmul.f32 %v2948_v15, %v5295_v22  ;;  %v2889_v58 = vsub.f32 1.0, %v2888_v44  ;;  %vm2907_vm3 = vweird.f32 %v2736_v24 }
 0x8e9   : > { %v2914_v62 = vor.u32 1.1754944e-38, %v2913_v40  ;;  %vm2912_vm11 = vcmp.eq.f32.partialorder %v2911_v10, 8.507059e+37 }
 0x8ea   : > { %3007 = vrot.lane.b32.xlu0 %v2974_v3, %s3983_s16  ;;  %v2890_v6 = vmul.f32 %v3859_v57, %v2889_v58 }
 0x8ec   : > { %v2891_v12 = vadd.f32 %v3859_v57, %v2890_v6 }
 0x8ed   : > { %v3861_v49 = vpop.eup %3860 }
 0x8ee   : > { %v2895_v23 = vsel %vm2894_vm7, %v3859_v57, %v2891_v12  ;;  %v2903_v43 = vmul.f32 %v3861_v49, %v2736_v24  ;;  %vm2908_vm9 = vweird.f32 %v3861_v49 }
 0x8ef   : > { %v5299_v47 = vsel %vm2897_vm8, %v2899_v36, %v2895_v23  ;;  %vm2909_vm10 = vmor %vm2907_vm3, %vm2908_vm9 }
 0x8f0   : > { %v2975_v25 = vmul.f32 %v2950_v14, %v5299_v47  ;;  %v2904_v27 = vsub.f32 1.0, %v2903_v43 }
 0x8f2   : > { %3009 = vrot.lane.b32.xlu1 %v2975_v25, %s3983_s16  ;;  %v2905_v0 = vmul.f32 %v3861_v49, %v2904_v27 }
 0x8f4   : > { %v2906_v20 = vadd.f32 %v3861_v49, %v2905_v0 }
 0x8f6   : > { %v2910_v9 = vsel %vm2909_vm10, %v3861_v49, %v2906_v20 }
 0x8f7   : > { %v5303_v34 = vsel %vm2912_vm11, %v2914_v62, %v2910_v9 }
 0x8f8   : > { %v2976_v41 = vmul.f32 %v2952_v61, %v5303_v34 }
 0x8fa   : > { %3011 = vrot.lane.b32.xlu2 %v2976_v41, %s3983_s16  ;;  %s404_s16 = sand.u32 1, %s3973_s22  }
 0x8fb   : > { %s3690_s15 = smul.u32 96, %s404_s16 }
 0x8fd   : > { %s5374_s17 = scalar_lea.vmem [#allocation2], %s3690_s15  ;;  %s3206_s15 = scalar_lea.sflag [#allocation3], %s404_s16 }
 0x8fe   : > { %s3218_s28 = sshll.u32 %s5374_s17, 4  ;;  %s3219_s28 = int_to_ptr.vmem [resolvable:$true] %s3218_s28 }
 0x90c   : > { %v2994_v51 = vpop.permute.xlu2 %2993 }
 0x90d   : > { %v3027_v57 = vadd.f32 %v2994_v51, %v5210_v18  ;;  %v3123_v51 = vmul.f32 %v5237_v48, %v4880_v37  ;;  %v3121_v37 = vmul.f32 %v5219_v11, %v4893_v32  ;;  %v3129_v32 = vmul.f32 %v5291_v17, %v4853_v39 }
 0x90e   : > { %v3125_v39 = vmul.f32 %v5255_v21, %v4834_v38  ;;  %v3127_v38 = vmul.f32 %v5273_v55, %v4840_v53  ;;  %v3058_v53 = vsub.f32 1.0, %v5295_v22 }
 0x90f   : > { %3862 = vtanh.f32 %v3027_v57 }
 0x914   : > { %v2990_v30 = vpop.permute.xlu0 %2989 }
 0x915   : > { %v3863_v4 = vpop.eup %3862  ;;  %v3025_v44 = vadd.f32 %v2990_v30, %v5200_v13  ;;  %v3054_v30 = vsub.f32 1.0, %v5264_v54 }
 0x916   : > { %3077 = vrot.lane.b32.xlu2 %v3863_v4, %s5467_s29 }
 0x917   : > { %3864 = vtanh.f32 %v3025_v44 }
 0x91c   : > { %v2992_v24 = vpop.permute.xlu1 %2991 }
 0x91d   : > { %v3865_v15 = vpop.eup %3864  ;;  %v3026_v3 = vadd.f32 %v2992_v24, %v5205_v45 }
 0x91e   : > { %3073 = vrot.lane.b32.xlu0 %v3865_v15, %s5467_s29  ;;  %v3049_v15 = vsub.f32 1.0, %v5219_v11 }
 0x91f   : > { %3866 = vtanh.f32 %v3026_v3 }
 0x924   : > { %v3000_v58 = vpop.permute.xlu2 %2999 }
 0x925   : > { %v3867_v1 = vpop.eup %3866  ;;  %v3030_v6 = vadd.f32 %v3000_v58, %v5231_v59 }
 0x926   : > { %3075 = vrot.lane.b32.xlu1 %v3867_v1, %s5467_s29  ;;  %v3050_v1 = vsub.f32 1.0, %v5228_v8 }
 0x927   : > { %3868 = vtanh.f32 %v3030_v6 }
 0x92c   : > { %v2996_v18 = vpop.permute.xlu0 %2995 }
 0x92d   : > { %v3869_v50 = vpop.eup %3868  ;;  %v3028_v13 = vadd.f32 %v2996_v18, %v5215_v46 }
 0x92e   : > { %3083 = vrot.lane.b32.xlu2 %v3869_v50, %s5467_s29  ;;  %v3057_v50 = vsub.f32 1.0, %v5291_v17 }
 0x92f   : > { %3870 = vtanh.f32 %v3028_v13 }
 0x934   : > { %v2998_v12 = vpop.permute.xlu1 %2997 }
 0x935   : > { %v3871_v49 = vpop.eup %3870  ;;  %v3029_v45 = vadd.f32 %v2998_v12, %v5222_v52 }
 0x936   : > { %3079 = vrot.lane.b32.xlu0 %v3871_v49, %s5467_s29  ;;  %v3052_v49 = vsub.f32 1.0, %v5246_v19 }
 0x937   : > { %3872 = vtanh.f32 %v3029_v45 }
 0x93c   : > { %v3006_v36 = vpop.permute.xlu2 %3005 }
 0x93d   : > { %v3873_v23 = vpop.eup %3872  ;;  %v3033_v59 = vadd.f32 %v3006_v36, %v5258_v35 }
 0x93e   : > { %3081 = vrot.lane.b32.xlu1 %v3873_v23, %s5467_s29  ;;  %v3053_v23 = vsub.f32 1.0, %v5255_v21 }
 0x93f   : > { %3874 = vtanh.f32 %v3033_v59 }
 0x944   : > { %v3002_v43 = vpop.permute.xlu0 %3001 }
 0x945   : > { %v3875_v14 = vpop.eup %3874  ;;  %v3031_v46 = vadd.f32 %v3002_v43, %v5240_v7 }
 0x946   : > { %3089 = vrot.lane.b32.xlu2 %v3875_v14, %s5467_s29  ;;  %v3060_v14 = vsub.f32 1.0, %v5303_v34 }
 0x947   : > { %3876 = vtanh.f32 %v3031_v46 }
 0x94c   : > { %v3004_v25 = vpop.permute.xlu1 %3003 }
 0x94d   : > { %v3877_v27 = vpop.eup %3876  ;;  %v3032_v52 = vadd.f32 %v3004_v25, %v5249_v60 }
 0x94e   : > { %3085 = vrot.lane.b32.xlu0 %v3877_v27, %s5467_s29  ;;  %v3055_v27 = vsub.f32 1.0, %v5273_v55 }
 0x94f   : > { %3878 = vtanh.f32 %v3032_v52 }
 0x954   : > { %v3012_v40 = vpop.permute.xlu2 %3011 }
 0x955   : > { %v3879_v0 = vpop.eup %3878  ;;  %v3036_v35 = vadd.f32 %v3012_v40, %v5285_v16  ;;  %v3051_v16 = vsub.f32 1.0, %v5237_v48 }
 0x956   : > { %3087 = vrot.lane.b32.xlu1 %v3879_v0, %s5467_s29  ;;  %v3056_v0 = vsub.f32 1.0, %v5282_v28 }
 0x957   : > { %3880 = vtanh.f32 %v3036_v35 }
 0x95c   : > { %v3008_v10 = vpop.permute.xlu0 %3007 }
 0x95d   : > { %v3881_v20 = vpop.eup %3880  ;;  %v3034_v7 = vadd.f32 %v3008_v10, %v5267_v33 }
 0x95e   : > { %3095 = vrot.lane.b32.xlu2 %v3881_v20, %s5467_s29 }
 0x95f   : > { %3882 = vtanh.f32 %v3034_v7 }
 0x964   : > { %v3010_v62 = vpop.permute.xlu1 %3009 }
 0x965   : > { %v3883_v9 = vpop.eup %3882  ;;  %v3035_v60 = vadd.f32 %v3010_v62, %v5276_v26  ;;  %v3126_v26 = vmul.f32 %v5264_v54, %v4871_v31  ;;  %v3122_v31 = vmul.f32 %v5228_v8, %v4891_v63  ;;  %v3124_v63 = vmul.f32 %v5246_v19, %v4882_v29 }
 0x966   : > { %3091 = vrot.lane.b32.xlu0 %v3883_v9, %s5467_s29  ;;  %v3132_v29 = vmul.f32 %v5303_v34, %v4864_v56  ;;  %v3128_v56 = vmul.f32 %v5282_v28, %v4842_v5  ;;  %v3130_v5 = vmul.f32 %v5295_v22, %v4851_v2  ;;  %v3059_v62 = vsub.f32 1.0, %v5299_v47 }
 0x967   : > { %3884 = vtanh.f32 %v3035_v60  ;;  %v3131_v60 = vmul.f32 %v5299_v47, %v4862_v42 }
 0x96d   : > { %v3885_v61 = vpop.eup %3884 }
 0x96e   : > { %3093 = vrot.lane.b32.xlu1 %v3885_v61, %s5467_s29 }
 0x970   : > { %v3078_v41 = vpop.permute.xlu2 %3077 }
 0x971   : > { %v3111_v33 = vmul.f32 %v3078_v41, %v3051_v16 }
 0x973   : > { %v3135_v57 = vadd.f32 %v3123_v51, %v3111_v33 }
 0x975   : > { %3161 = vrot.lane.b32.xlu2 %v3135_v57, %s5467_s29 }
 0x988   : > { %v3084_v4 = vpop.permute.xlu2 %3083 }
 0x989   : > { %v3114_v44 = vmul.f32 %v3084_v4, %v3054_v30 }
 0x98b   : > { %v3138_v24 = vadd.f32 %v3126_v26, %v3114_v44 }
 0x98d   : > { %3167 = vrot.lane.b32.xlu2 %v3138_v24, %s5467_s29 }
 0x990   : > { %v3074_v3 = vpop.permute.xlu0 %3073 }
 0x991   : > { %v3109_v48 = vmul.f32 %v3074_v3, %v3049_v15 }
 0x993   : > { %v3133_v58 = vadd.f32 %v3121_v37, %v3109_v48 }
 0x995   : > { %3157 = vrot.lane.b32.xlu0 %v3133_v58, %s5467_s29 }
 0x998   : > { %v3076_v6 = vpop.permute.xlu1 %3075 }
 0x999   : > { %v3110_v54 = vmul.f32 %v3076_v6, %v3050_v1 }
 0x99b   : > { %v3134_v18 = vadd.f32 %v3122_v31, %v3110_v54 }
 0x99d   : > { %3159 = vrot.lane.b32.xlu1 %v3134_v18, %s5467_s29 }
 0x9a0   : > { %v3090_v13 = vpop.permute.xlu2 %3089 }
 0x9a1   : > { %v3117_v11 = vmul.f32 %v3090_v13, %v3057_v50 }
 0x9a3   : > { %v3141_v12 = vadd.f32 %v3129_v32, %v3117_v11 }
 0x9a5   : > { %3173 = vrot.lane.b32.xlu2 %v3141_v12, %s5467_s29 }
 0x9a8   : > { %v3080_v45 = vpop.permute.xlu0 %3079 }
 0x9a9   : > { %v3112_v8 = vmul.f32 %v3080_v45, %v3052_v49 }
 0x9ab   : > { %v3136_v36 = vadd.f32 %v3124_v63, %v3112_v8 }
 0x9ad   : > { %3163 = vrot.lane.b32.xlu0 %v3136_v36, %s5467_s29 }
 0x9b0   : > { %v3082_v59 = vpop.permute.xlu1 %3081 }
 0x9b1   : > { %v3113_v17 = vmul.f32 %v3082_v59, %v3053_v23 }
 0x9b3   : > { %v3137_v43 = vadd.f32 %v3125_v39, %v3113_v17 }
 0x9b5   : > { %3165 = vrot.lane.b32.xlu1 %v3137_v43, %s5467_s29 }
 0x9b8   : > { %v3096_v46 = vpop.permute.xlu2 %3095 }
 0x9b9   : > { %v3120_v19 = vmul.f32 %v3096_v46, %v3060_v14 }
 0x9bb   : > { %v3144_v25 = vadd.f32 %v3132_v29, %v3120_v19 }
 0x9bd   : > { %3179 = vrot.lane.b32.xlu2 %v3144_v25, %s5467_s29 }
 0x9c0   : > { %v3086_v52 = vpop.permute.xlu0 %3085 }
 0x9c1   : > { %v3115_v21 = vmul.f32 %v3086_v52, %v3055_v27 }
 0x9c3   : > { %v3139_v40 = vadd.f32 %v3127_v38, %v3115_v21 }
 0x9c5   : > { %3169 = vrot.lane.b32.xlu0 %v3139_v40, %s5467_s29 }
 0x9c8   : > { %v3088_v35 = vpop.permute.xlu1 %3087 }
 0x9c9   : > { %v3116_v34 = vmul.f32 %v3088_v35, %v3056_v0 }
 0x9cb   : > { %v3140_v10 = vadd.f32 %v3128_v56, %v3116_v34 }
 0x9cd   : > { %3171 = vrot.lane.b32.xlu1 %v3140_v10, %s5467_s29 }
 0x9cf   : > { %v3162_v20 = vpop.permute.xlu2 %3161 }
 0x9d0   : > { %3195 = vst.msk [vmem:[%s5374_s17 + $0x10] sm:$0xff] %vm536_vm2, %v3162_v20 }
 0x9d8   : > { %v3092_v55 = vpop.permute.xlu0 %3091 }
 0x9d9   : > { %v3118_v28 = vmul.f32 %v3092_v55, %v3058_v53 }
 0x9db   : > { %v3142_v7 = vadd.f32 %v3130_v5, %v3118_v28 }
 0x9dd   : > { %3175 = vrot.lane.b32.xlu0 %v3142_v7, %s5467_s29 }
 0x9e0   : > { %v3094_v9 = vpop.permute.xlu1 %3093 }
 0x9e1   : > { %v3119_v61 = vmul.f32 %v3094_v9, %v3059_v62 }
 0x9e3   : > { %v3143_v16 = vadd.f32 %v3131_v60, %v3119_v61 }
 0x9e5   : > { %3177 = vrot.lane.b32.xlu1 %v3143_v16, %s5467_s29  ;;  %s3220_s29 = sshll.u32 %s3217_s26, 4  ;;  %s3221_s29 = int_to_ptr.hbm [resolvable:$true] %s3220_s29 }
 0x9e6   : > { %s3933_s0 = sshra.s32 %s3221_s29, 4  ;;  %s3934_s0 = int_to_ptr.hbm [resolvable:$true] %s3933_s0 }
 0x9e7   : > { %v3168_v2 = vpop.permute.xlu2 %3167  ;;  %s3935_s1 = scalar_lea.hbm %s3934_s0, 96  ;;  %p3940_p0 = scmp.lt.s32.totalorder %s3934_s0, %s5454_s12 }
 0x9e8   : > { %3198 = vst.msk [vmem:[%s5374_s17 + $0x28] sm:$0xff] %vm536_vm2, %v3168_v2  ;;  %p3936_p11 = scmp.ne.s32.totalorder %s3934_s0, %s3935_s1  ;;  %p3941_p1 = scmp.lt.s32.totalorder %s3939_s18, %s3935_s1 }
 0x9ea   : > { %p3937_p12 = pnand %p3936_p11, %p4091_p5  ;;  %p3942_p2 = por %p3941_p1, %p3940_p0 }
 0x9ec   : > { %p3938_p13 = pneg %p3937_p12 }
 0x9ee   : > { %p3943_p3 = pnand %p3942_p2, %p3938_p13 }
 0x9ff   : > { %v3174_v22 = vpop.permute.xlu2 %3173 }
 0xa00   : > { %3201 = vst.msk [vmem:[%s5374_s17 + $0x40] sm:$0xff] %vm536_vm2, %v3174_v22 }
 0xa07   : > { %v3158_v41 = vpop.permute.xlu0 %3157 }
 0xa08   : > { %3193 = vst.msk [vmem:[%s5374_s17] sm:$0xff] %vm536_vm2, %v3158_v41 }
 0xa0f   : > { %v3160_v51 = vpop.permute.xlu1 %3159 }
 0xa10   : > { %3194 = vst.msk [vmem:[%s5374_s17 + $0x8] sm:$0xff] %vm536_vm2, %v3160_v51 }
 0xa17   : > { %v3180_v42 = vpop.permute.xlu2 %3179 }
 0xa18   : > { %3204 = vst.msk [vmem:[%s5374_s17 + $0x58] sm:$0xff] %vm536_vm2, %v3180_v42 }
 0xa1f   : > { %v3164_v47 = vpop.permute.xlu0 %3163 }
 0xa20   : > { %3196 = vst.msk [vmem:[%s5374_s17 + $0x18] sm:$0xff] %vm536_vm2, %v3164_v47 }
 0xa27   : > { %v3166_v33 = vpop.permute.xlu1 %3165 }
 0xa28   : > { %3197 = vst.msk [vmem:[%s5374_s17 + $0x20] sm:$0xff] %vm536_vm2, %v3166_v33 }
 0xa37   : > { %v3170_v57 = vpop.permute.xlu0 %3169 }
 0xa38   : > { %3199 = vst.msk [vmem:[%s5374_s17 + $0x30] sm:$0xff] %vm536_vm2, %v3170_v57 }
 0xa3f   : > { %v3172_v30 = vpop.permute.xlu1 %3171 }
 0xa40   : > { %3200 = vst.msk [vmem:[%s5374_s17 + $0x38] sm:$0xff] %vm536_vm2, %v3172_v30 }
 0xa4f   : > { %v3176_v4 = vpop.permute.xlu0 %3175 }
 0xa50   : > { %3202 = vst.msk [vmem:[%s5374_s17 + $0x48] sm:$0xff] %vm536_vm2, %v3176_v4 }
 0xa57   : > { %v3178_v26 = vpop.permute.xlu1 %3177 }
 0xa58   : > { %3203 = vst.msk [vmem:[%s5374_s17 + $0x50] sm:$0xff] %vm536_vm2, %v3178_v26 }
 0xa59   : > { %3946 = shalt.err (!%p3943_p3)
}
 0xa5a   : > { %s3986_s16 = smov 128   ;;  %s3987_s17 = smov 8  }
 0xa5b   : > { %3693 = dma.vmem_to_hbm [thread:$0]  (%p4091_p5), %s3219_s28, 1536, %s3221_s29, %s3206_s15, %s3986_s16, %s3986_s16, %s3987_s17  }
 0xa5c PF: > { %p3699_p4 = scmp.ge.s32.totalorder %s3981_s24, 2  ;;  %s3235_s25 = sand.u32 1, %s3969_s21  }
 0xa5d   : > { %s3236_s20 = scalar_lea.sflag [#allocation3], %s3235_s25 }
 0xa5e   : > { %p3696_p7 = pnand %p3699_p4, %p4095_p6 }
 0xa60   : > { %p3697_p8 = pneg %p3696_p7 }
 0xa62   : > { %3964 = dma.done.wait (%p3697_p8), %s3236_s20, 1536  }
 0xa63   : > { %3966 = vsyncadd (%p3697_p8), %s3236_s20, 4294965760  ;;  %p22_p9 = scmp.ge.s32.totalorder %s4078_s27, 4   ;;  %s5468_s21 = smov %s3973_s22 }
 0xa64   : > { %s5469_s22 = smov %s3977_s23  ;;  %s5470_s23 = smov %s4089_s30 }
 0xa65   : > { %s5471_s24 = smov %s4078_s27  ;;  %24 = sbr.rel (!%p22_p9) target bundleno = 6 (0x6), region = 109 }
 0xa6a   :  { %3242 = vsyncpa [#allocation3], 1 }
 0xa6b   :  { %3244 = vsyncpa [#allocation3 + $0x1], 1 }

</bundles_post_ra>
